<compile_context>
chip_gen: v5e
topology: v5e:2x2
jax: 0.10.0
libtpu: 0.0.40
codegen_flags: <defaults>
</compile_context>

<pallas_src>
import jax
import jax.numpy as jnp
from jax.experimental import pallas as pl
from jax.experimental.pallas import tpu as pltpu

ACTION_SIZE = 3
ACTION_PAD_K = 16                   # pad tiny action K-dim to one bf16 sublane tile
HIDDEN_SIZE = 128
STATE_FLAT = 3 * 32 * 32            # 3072
OUTPUT_SIZE = 32 * 32 * 3           # 3072
BATCH = 16


def world_model_kernel(
    state_ref,      # (B, 3072)          f32   (block t; cast to bf16 in-kernel)
    action_ref,     # (B, ACTION_PAD_K)  bf16  (block t; zero-padded beyond ACTION_SIZE)
    c0_ref,         # (B, H)             f32   (initial cell state, constant block)
    wst_ref,        # (3072, H)          bf16
    wgs_ref,        # (H, 4H)            bf16  (w_input[:H, :])
    wact_ref,       # (ACTION_PAD_K, 4H) bf16  (folded action->gates, zero pad rows)
    bfold_ref,      # (1, 4H)            f32   (all front-end biases folded)
    wout_ref,       # (H, 3072)          bf16
    bout_ref,       # (1, 3072)          f32
    pred_ref,       # out: (B, 3072)     f32   (block t)
    h_out_ref,      # out: (B, H)        f32   (constant block; final step persists)
    c_out_ref,      # out: (B, H)        f32   (constant block; final step persists)
    c_scratch,      # VMEM (B, H)        f32   (cell state carried across timesteps)
):
    H = HIDDEN_SIZE
    t = pl.program_id(0)

    @pl.when(t == 0)
    def _():
        c_scratch[...] = c0_ref[...]

    # --- LSTM-style front-end (bf16 MXU, f32 accumulate) ---
    state_bf16 = state_ref[...].astype(jnp.bfloat16)                   # in-VMEM cast
    state_proj = jnp.dot(state_bf16, wst_ref[...],
                         preferred_element_type=jnp.float32)           # (B, H) f32

    # gates = state_proj @ W_in[:H] + action @ W_act_fold + b_fold
    gates = jnp.dot(state_proj.astype(jnp.bfloat16), wgs_ref[...],
                    preferred_element_type=jnp.float32)
    gates = gates + jnp.dot(action_ref[...], wact_ref[...],
                            preferred_element_type=jnp.float32)
    gates = gates + bfold_ref[...]                                      # (B, 4H) f32

    i_t = jax.nn.sigmoid(gates[:, 0 * H:1 * H])
    f_t = jax.nn.sigmoid(gates[:, 1 * H:2 * H])
    o_t = jax.nn.sigmoid(gates[:, 2 * H:3 * H])
    g_t = jnp.tanh(gates[:, 3 * H:4 * H])

    c_t = f_t * c_scratch[...] + i_t * g_t
    h_t = o_t * jnp.tanh(c_t)
    c_scratch[...] = c_t

    # --- output projection ---
    pred_ref[...] = jnp.dot(h_t.astype(jnp.bfloat16), wout_ref[...],
                            preferred_element_type=jnp.float32) + bout_ref[...]

    # Constant-index output blocks stay VMEM-resident across the grid; only the
    # final timestep's value is written back to HBM.
    h_out_ref[...] = h_t
    c_out_ref[...] = c_t


def init_params(key, action_size=ACTION_SIZE, hidden_size=HIDDEN_SIZE,
                output_size=OUTPUT_SIZE):
    """Deterministic synthetic params. Stored as (in, out) matrices + (1, out) biases."""
    ks = jax.random.split(key, 8)

    def lin(kw, kb, fan_in, fan_out):
        # torch.nn.Linear default init: U(-1/sqrt(fan_in), 1/sqrt(fan_in))
        bound = 1.0 / (fan_in ** 0.5)
        w = jax.random.uniform(kw, (fan_in, fan_out), jnp.float32, -bound, bound)
        b = jax.random.uniform(kb, (1, fan_out), jnp.float32, -bound, bound)
        return w, b

    w_state, b_state = lin(ks[0], ks[1], STATE_FLAT, hidden_size)
    w_action, b_action = lin(ks[2], ks[3], action_size, hidden_size)
    w_input, b_input = lin(ks[4], ks[5], hidden_size * 2, hidden_size * 4)
    w_output, b_output = lin(ks[6], ks[7], hidden_size, output_size)
    return dict(w_state=w_state, b_state=b_state,
                w_action=w_action, b_action=b_action,
                w_input=w_input, b_input=b_input,
                w_output=w_output, b_output=b_output)


def fold_params(params):
    """One-time offline fold + bf16 cast of the kernel-side parameters."""
    H = HIDDEN_SIZE
    w_input = params["w_input"]                       # (2H, 4H)
    w_gate_state = w_input[:H, :]                     # (H, 4H)  state-proj half
    w_gate_action = w_input[H:, :]                    # (H, 4H)  action-proj half

    # Fold the action linear directly into the gate matmul (f32 fold, bf16 store).
    w_act_fold = params["w_action"] @ w_gate_action                     # (A, 4H) f32
    w_act_fold_pad = jnp.zeros((ACTION_PAD_K, 4 * H), jnp.float32)
    w_act_fold_pad = w_act_fold_pad.at[:ACTION_SIZE, :].set(w_act_fold)

    # Fold all three front-end biases into one gate bias (kept f32).
    b_fold = (params["b_state"] @ w_gate_state
              + params["b_action"] @ w_gate_action
              + params["b_input"])                    # (1, 4H)

    return dict(
        w_state=params["w_state"].astype(jnp.bfloat16),         # (3072, H) bf16
        w_gate_state=w_gate_state.astype(jnp.bfloat16),          # (H, 4H)   bf16
        w_act_fold=w_act_fold_pad.astype(jnp.bfloat16),          # (16, 4H)  bf16
        b_fold=b_fold,                                           # (1, 4H)   f32
        w_output=params["w_output"].astype(jnp.bfloat16),        # (H, 3072) bf16
        b_output=params["b_output"],                             # (1, 3072) f32
    )


def _run_pallas(folded, states_flat, actions_pad, c_prev):
    """states_flat: (T, B, 3072) f32; actions_pad: (T, B, 16) bf16; c_prev: (B, H) f32."""
    T, B, _ = states_flat.shape
    H = HIDDEN_SIZE

    preds, h_t, c_t = pl.pallas_call(
        world_model_kernel,
        grid=(T,),
        out_shape=(
            jax.ShapeDtypeStruct((T, B, OUTPUT_SIZE), jnp.float32),
            jax.ShapeDtypeStruct((B, H), jnp.float32),
            jax.ShapeDtypeStruct((B, H), jnp.float32),
        ),
        in_specs=[
            pl.BlockSpec((None, B, STATE_FLAT), lambda t: (t, 0, 0)),     # state[t]
            pl.BlockSpec((None, B, ACTION_PAD_K), lambda t: (t, 0, 0)),   # action[t]
            pl.BlockSpec((B, H), lambda t: (0, 0)),                       # c_prev
            pl.BlockSpec((STATE_FLAT, H), lambda t: (0, 0)),              # w_state
            pl.BlockSpec((H, 4 * H), lambda t: (0, 0)),                   # w_gate_state
            pl.BlockSpec((ACTION_PAD_K, 4 * H), lambda t: (0, 0)),        # w_act_fold
            pl.BlockSpec((1, 4 * H), lambda t: (0, 0)),                   # b_fold
            pl.BlockSpec((H, OUTPUT_SIZE), lambda t: (0, 0)),             # w_output
            pl.BlockSpec((1, OUTPUT_SIZE), lambda t: (0, 0)),             # b_output
        ],
        out_specs=(
            pl.BlockSpec((None, B, OUTPUT_SIZE), lambda t: (t, 0, 0)),    # pred[t]
            pl.BlockSpec((B, H), lambda t: (0, 0)),                       # final h
            pl.BlockSpec((B, H), lambda t: (0, 0)),                       # final c
        ),
        scratch_shapes=[pltpu.VMEM((B, H), jnp.float32)],
        compiler_params=pltpu.CompilerParams(
            dimension_semantics=("arbitrary",),     # sequential carry in c_scratch
            vmem_limit_bytes=16 << 20,
        ),
    )(
        states_flat, actions_pad, c_prev,
        folded["w_state"], folded["w_gate_state"],
        folded["w_act_fold"], folded["b_fold"],
        folded["w_output"], folded["b_output"],
    )
    return preds, h_t, c_t


def _prep_inputs(states, actions, hidden):
    """states: (T, B, 3, 32, 32); actions: (T, B, A)."""
    T, B = states.shape[0], states.shape[1]
    H = HIDDEN_SIZE
    states_flat = states.reshape(T, B, -1).astype(jnp.float32)        # no bf16 cast here
    actions_pad = jnp.zeros((T, B, ACTION_PAD_K), jnp.bfloat16)
    actions_pad = actions_pad.at[:, :, :actions.shape[-1]].set(actions.astype(jnp.bfloat16))
    if hidden is None:
        c_prev = jnp.zeros((B, H), jnp.float32)
    else:
        # Like the PyTorch module, h_prev is unused by the gates; only c carries state.
        c_prev = hidden[1].reshape(B, H).astype(jnp.float32)
    return states_flat, actions_pad, c_prev


@jax.jit
def world_model_forward(folded, state, action, hidden=None):
    """Single step. state: (B, 3, 32, 32) NCHW; action: (B, action_size)."""
    states_flat, actions_pad, c_prev = _prep_inputs(state[None], action[None], hidden)
    preds, h_t, c_t = _run_pallas(folded, states_flat, actions_pad, c_prev)
    new_hidden = (h_t[None, :, :], c_t[None, :, :])      # (1, B, H) each, like torch
    return preds[0], new_hidden


@jax.jit
def world_model_rollout(folded, states, actions, hidden=None):
    """T fused steps in ONE pallas_call (weights DMA'd once, c carried in VMEM).

    states: (T, B, 3, 32, 32); actions: (T, B, action_size).
    Returns preds (T, B, 3072) and the final hidden (1,B,H)x2.
    """
    states_flat, actions_pad, c_prev = _prep_inputs(states, actions, hidden)
    preds, h_t, c_t = _run_pallas(folded, states_flat, actions_pad, c_prev)
    return preds, (h_t[None, :, :], c_t[None, :, :])


# ----------------------------- references -----------------------------

def _reference_forward(params, state, action, hidden=None):
    """Pure-JAX f32 reference mirroring the PyTorch module (unfolded params)."""
    B = state.shape[0]
    H = HIDDEN_SIZE
    sf = state.reshape(B, -1)
    sp = sf @ params["w_state"] + params["b_state"]
    ap = action @ params["w_action"] + params["b_action"]
    comb = jnp.concatenate([sp, ap], -1)
    c_prev = jnp.zeros((B, H), jnp.float32) if hidden is None else hidden[1].reshape(B, H)
    gates = comb @ params["w_input"] + params["b_input"]
    i_t = jax.nn.sigmoid(gates[:, 0 * H:1 * H])
    f_t = jax.nn.sigmoid(gates[:, 1 * H:2 * H])
    o_t = jax.nn.sigmoid(gates[:, 2 * H:3 * H])
    g_t = jnp.tanh(gates[:, 3 * H:4 * H])
    c_t = f_t * c_prev + i_t * g_t
    h_t = o_t * jnp.tanh(c_t)
    pred = h_t @ params["w_output"] + params["b_output"]
    return pred, (h_t[None], c_t[None])


def _matched_forward(folded, state, action, hidden=None):
    """Reference that mirrors the kernel's folded/bf16 arithmetic exactly."""
    B = state.shape[0]
    H = HIDDEN_SIZE
    sf = state.reshape(B, -1).astype(jnp.bfloat16)
    a = jnp.zeros((B, ACTION_PAD_K), jnp.bfloat16).at[:, :action.shape[-1]].set(
        action.astype(jnp.bfloat16))
    c_prev = jnp.zeros((B, H), jnp.float32) if hidden is None else hidden[1].reshape(B, H)

    sp = jnp.dot(sf, folded["w_state"], preferred_element_type=jnp.float32)
    gates = (jnp.dot(sp.astype(jnp.bfloat16), folded["w_gate_state"],
                     preferred_element_type=jnp.float32)
             + jnp.dot(a, folded["w_act_fold"], preferred_element_type=jnp.float32)
             + folded["b_fold"])
    i_t = jax.nn.sigmoid(gates[:, 0 * H:1 * H])
    f_t = jax.nn.sigmoid(gates[:, 1 * H:2 * H])
    o_t = jax.nn.sigmoid(gates[:, 2 * H:3 * H])
    g_t = jnp.tanh(gates[:, 3 * H:4 * H])
    c_t = f_t * c_prev + i_t * g_t
    h_t = o_t * jnp.tanh(c_t)
    pred = jnp.dot(h_t.astype(jnp.bfloat16), folded["w_output"],
                   preferred_element_type=jnp.float32) + folded["b_output"]
    return pred, (h_t[None], c_t[None])


if __name__ == "__main__":
    key = jax.random.PRNGKey(0)
    k_param, k_state, k_action, k_seq_s, k_seq_a = jax.random.split(key, 5)

    params = init_params(k_param)
    folded = fold_params(params)          # one-time offline fold/cast

    # ---- single-step forward (torch module semantics) ----
    state = jax.random.normal(k_state, (BATCH, 3, 32, 32), jnp.float32)
    action = jax.random.normal(k_action, (BATCH, ACTION_SIZE), jnp.float32)

    pred, (h_t, c_t) = world_model_forward(folded, state, action)
    jax.block_until_ready((pred, h_t, c_t))

    assert pred.shape == (BATCH, OUTPUT_SIZE)
    assert h_t.shape == (1, BATCH, HIDDEN_SIZE)
    assert c_t.shape == (1, BATCH, HIDDEN_SIZE)

    # Tight check vs. precision-matched (folded / bf16) reference.
    m_pred, (m_h, m_c) = _matched_forward(folded, state, action)
    assert jnp.allclose(pred, m_pred, rtol=3e-3, atol=3e-3)
    assert jnp.allclose(h_t, m_h, rtol=3e-3, atol=3e-3)
    assert jnp.allclose(c_t, m_c, rtol=3e-3, atol=3e-3)

    # Semantic check vs. pure-f32 PyTorch-equivalent reference (bf16 tolerance).
    r_pred, (r_h, r_c) = _reference_forward(params, state, action)
    assert jnp.allclose(pred, r_pred, rtol=2e-2, atol=2e-2)
    assert jnp.allclose(h_t, r_h, rtol=2e-2, atol=2e-2)
    assert jnp.allclose(c_t, r_c, rtol=2e-2, atol=2e-2)

    # Second step feeding the hidden state back (exercises the hidden!=None path).
    pred2, (h_t2, c_t2) = world_model_forward(folded, state, action, (h_t, c_t))
    jax.block_until_ready(pred2)
    m_pred2, (m_h2, m_c2) = _matched_forward(folded, state, action, (m_h, m_c))
    assert jnp.allclose(pred2, m_pred2, rtol=5e-3, atol=5e-3)
    assert jnp.allclose(c_t2, m_c2, rtol=5e-3, atol=5e-3)

    # ---- fused T-step rollout (main perf feedback: amortize weight DMA) ----
    T = 4
    states_seq = jax.random.normal(k_seq_s, (T, BATCH, 3, 32, 32), jnp.float32)
    actions_seq = jax.random.normal(k_seq_a, (T, BATCH, ACTION_SIZE), jnp.float32)

    preds_seq, (h_fin, c_fin) = world_model_rollout(folded, states_seq, actions_seq)
    jax.block_until_ready((preds_seq, h_fin, c_fin))
    assert preds_seq.shape == (T, BATCH, OUTPUT_SIZE)

    hid_m, hid_r = None, None
    for t in range(T):
        mp, hid_m = _matched_forward(folded, states_seq[t], actions_seq[t], hid_m)
        rp, hid_r = _reference_forward(params, states_seq[t], actions_seq[t], hid_r)
        assert jnp.allclose(preds_seq[t], mp, rtol=5e-3, atol=5e-3)
        assert jnp.allclose(preds_seq[t], rp, rtol=3e-2, atol=3e-2)
    assert jnp.allclose(h_fin, hid_m[0], rtol=5e-3, atol=5e-3)
    assert jnp.allclose(c_fin, hid_m[1], rtol=5e-3, atol=5e-3)

    # TODO(synk): like the PyTorch module, gates use only [state_proj, action_proj];
    # the recurrent h_prev term of a true LSTMCell is intentionally absent in both.
    print("KERNEL_OK")
</pallas_src>

<mosaic_0001>
module attributes {stable_mosaic.version = 11 : i64} {
  func.func @world_model_kernel(%arg0: i32, %arg1: memref<1x16x3072xf32, #tpu.memory_space<vmem>>, %arg2: memref<1x16x16xbf16, #tpu.memory_space<vmem>>, %arg3: memref<16x128xf32, #tpu.memory_space<vmem>>, %arg4: memref<3072x128xbf16, #tpu.memory_space<vmem>>, %arg5: memref<128x512xbf16, #tpu.memory_space<vmem>>, %arg6: memref<16x512xbf16, #tpu.memory_space<vmem>>, %arg7: memref<1x512xf32, #tpu.memory_space<vmem>>, %arg8: memref<128x3072xbf16, #tpu.memory_space<vmem>>, %arg9: memref<1x3072xf32, #tpu.memory_space<vmem>>, %arg10: memref<1x16x3072xf32, #tpu.memory_space<vmem>>, %arg11: memref<16x128xf32, #tpu.memory_space<vmem>>, %arg12: memref<16x128xf32, #tpu.memory_space<vmem>>, %arg13: memref<16x128xf32, #tpu.memory_space<vmem>>) attributes {dimension_semantics = [#tpu.dimension_semantics<arbitrary>], iteration_bounds = array<i64: 1>, scalar_prefetch = 0 : i64, scratch_operands = 1 : i64, tpu.core_type = #tpu.core_type<tc>, window_params = [{transform_indices = @transform_0, window_bounds = array<i64: 1, 16, 3072>}, {transform_indices = @transform_1, window_bounds = array<i64: 1, 16, 16>}, {pipeline_mode = #tpu.pipeline_mode<synchronous>, transform_indices = @transform_2, window_bounds = array<i64: 16, 128>}, {pipeline_mode = #tpu.pipeline_mode<synchronous>, transform_indices = @transform_3, window_bounds = array<i64: 3072, 128>}, {pipeline_mode = #tpu.pipeline_mode<synchronous>, transform_indices = @transform_4, window_bounds = array<i64: 128, 512>}, {pipeline_mode = #tpu.pipeline_mode<synchronous>, transform_indices = @transform_5, window_bounds = array<i64: 16, 512>}, {pipeline_mode = #tpu.pipeline_mode<synchronous>, transform_indices = @transform_6, window_bounds = array<i64: 1, 512>}, {pipeline_mode = #tpu.pipeline_mode<synchronous>, transform_indices = @transform_7, window_bounds = array<i64: 128, 3072>}, {pipeline_mode = #tpu.pipeline_mode<synchronous>, transform_indices = @transform_8, window_bounds = array<i64: 1, 3072>}, {transform_indices = @transform_9, window_bounds = array<i64: 1, 16, 3072>}, {pipeline_mode = #tpu.pipeline_mode<synchronous>, transform_indices = @transform_10, window_bounds = array<i64: 16, 128>}, {pipeline_mode = #tpu.pipeline_mode<synchronous>, transform_indices = @transform_11, window_bounds = array<i64: 16, 128>}]} {
    %c0_i32 = arith.constant 0 : i32
    %0 = arith.cmpi eq, %arg0, %c0_i32 : i32
    %1 = arith.extui %0 : i1 to i32
    %c0_i32_0 = arith.constant 0 : i32
    %2 = arith.cmpi ne, %1, %c0_i32_0 : i32
    scf.if %2 {
      %c0_35 = arith.constant 0 : index
      %c0_36 = arith.constant 0 : index
      %57 = vector.load %arg3[%c0_35, %c0_36] : memref<16x128xf32, #tpu.memory_space<vmem>>, vector<16x128xf32>
      %c0_37 = arith.constant 0 : index
      %c0_38 = arith.constant 0 : index
      %58 = vector.load %arg13[%c0_37, %c0_38] : memref<16x128xf32, #tpu.memory_space<vmem>>, vector<16x128xf32>
      tpu.vector_store %arg13[%c0_37, %c0_38], %57 {strides = array<i32>} : memref<16x128xf32, #tpu.memory_space<vmem>>, vector<16x128xf32>,
    } else {
    }
    %c0 = arith.constant 0 : index
    %c0_1 = arith.constant 0 : index
    %c0_2 = arith.constant 0 : index
    %3 = vector.load %arg1[%c0, %c0_1, %c0_2] : memref<1x16x3072xf32, #tpu.memory_space<vmem>>, vector<1x16x3072xf32>
    %4 = vector.shape_cast %3 : vector<1x16x3072xf32> to vector<16x3072xf32>
    %5 = arith.truncf %4 : vector<16x3072xf32> to vector<16x3072xbf16>
    %c0_3 = arith.constant 0 : index
    %c0_4 = arith.constant 0 : index
    %6 = vector.load %arg4[%c0_3, %c0_4] : memref<3072x128xbf16, #tpu.memory_space<vmem>>, vector<3072x128xbf16>
    %cst = arith.constant dense<0.000000e+00> : vector<16x128xf32>
    %7 = tpu.matmul %5, %6, %cst {dimension_numbers = #tpu.dot_dimension_numbers<[1], [0], [0], [1], [0, 0, 1, 1], [], []>} : vector<16x3072xbf16>, vector<3072x128xbf16>, vector<16x128xf32> -> vector<16x128xf32>
    %8 = arith.truncf %7 : vector<16x128xf32> to vector<16x128xbf16>
    %c0_5 = arith.constant 0 : index
    %c0_6 = arith.constant 0 : index
    %9 = vector.load %arg5[%c0_5, %c0_6] : memref<128x512xbf16, #tpu.memory_space<vmem>>, vector<128x512xbf16>
    %cst_7 = arith.constant dense<0.000000e+00> : vector<16x512xf32>
    %10 = tpu.matmul %8, %9, %cst_7 {dimension_numbers = #tpu.dot_dimension_numbers<[1], [0], [0], [1], [0, 0, 1, 1], [], []>} : vector<16x128xbf16>, vector<128x512xbf16>, vector<16x512xf32> -> vector<16x512xf32>
    %c0_8 = arith.constant 0 : index
    %c0_9 = arith.constant 0 : index
    %c0_10 = arith.constant 0 : index
    %11 = vector.load %arg2[%c0_8, %c0_9, %c0_10] : memref<1x16x16xbf16, #tpu.memory_space<vmem>>, vector<1x16x16xbf16>
    %12 = vector.shape_cast %11 : vector<1x16x16xbf16> to vector<16x16xbf16>
    %c0_11 = arith.constant 0 : index
    %c0_12 = arith.constant 0 : index
    %13 = vector.load %arg6[%c0_11, %c0_12] : memref<16x512xbf16, #tpu.memory_space<vmem>>, vector<16x512xbf16>
    %cst_13 = arith.constant dense<0.000000e+00> : vector<16x512xf32>
    %14 = tpu.matmul %12, %13, %cst_13 {dimension_numbers = #tpu.dot_dimension_numbers<[1], [0], [0], [1], [0, 0, 1, 1], [], []>} : vector<16x16xbf16>, vector<16x512xbf16>, vector<16x512xf32> -> vector<16x512xf32>
    %15 = arith.addf %10, %14 : vector<16x512xf32>
    %c0_14 = arith.constant 0 : index
    %c0_15 = arith.constant 0 : index
    %16 = vector.load %arg7[%c0_14, %c0_15] : memref<1x512xf32, #tpu.memory_space<vmem>>, vector<1x512xf32>
    %17 = vector.broadcast %16 : vector<1x512xf32> to vector<16x512xf32>
    %18 = arith.addf %15, %17 : vector<16x512xf32>
    %19 = vector.extract_strided_slice %18 {offsets = [0, 0], sizes = [16, 128], strides = [1, 1]} : vector<16x512xf32> to vector<16x128xf32>
    %20 = arith.negf %19 : vector<16x128xf32>
    %21 = math.exp %20 : vector<16x128xf32>
    %cst_16 = arith.constant 1.000000e+00 : f32
    %22 = vector.broadcast %cst_16 : f32 to vector<16x128xf32>
    %23 = arith.addf %22, %21 : vector<16x128xf32>
    %24 = arith.divf %22, %23 : vector<16x128xf32>
    %25 = vector.extract_strided_slice %18 {offsets = [0, 128], sizes = [16, 128], strides = [1, 1]} : vector<16x512xf32> to vector<16x128xf32>
    %26 = arith.negf %25 : vector<16x128xf32>
    %27 = math.exp %26 : vector<16x128xf32>
    %cst_17 = arith.constant 1.000000e+00 : f32
    %28 = vector.broadcast %cst_17 : f32 to vector<16x128xf32>
    %29 = arith.addf %28, %27 : vector<16x128xf32>
    %30 = arith.divf %28, %29 : vector<16x128xf32>
    %31 = vector.extract_strided_slice %18 {offsets = [0, 256], sizes = [16, 128], strides = [1, 1]} : vector<16x512xf32> to vector<16x128xf32>
    %32 = arith.negf %31 : vector<16x128xf32>
    %33 = math.exp %32 : vector<16x128xf32>
    %cst_18 = arith.constant 1.000000e+00 : f32
    %34 = vector.broadcast %cst_18 : f32 to vector<16x128xf32>
    %35 = arith.addf %34, %33 : vector<16x128xf32>
    %36 = arith.divf %34, %35 : vector<16x128xf32>
    %37 = vector.extract_strided_slice %18 {offsets = [0, 384], sizes = [16, 128], strides = [1, 1]} : vector<16x512xf32> to vector<16x128xf32>
    %38 = math.tanh %37 : vector<16x128xf32>
    %c0_19 = arith.constant 0 : index
    %c0_20 = arith.constant 0 : index
    %39 = vector.load %arg13[%c0_19, %c0_20] : memref<16x128xf32, #tpu.memory_space<vmem>>, vector<16x128xf32>
    %40 = arith.mulf %30, %39 : vector<16x128xf32>
    %41 = arith.mulf %24, %38 : vector<16x128xf32>
    %42 = arith.addf %40, %41 : vector<16x128xf32>
    %43 = math.tanh %42 : vector<16x128xf32>
    %44 = arith.mulf %36, %43 : vector<16x128xf32>
    %c0_21 = arith.constant 0 : index
    %c0_22 = arith.constant 0 : index
    %45 = vector.load %arg13[%c0_21, %c0_22] : memref<16x128xf32, #tpu.memory_space<vmem>>, vector<16x128xf32>
    tpu.vector_store %arg13[%c0_21, %c0_22], %42 {strides = array<i32>} : memref<16x128xf32, #tpu.memory_space<vmem>>, vector<16x128xf32>,
    %46 = arith.truncf %44 : vector<16x128xf32> to vector<16x128xbf16>
    %c0_23 = arith.constant 0 : index
    %c0_24 = arith.constant 0 : index
    %47 = vector.load %arg8[%c0_23, %c0_24] : memref<128x3072xbf16, #tpu.memory_space<vmem>>, vector<128x3072xbf16>
    %cst_25 = arith.constant dense<0.000000e+00> : vector<16x3072xf32>
    %48 = tpu.matmul %46, %47, %cst_25 {dimension_numbers = #tpu.dot_dimension_numbers<[1], [0], [0], [1], [0, 0, 1, 1], [], []>} : vector<16x128xbf16>, vector<128x3072xbf16>, vector<16x3072xf32> -> vector<16x3072xf32>
    %c0_26 = arith.constant 0 : index
    %c0_27 = arith.constant 0 : index
    %49 = vector.load %arg9[%c0_26, %c0_27] : memref<1x3072xf32, #tpu.memory_space<vmem>>, vector<1x3072xf32>
    %50 = vector.broadcast %49 : vector<1x3072xf32> to vector<16x3072xf32>
    %51 = arith.addf %48, %50 : vector<16x3072xf32>
    %c0_28 = arith.constant 0 : index
    %c0_29 = arith.constant 0 : index
    %c0_30 = arith.constant 0 : index
    %52 = vector.load %arg10[%c0_28, %c0_29, %c0_30] : memref<1x16x3072xf32, #tpu.memory_space<vmem>>, vector<1x16x3072xf32>
    %53 = vector.shape_cast %52 : vector<1x16x3072xf32> to vector<16x3072xf32>
    %54 = vector.shape_cast %51 : vector<16x3072xf32> to vector<1x16x3072xf32>
    tpu.vector_store %arg10[%c0_28, %c0_29, %c0_30], %54 {strides = array<i32>} : memref<1x16x3072xf32, #tpu.memory_space<vmem>>, vector<1x16x3072xf32>,
    %c0_31 = arith.constant 0 : index
    %c0_32 = arith.constant 0 : index
    %55 = vector.load %arg11[%c0_31, %c0_32] : memref<16x128xf32, #tpu.memory_space<vmem>>, vector<16x128xf32>
    tpu.vector_store %arg11[%c0_31, %c0_32], %44 {strides = array<i32>} : memref<16x128xf32, #tpu.memory_space<vmem>>, vector<16x128xf32>,
    %c0_33 = arith.constant 0 : index
    %c0_34 = arith.constant 0 : index
    %56 = vector.load %arg12[%c0_33, %c0_34] : memref<16x128xf32, #tpu.memory_space<vmem>>, vector<16x128xf32>
    tpu.vector_store %arg12[%c0_33, %c0_34], %42 {strides = array<i32>} : memref<16x128xf32, #tpu.memory_space<vmem>>, vector<16x128xf32>,
    return
  }
  func.func @transform_0(%arg0: i32) -> (i32, i32, i32) {
    %c0_i32 = arith.constant 0 : i32
    %c0_i32_0 = arith.constant 0 : i32
    %c0_i32_1 = arith.constant 0 : i32
    return %arg0, %c0_i32, %c0_i32_0 : i32, i32, i32
  }
  func.func @transform_1(%arg0: i32) -> (i32, i32, i32) {
    %c0_i32 = arith.constant 0 : i32
    %c0_i32_0 = arith.constant 0 : i32
    %c0_i32_1 = arith.constant 0 : i32
    return %arg0, %c0_i32, %c0_i32_0 : i32, i32, i32
  }
  func.func @transform_2(%arg0: i32) -> (i32, i32) {
    %c0_i32 = arith.constant 0 : i32
    %c0_i32_0 = arith.constant 0 : i32
    %c0_i32_1 = arith.constant 0 : i32
    return %c0_i32, %c0_i32_0 : i32, i32
  }
  func.func @transform_3(%arg0: i32) -> (i32, i32) {
    %c0_i32 = arith.constant 0 : i32
    %c0_i32_0 = arith.constant 0 : i32
    %c0_i32_1 = arith.constant 0 : i32
    return %c0_i32, %c0_i32_0 : i32, i32
  }
  func.func @transform_4(%arg0: i32) -> (i32, i32) {
    %c0_i32 = arith.constant 0 : i32
    %c0_i32_0 = arith.constant 0 : i32
    %c0_i32_1 = arith.constant 0 : i32
    return %c0_i32, %c0_i32_0 : i32, i32
  }
  func.func @transform_5(%arg0: i32) -> (i32, i32) {
    %c0_i32 = arith.constant 0 : i32
    %c0_i32_0 = arith.constant 0 : i32
    %c0_i32_1 = arith.constant 0 : i32
    return %c0_i32, %c0_i32_0 : i32, i32
  }
  func.func @transform_6(%arg0: i32) -> (i32, i32) {
    %c0_i32 = arith.constant 0 : i32
    %c0_i32_0 = arith.constant 0 : i32
    %c0_i32_1 = arith.constant 0 : i32
    return %c0_i32, %c0_i32_0 : i32, i32
  }
  func.func @transform_7(%arg0: i32) -> (i32, i32) {
    %c0_i32 = arith.constant 0 : i32
    %c0_i32_0 = arith.constant 0 : i32
    %c0_i32_1 = arith.constant 0 : i32
    return %c0_i32, %c0_i32_0 : i32, i32
  }
  func.func @transform_8(%arg0: i32) -> (i32, i32) {
    %c0_i32 = arith.constant 0 : i32
    %c0_i32_0 = arith.constant 0 : i32
    %c0_i32_1 = arith.constant 0 : i32
    return %c0_i32, %c0_i32_0 : i32, i32
  }
  func.func @transform_9(%arg0: i32) -> (i32, i32, i32) {
    %c0_i32 = arith.constant 0 : i32
    %c0_i32_0 = arith.constant 0 : i32
    %c0_i32_1 = arith.constant 0 : i32
    return %arg0, %c0_i32, %c0_i32_0 : i32, i32, i32
  }
  func.func @transform_10(%arg0: i32) -> (i32, i32) {
    %c0_i32 = arith.constant 0 : i32
    %c0_i32_0 = arith.constant 0 : i32
    %c0_i32_1 = arith.constant 0 : i32
    return %c0_i32, %c0_i32_0 : i32, i32
  }
  func.func @transform_11(%arg0: i32) -> (i32, i32) {
    %c0_i32 = arith.constant 0 : i32
    %c0_i32_0 = arith.constant 0 : i32
    %c0_i32_1 = arith.constant 0 : i32
    return %c0_i32, %c0_i32_0 : i32, i32
  }
}

</mosaic_0001>

<bundles_post_ra>
// kernel: world_model_forward.1
= control target key start
LH: loop header
LB: loop body
LE: loop exit
PB: predicated region body
PF: predicated region fallthrough
CT: control target
= control target key end

     0   :  { %17 = vsyncpa [#allocation4], 0  ;;  %s7725_s0 = inlined_call_operand.vmem [shape: f32[1,16,3072], index: 0, kind: input, shape index: {}]   ;;  %s7726_s1 = inlined_call_operand.vmem [shape: bf16[1,16,16], index: 1, kind: input, shape index: {}]   ;;  %s7727_s2 = inlined_call_operand.vmem [shape: f32[16,128], index: 2, kind: input, shape index: {}]   ;;  %s7728_s3 = inlined_call_operand.vmem [shape: bf16[3072,128], index: 3, kind: input, shape index: {}]   ;;  %s7729_s4 = inlined_call_operand.vmem [shape: bf16[128,512], index: 4, kind: input, shape index: {}]   ;;  %s7730_s5 = inlined_call_operand.vmem [shape: bf16[16,512], index: 5, kind: input, shape index: {}]   ;;  %s7731_s6 = inlined_call_operand.vmem [shape: f32[1,512], index: 6, kind: input, shape index: {}]   ;;  %s7732_s7 = inlined_call_operand.hbm [shape: bf16[128,3072], index: 7, kind: input, shape index: {}]   ;;  %s7733_s8 = inlined_call_operand.vmem [shape: f32[1,3072], index: 8, kind: input, shape index: {}]   ;;  %s7734_s9 = inlined_call_operand.hbm [shape: f32[1,16,3072], index: 9, kind: output, shape index: {0}]   ;;  %s7735_s10 = inlined_call_operand.hbm [shape: f32[16,128], index: 10, kind: output, shape index: {1}]   ;;  %s7736_s11 = inlined_call_operand.hbm [shape: f32[16,128], index: 11, kind: output, shape index: {2}]  }
   0x1   :  { %18 = vsyncpa [#allocation5], 0 }
   0x2   :  { %19 = vsyncpa [#allocation8], 0  ;;  %s38_s19 = sshll.u32 %s7732_s7, 4  ;;  %s6402_s20 = smov [#allocation3]   ;;  %s39_s19 = int_to_ptr.hbm [resolvable:$true] %s38_s19 }
   0x3   :  { %s40_s21 = sshll.u32 %s6402_s20, 4  ;;  %s6403_s22 = smov 1536   ;;  %s41_s21 = int_to_ptr.vmem [resolvable:$true] %s40_s21 }
   0x4   :  { %s6404_s23 = smov 96  }
   0x5   :  { %46 = dma.hbm_to_vmem [thread:$0]  %s39_s19, 24576, %s41_s21, [#allocation4], %s6403_s22, %s6403_s22, %s6404_s23  }
   0x6   :  { %6396 = dma.done.wait [#allocation4], 24576  }
   0x7   :  { %6397 = vsyncadd [#allocation4], 4294942720  ;;  %v5844_v0 = vld [vmem:[%s7728_s3 + $0x38] sm:$0xff]  ;;  %v5843_v4 = vld [vmem:[%s7728_s3 + $0x30] sm:$0xff]  ;;  %vm2070_vm0 = vcmask 130048   ;;  %s6405_s30 = smov [#allocation7]  }
   0x8   :  { %v5852_v1 = vld [vmem:[%s7728_s3 + $0x78] sm:$0xff]  ;;  %1670 = vmatpush.bf16.msra.mxu0 %v5844_v0  ;;  %v5851_v5 = vld [vmem:[%s7728_s3 + $0x70] sm:$0xff]  ;;  %v5842_v8 = vld [vmem:[%s7728_s3 + $0x28] sm:$0xff]  ;;  %s4106_s12 = sshll.u32 %s6405_s30, 4  ;;  %s4108_s14 = sshll.u32 %s7735_s10, 4  ;;  %s4107_s12 = int_to_ptr.vmem [resolvable:$true] %s4106_s12  ;;  %s4109_s14 = int_to_ptr.hbm [resolvable:$true] %s4108_s14 }
   0x9   :  { %v5860_v2 = vld [vmem:[%s7728_s3 + $0xb8] sm:$0xff]  ;;  %1684 = vmatpush.bf16.msra.mxu1 %v5852_v1  ;;  %v5859_v6 = vld [vmem:[%s7728_s3 + $0xb0] sm:$0xff]  ;;  %v5850_v9 = vld [vmem:[%s7728_s3 + $0x68] sm:$0xff]  ;;  %s6406_s15 = smov 128   ;;  %s6407_s16 = smov 8  }
   0xa   :  { %v5868_v3 = vld [vmem:[%s7728_s3 + $0xf8] sm:$0xff]  ;;  %1698 = vmatpush.bf16.msra.mxu2 %v5860_v2  ;;  %v5867_v7 = vld [vmem:[%s7728_s3 + $0xf0] sm:$0xff]  ;;  %v5858_v10 = vld [vmem:[%s7728_s3 + $0xa8] sm:$0xff]  ;;  %s6408_s10 = smov [#allocation9]   ;;  %s4121_s19 = sshll.u32 %s7736_s11, 4  ;;  %s4122_s19 = int_to_ptr.hbm [resolvable:$true] %s4121_s19 }
   0xb   :  { %1712 = vmatpush.bf16.msra.mxu3 %v5868_v3  ;;  %v5866_v11 = vld [vmem:[%s7728_s3 + $0xe8] sm:$0xff]  ;;  %v5841_v12 = vld [vmem:[%s7728_s3 + $0x20] sm:$0xff]  ;;  %v5840_v16 = vld [vmem:[%s7728_s3 + $0x18] sm:$0xff]  ;;  %s4095_s24 = sshll.u32 %s7734_s9, 4  ;;  %s6410_s25 = smov 3072   ;;  %s4096_s24 = int_to_ptr.hbm [resolvable:$true] %s4095_s24 }
   0xc   :  { %1671 = vmatpush.bf16.msra.mxu0 %v5843_v4  ;;  %v5849_v13 = vld [vmem:[%s7728_s3 + $0x60] sm:$0xff]  ;;  %v5848_v17 = vld [vmem:[%s7728_s3 + $0x58] sm:$0xff]  ;;  %v5839_v20 = vld [vmem:[%s7728_s3 + $0x10] sm:$0xff] }
   0xd   :  { %1685 = vmatpush.bf16.msra.mxu1 %v5851_v5  ;;  %v5857_v14 = vld [vmem:[%s7728_s3 + $0xa0] sm:$0xff]  ;;  %v5856_v18 = vld [vmem:[%s7728_s3 + $0x98] sm:$0xff]  ;;  %v5847_v21 = vld [vmem:[%s7728_s3 + $0x50] sm:$0xff] }
   0xe   :  { %1699 = vmatpush.bf16.msra.mxu2 %v5859_v6  ;;  %v5865_v15 = vld [vmem:[%s7728_s3 + $0xe0] sm:$0xff]  ;;  %v5864_v19 = vld [vmem:[%s7728_s3 + $0xd8] sm:$0xff]  ;;  %v5855_v22 = vld [vmem:[%s7728_s3 + $0x90] sm:$0xff] }
   0xf   :  { %1713 = vmatpush.bf16.msra.mxu3 %v5867_v7  ;;  %v5863_v23 = vld [vmem:[%s7728_s3 + $0xd0] sm:$0xff]  ;;  %v5838_v24 = vld [vmem:[%s7728_s3 + $0x8] sm:$0xff]  ;;  %v5837_v28 = vld [vmem:[%s7728_s3] sm:$0xff] }
  0x10   :  { %1672 = vmatpush.bf16.msra.mxu0 %v5842_v8  ;;  %v5846_v25 = vld [vmem:[%s7728_s3 + $0x48] sm:$0xff]  ;;  %v5845_v29 = vld [vmem:[%s7728_s3 + $0x40] sm:$0xff]  ;;  %v5876_v32 = vld [vmem:[%s7728_s3 + $0x138] sm:$0xff] }
  0x11   :  { %1686 = vmatpush.bf16.msra.mxu1 %v5850_v9  ;;  %v5854_v26 = vld [vmem:[%s7728_s3 + $0x88] sm:$0xff]  ;;  %v5853_v30 = vld [vmem:[%s7728_s3 + $0x80] sm:$0xff]  ;;  %v5884_v33 = vld [vmem:[%s7728_s3 + $0x178] sm:$0xff] }
  0x12   :  { %1700 = vmatpush.bf16.msra.mxu2 %v5858_v10  ;;  %v5862_v27 = vld [vmem:[%s7728_s3 + $0xc8] sm:$0xff]  ;;  %v5861_v31 = vld [vmem:[%s7728_s3 + $0xc0] sm:$0xff]  ;;  %v64_v36 = vld [vmem:[%s7725_s0 + $0x10] sm:$0xff] }
  0x13   :  { %1714 = vmatpush.bf16.msra.mxu3 %v5866_v11  ;;  %v62_v34 = vld [vmem:[%s7725_s0] sm:$0xff]  ;;  %v88_v37 = vld [vmem:[%s7725_s0 + $0xd0] sm:$0xff]  ;;  %v63_v38 = vld [vmem:[%s7725_s0 + $0x8] sm:$0xff] }
  0x14   :  { %1673 = vmatpush.bf16.msra.mxu0 %v5841_v12  ;;  %v86_v35 = vld [vmem:[%s7725_s0 + $0xc0] sm:$0xff]  ;;  %v87_v39 = vld [vmem:[%s7725_s0 + $0xc8] sm:$0xff]  ;;  %v65_v40 = vld [vmem:[%s7725_s0 + $0x18] sm:$0xff]  ;;  %v112_v45 = vpack.c.bf16 %v88_v37, %v64_v36 }
  0x15   :  { %1687 = vmatpush.bf16.msra.mxu1 %v5849_v13  ;;  %v89_v41 = vld [vmem:[%s7725_s0 + $0xd8] sm:$0xff]  ;;  %v110_v44 = vpack.c.bf16 %v86_v35, %v62_v34  ;;  %v111_v46 = vpack.c.bf16 %v87_v39, %v63_v38  ;;  %v5875_v48 = vld [vmem:[%s7728_s3 + $0x130] sm:$0xff]  ;;  %v5874_v52 = vld [vmem:[%s7728_s3 + $0x128] sm:$0xff] }
  0x16   :  { %1701 = vmatpush.bf16.msra.mxu2 %v5857_v14  ;;  %v5892_v42 = vld [vmem:[%s7728_s3 + $0x1b8] sm:$0xff]  ;;  %v113_v47 = vpack.c.bf16 %v89_v41, %v65_v40  ;;  %v5883_v49 = vld [vmem:[%s7728_s3 + $0x170] sm:$0xff]  ;;  %v5882_v53 = vld [vmem:[%s7728_s3 + $0x168] sm:$0xff] }
  0x17   :  { %1715 = vmatpush.bf16.msra.mxu3 %v5865_v15  ;;  %v5900_v43 = vld [vmem:[%s7728_s3 + $0x1f8] sm:$0xff]  ;;  %v5891_v50 = vld [vmem:[%s7728_s3 + $0x1b0] sm:$0xff]  ;;  %v5890_v54 = vld [vmem:[%s7728_s3 + $0x1a8] sm:$0xff] }
  0x18   :  { %1674 = vmatpush.bf16.msra.mxu0 %v5840_v16  ;;  %v5899_v51 = vld [vmem:[%s7728_s3 + $0x1f0] sm:$0xff]  ;;  %v5898_v55 = vld [vmem:[%s7728_s3 + $0x1e8] sm:$0xff]  ;;  %v5873_v56 = vld [vmem:[%s7728_s3 + $0x120] sm:$0xff] }
  0x19   :  { %1688 = vmatpush.bf16.msra.mxu1 %v5848_v17  ;;  %v5881_v57 = vld [vmem:[%s7728_s3 + $0x160] sm:$0xff]  ;;  %v5872_v60 = vld [vmem:[%s7728_s3 + $0x118] sm:$0xff]  ;;  %v5871_v0 = vld [vmem:[%s7728_s3 + $0x110] sm:$0xff] }
  0x1a   :  { %1702 = vmatpush.bf16.msra.mxu2 %v5856_v18  ;;  %v5889_v58 = vld [vmem:[%s7728_s3 + $0x1a0] sm:$0xff]  ;;  %v5880_v61 = vld [vmem:[%s7728_s3 + $0x158] sm:$0xff]  ;;  %v5879_v1 = vld [vmem:[%s7728_s3 + $0x150] sm:$0xff] }
  0x1b   :  { %1716 = vmatpush.bf16.msra.mxu3 %v5864_v19  ;;  %v5897_v59 = vld [vmem:[%s7728_s3 + $0x1e0] sm:$0xff]  ;;  %v5888_v62 = vld [vmem:[%s7728_s3 + $0x198] sm:$0xff]  ;;  %v5887_v2 = vld [vmem:[%s7728_s3 + $0x190] sm:$0xff] }
  0x1c   :  { %1675 = vmatpush.bf16.msra.mxu0 %v5839_v20  ;;  %v5896_v63 = vld [vmem:[%s7728_s3 + $0x1d8] sm:$0xff]  ;;  %v5895_v3 = vld [vmem:[%s7728_s3 + $0x1d0] sm:$0xff]  ;;  %v5870_v4 = vld [vmem:[%s7728_s3 + $0x108] sm:$0xff] }
  0x1d   :  { %1689 = vmatpush.bf16.msra.mxu1 %v5847_v21  ;;  %v5878_v5 = vld [vmem:[%s7728_s3 + $0x148] sm:$0xff]  ;;  %v5869_v8 = vld [vmem:[%s7728_s3 + $0x100] sm:$0xff]  ;;  %v5908_v12 = vld [vmem:[%s7728_s3 + $0x238] sm:$0xff] }
  0x1e   :  { %1703 = vmatpush.bf16.msra.mxu2 %v5855_v22  ;;  %v5886_v6 = vld [vmem:[%s7728_s3 + $0x188] sm:$0xff]  ;;  %v5877_v9 = vld [vmem:[%s7728_s3 + $0x140] sm:$0xff]  ;;  %v5916_v13 = vld [vmem:[%s7728_s3 + $0x278] sm:$0xff] }
  0x1f   :  { %1717 = vmatpush.bf16.msra.mxu3 %v5863_v23  ;;  %v5894_v7 = vld [vmem:[%s7728_s3 + $0x1c8] sm:$0xff]  ;;  %v5885_v10 = vld [vmem:[%s7728_s3 + $0x180] sm:$0xff]  ;;  %v68_v16 = vld [vmem:[%s7725_s0 + $0x30] sm:$0xff] }
  0x20   :  { %1676 = vmatpush.bf16.msra.mxu0 %v5838_v24  ;;  %v5893_v11 = vld [vmem:[%s7728_s3 + $0x1c0] sm:$0xff]  ;;  %v92_v17 = vld [vmem:[%s7725_s0 + $0xf0] sm:$0xff]  ;;  %v67_v18 = vld [vmem:[%s7725_s0 + $0x28] sm:$0xff] }
  0x21   :  { %1690 = vmatpush.bf16.msra.mxu1 %v5846_v25  ;;  %v66_v14 = vld [vmem:[%s7725_s0 + $0x20] sm:$0xff]  ;;  %v91_v19 = vld [vmem:[%s7725_s0 + $0xe8] sm:$0xff]  ;;  %v69_v20 = vld [vmem:[%s7725_s0 + $0x38] sm:$0xff]  ;;  %v116_v25 = vpack.c.bf16 %v92_v17, %v68_v16 }
  0x22   :  { %1704 = vmatpush.bf16.msra.mxu2 %v5854_v26  ;;  %v90_v15 = vld [vmem:[%s7725_s0 + $0xe0] sm:$0xff]  ;;  %v93_v21 = vld [vmem:[%s7725_s0 + $0xf8] sm:$0xff]  ;;  %v115_v26 = vpack.c.bf16 %v91_v19, %v67_v18  ;;  %v5922_v34 = vld [vmem:[%s7728_s3 + $0x2a8] sm:$0xff] }
  0x23   :  { %1718 = vmatpush.bf16.msra.mxu3 %v5862_v27  ;;  %v5924_v22 = vld [vmem:[%s7728_s3 + $0x2b8] sm:$0xff]  ;;  %v114_v24 = vpack.c.bf16 %v90_v15, %v66_v14  ;;  %v117_v27 = vpack.c.bf16 %v93_v21, %v69_v20  ;;  %v5930_v35 = vld [vmem:[%s7728_s3 + $0x2e8] sm:$0xff]  ;;  %v5905_v36 = vld [vmem:[%s7728_s3 + $0x220] sm:$0xff] }
  0x24   :  { %1677 = vmatpush.bf16.msra.mxu0 %v5837_v28  ;;  %v5932_v23 = vld [vmem:[%s7728_s3 + $0x2f8] sm:$0xff]  ;;  %v5907_v28 = vld [vmem:[%s7728_s3 + $0x230] sm:$0xff]  ;;  %v5913_v37 = vld [vmem:[%s7728_s3 + $0x260] sm:$0xff] }
  0x25   :  { %1691 = vmatpush.bf16.msra.mxu1 %v5845_v29  ;;  %v5915_v29 = vld [vmem:[%s7728_s3 + $0x270] sm:$0xff]  ;;  %v5921_v38 = vld [vmem:[%s7728_s3 + $0x2a0] sm:$0xff]  ;;  %v5904_v40 = vld [vmem:[%s7728_s3 + $0x218] sm:$0xff] }
  0x26   :  { %1705 = vmatpush.bf16.msra.mxu2 %v5853_v30  ;;  %v5923_v30 = vld [vmem:[%s7728_s3 + $0x2b0] sm:$0xff]  ;;  %v5929_v39 = vld [vmem:[%s7728_s3 + $0x2e0] sm:$0xff]  ;;  %v5912_v41 = vld [vmem:[%s7728_s3 + $0x258] sm:$0xff] }
  0x27   :  { %1719 = vmatpush.bf16.msra.mxu3 %v5861_v31  ;;  %1678 = vmatmul.bf16.vlgmr.msra.gmra.mxu0 %v110_v44  ;;  %v5931_v31 = vld [vmem:[%s7728_s3 + $0x2f0] sm:$0xff]  ;;  %v5954_v14 = vld [vmem:[%s7728_s3 + $0x3a8] sm:$0xff]  ;;  %v5937_v16 = vld [vmem:[%s7728_s3 + $0x320] sm:$0xff] }
  0x28   :  { %1726 = vmatpush.bf16.msrb.mxu0 %v5876_v32  ;;  %1692 = vmatmul.bf16.vlgmr.msra.gmra.mxu1 %v111_v46  ;;  %v5906_v32 = vld [vmem:[%s7728_s3 + $0x228] sm:$0xff]  ;;  %v5903_v44 = vld [vmem:[%s7728_s3 + $0x210] sm:$0xff]  ;;  %v5945_v17 = vld [vmem:[%s7728_s3 + $0x360] sm:$0xff] }
  0x29   :  { %1740 = vmatpush.bf16.msrb.mxu1 %v5884_v33  ;;  %1706 = vmatmul.bf16.vlgmr.msra.gmra.mxu2 %v112_v45  ;;  %v5914_v33 = vld [vmem:[%s7728_s3 + $0x268] sm:$0xff]  ;;  %v5911_v45 = vld [vmem:[%s7728_s3 + $0x250] sm:$0xff]  ;;  %v5953_v18 = vld [vmem:[%s7728_s3 + $0x3a0] sm:$0xff] }
  0x2a   :  { %1754 = vmatpush.bf16.msrb.mxu2 %v5892_v42  ;;  %1720 = vmatmul.bf16.vlgmr.msra.gmra.mxu3 %v113_v47  ;;  %v5920_v42 = vld [vmem:[%s7728_s3 + $0x298] sm:$0xff]  ;;  %v5919_v46 = vld [vmem:[%s7728_s3 + $0x290] sm:$0xff]  ;;  %v5962_v15 = vld [vmem:[%s7728_s3 + $0x3e8] sm:$0xff] }
  0x2b   :  { %1768 = vmatpush.bf16.msrb.mxu3 %v5900_v43  ;;  %v5928_v43 = vld [vmem:[%s7728_s3 + $0x2d8] sm:$0xff]  ;;  %v5927_v47 = vld [vmem:[%s7728_s3 + $0x2d0] sm:$0xff]  ;;  %v5961_v19 = vld [vmem:[%s7728_s3 + $0x3e0] sm:$0xff] }
  0x2c   :  { %1727 = vmatpush.bf16.msrb.mxu0 %v5875_v48  ;;  %v5902_v48 = vld [vmem:[%s7728_s3 + $0x208] sm:$0xff]  ;;  %v5936_v20 = vld [vmem:[%s7728_s3 + $0x318] sm:$0xff] }
  0x2d   :  { %1741 = vmatpush.bf16.msrb.mxu1 %v5883_v49  ;;  %v5910_v49 = vld [vmem:[%s7728_s3 + $0x248] sm:$0xff]  ;;  %v5944_v21 = vld [vmem:[%s7728_s3 + $0x358] sm:$0xff] }
  0x2e   :  { %1755 = vmatpush.bf16.msrb.mxu2 %v5891_v50  ;;  %v5918_v50 = vld [vmem:[%s7728_s3 + $0x288] sm:$0xff] }
  0x2f   :  { %1769 = vmatpush.bf16.msrb.mxu3 %v5899_v51  ;;  %v5926_v51 = vld [vmem:[%s7728_s3 + $0x2c8] sm:$0xff] }
  0x30   :  { %1728 = vmatpush.bf16.msrb.mxu0 %v5874_v52  ;;  %v5901_v52 = vld [vmem:[%s7728_s3 + $0x200] sm:$0xff] }
  0x31   :  { %1742 = vmatpush.bf16.msrb.mxu1 %v5882_v53  ;;  %v5909_v53 = vld [vmem:[%s7728_s3 + $0x240] sm:$0xff] }
  0x32   :  { %1756 = vmatpush.bf16.msrb.mxu2 %v5890_v54  ;;  %v5917_v54 = vld [vmem:[%s7728_s3 + $0x280] sm:$0xff] }
  0x33   :  { %1770 = vmatpush.bf16.msrb.mxu3 %v5898_v55  ;;  %v5925_v55 = vld [vmem:[%s7728_s3 + $0x2c0] sm:$0xff] }
  0x34   :  { %1729 = vmatpush.bf16.msrb.mxu0 %v5873_v56  ;;  %v5940_v56 = vld [vmem:[%s7728_s3 + $0x338] sm:$0xff] }
  0x35   :  { %1743 = vmatpush.bf16.msrb.mxu1 %v5881_v57  ;;  %v5948_v57 = vld [vmem:[%s7728_s3 + $0x378] sm:$0xff] }
  0x36   :  { %1757 = vmatpush.bf16.msrb.mxu2 %v5889_v58  ;;  %v70_v58 = vld [vmem:[%s7725_s0 + $0x40] sm:$0xff] }
  0x37   :  { %1771 = vmatpush.bf16.msrb.mxu3 %v5897_v59  ;;  %v94_v59 = vld [vmem:[%s7725_s0 + $0x100] sm:$0xff] }
  0x38   :  { %1730 = vmatpush.bf16.msrb.mxu0 %v5872_v60  ;;  %v72_v60 = vld [vmem:[%s7725_s0 + $0x50] sm:$0xff] }
  0x39   :  { %1744 = vmatpush.bf16.msrb.mxu1 %v5880_v61  ;;  %v96_v61 = vld [vmem:[%s7725_s0 + $0x110] sm:$0xff] }
  0x3a   :  { %1758 = vmatpush.bf16.msrb.mxu2 %v5888_v62  ;;  %v71_v62 = vld [vmem:[%s7725_s0 + $0x48] sm:$0xff] }
  0x3b   :  { %1772 = vmatpush.bf16.msrb.mxu3 %v5896_v63  ;;  %v95_v63 = vld [vmem:[%s7725_s0 + $0x108] sm:$0xff] }
  0x3c   :  { %1731 = vmatpush.bf16.msrb.mxu0 %v5871_v0  ;;  %v73_v0 = vld [vmem:[%s7725_s0 + $0x58] sm:$0xff] }
  0x3d   :  { %1745 = vmatpush.bf16.msrb.mxu1 %v5879_v1  ;;  %v97_v1 = vld [vmem:[%s7725_s0 + $0x118] sm:$0xff] }
  0x3e   :  { %1759 = vmatpush.bf16.msrb.mxu2 %v5887_v2  ;;  %v5956_v2 = vld [vmem:[%s7728_s3 + $0x3b8] sm:$0xff] }
  0x3f   :  { %1773 = vmatpush.bf16.msrb.mxu3 %v5895_v3  ;;  %v5964_v3 = vld [vmem:[%s7728_s3 + $0x3f8] sm:$0xff] }
  0x40   :  { %1732 = vmatpush.bf16.msrb.mxu0 %v5870_v4  ;;  %v118_v4 = vpack.c.bf16 %v94_v59, %v70_v58  ;;  %v5986_v58 = vld [vmem:[%s7728_s3 + $0x4a8] sm:$0xff] }
  0x41   :  { %1746 = vmatpush.bf16.msrb.mxu1 %v5878_v5  ;;  %v120_v5 = vpack.c.bf16 %v96_v61, %v72_v60  ;;  %v5994_v59 = vld [vmem:[%s7728_s3 + $0x4e8] sm:$0xff]  ;;  %v5969_v60 = vld [vmem:[%s7728_s3 + $0x420] sm:$0xff] }
  0x42   :  { %1760 = vmatpush.bf16.msrb.mxu2 %v5886_v6  ;;  %v119_v6 = vpack.c.bf16 %v95_v63, %v71_v62  ;;  %v5977_v61 = vld [vmem:[%s7728_s3 + $0x460] sm:$0xff] }
  0x43   :  { %1774 = vmatpush.bf16.msrb.mxu3 %v5894_v7  ;;  %v121_v7 = vpack.c.bf16 %v97_v1, %v73_v0  ;;  %v5985_v62 = vld [vmem:[%s7728_s3 + $0x4a0] sm:$0xff]  ;;  %v5968_v0 = vld [vmem:[%s7728_s3 + $0x418] sm:$0xff] }
  0x44   :  { %1733 = vmatpush.bf16.msrb.mxu0 %v5869_v8  ;;  %v5939_v8 = vld [vmem:[%s7728_s3 + $0x330] sm:$0xff]  ;;  %v5993_v63 = vld [vmem:[%s7728_s3 + $0x4e0] sm:$0xff]  ;;  %v5976_v1 = vld [vmem:[%s7728_s3 + $0x458] sm:$0xff] }
  0x45   :  { %1747 = vmatpush.bf16.msrb.mxu1 %v5877_v9  ;;  %v5947_v9 = vld [vmem:[%s7728_s3 + $0x370] sm:$0xff] }
  0x46   :  { %1761 = vmatpush.bf16.msrb.mxu2 %v5885_v10  ;;  %v5955_v10 = vld [vmem:[%s7728_s3 + $0x3b0] sm:$0xff] }
  0x47   :  { %1775 = vmatpush.bf16.msrb.mxu3 %v5893_v11  ;;  %1734 = vmatmul.bf16.vlgmr.msrb.gmra.mxu0 %v114_v24  ;;  %v5963_v11 = vld [vmem:[%s7728_s3 + $0x3f0] sm:$0xff] }
  0x48   :  { %1782 = vmatpush.bf16.msra.mxu0 %v5908_v12  ;;  %1748 = vmatmul.bf16.vlgmr.msrb.gmra.mxu1 %v115_v26  ;;  %v5938_v12 = vld [vmem:[%s7728_s3 + $0x328] sm:$0xff]  ;;  %v5935_v24 = vld [vmem:[%s7728_s3 + $0x310] sm:$0xff] }
  0x49   :  { %1796 = vmatpush.bf16.msra.mxu1 %v5916_v13  ;;  %1762 = vmatmul.bf16.vlgmr.msrb.gmra.mxu2 %v116_v25  ;;  %v5946_v13 = vld [vmem:[%s7728_s3 + $0x368] sm:$0xff]  ;;  %v5943_v25 = vld [vmem:[%s7728_s3 + $0x350] sm:$0xff] }
  0x4a   :  { %1810 = vmatpush.bf16.msra.mxu2 %v5924_v22  ;;  %1776 = vmatmul.bf16.vlgmr.msrb.gmra.mxu3 %v117_v27  ;;  %v5952_v22 = vld [vmem:[%s7728_s3 + $0x398] sm:$0xff]  ;;  %v5951_v26 = vld [vmem:[%s7728_s3 + $0x390] sm:$0xff] }
  0x4b   :  { %1824 = vmatpush.bf16.msra.mxu3 %v5932_v23  ;;  %v5960_v23 = vld [vmem:[%s7728_s3 + $0x3d8] sm:$0xff]  ;;  %v5959_v27 = vld [vmem:[%s7728_s3 + $0x3d0] sm:$0xff] }
  0x4c   :  { %1783 = vmatpush.bf16.msra.mxu0 %v5907_v28  ;;  %v5934_v28 = vld [vmem:[%s7728_s3 + $0x308] sm:$0xff] }
  0x4d   :  { %1797 = vmatpush.bf16.msra.mxu1 %v5915_v29  ;;  %v5942_v29 = vld [vmem:[%s7728_s3 + $0x348] sm:$0xff] }
  0x4e   :  { %1811 = vmatpush.bf16.msra.mxu2 %v5923_v30  ;;  %v5950_v30 = vld [vmem:[%s7728_s3 + $0x388] sm:$0xff] }
  0x4f   :  { %1825 = vmatpush.bf16.msra.mxu3 %v5931_v31  ;;  %v5958_v31 = vld [vmem:[%s7728_s3 + $0x3c8] sm:$0xff] }
  0x50   :  { %1784 = vmatpush.bf16.msra.mxu0 %v5906_v32  ;;  %v5933_v32 = vld [vmem:[%s7728_s3 + $0x300] sm:$0xff] }
  0x51   :  { %1798 = vmatpush.bf16.msra.mxu1 %v5914_v33  ;;  %v5941_v33 = vld [vmem:[%s7728_s3 + $0x340] sm:$0xff] }
  0x52   :  { %1812 = vmatpush.bf16.msra.mxu2 %v5922_v34  ;;  %v5949_v34 = vld [vmem:[%s7728_s3 + $0x380] sm:$0xff] }
  0x53   :  { %1826 = vmatpush.bf16.msra.mxu3 %v5930_v35  ;;  %v5957_v35 = vld [vmem:[%s7728_s3 + $0x3c0] sm:$0xff] }
  0x54   :  { %1785 = vmatpush.bf16.msra.mxu0 %v5905_v36  ;;  %v5972_v36 = vld [vmem:[%s7728_s3 + $0x438] sm:$0xff] }
  0x55   :  { %1799 = vmatpush.bf16.msra.mxu1 %v5913_v37  ;;  %v5980_v37 = vld [vmem:[%s7728_s3 + $0x478] sm:$0xff] }
  0x56   :  { %1813 = vmatpush.bf16.msra.mxu2 %v5921_v38  ;;  %v74_v38 = vld [vmem:[%s7725_s0 + $0x60] sm:$0xff] }
  0x57   :  { %1827 = vmatpush.bf16.msra.mxu3 %v5929_v39  ;;  %v98_v39 = vld [vmem:[%s7725_s0 + $0x120] sm:$0xff] }
  0x58   :  { %1786 = vmatpush.bf16.msra.mxu0 %v5904_v40  ;;  %v76_v40 = vld [vmem:[%s7725_s0 + $0x70] sm:$0xff] }
  0x59   :  { %1800 = vmatpush.bf16.msra.mxu1 %v5912_v41  ;;  %v100_v41 = vld [vmem:[%s7725_s0 + $0x130] sm:$0xff] }
  0x5a   :  { %1814 = vmatpush.bf16.msra.mxu2 %v5920_v42  ;;  %v75_v42 = vld [vmem:[%s7725_s0 + $0x68] sm:$0xff] }
  0x5b   :  { %1828 = vmatpush.bf16.msra.mxu3 %v5928_v43  ;;  %v99_v43 = vld [vmem:[%s7725_s0 + $0x128] sm:$0xff] }
  0x5c   :  { %1787 = vmatpush.bf16.msra.mxu0 %v5903_v44  ;;  %v77_v44 = vld [vmem:[%s7725_s0 + $0x78] sm:$0xff] }
  0x5d   :  { %1801 = vmatpush.bf16.msra.mxu1 %v5911_v45  ;;  %v101_v45 = vld [vmem:[%s7725_s0 + $0x138] sm:$0xff] }
  0x5e   :  { %1815 = vmatpush.bf16.msra.mxu2 %v5919_v46  ;;  %v5988_v46 = vld [vmem:[%s7728_s3 + $0x4b8] sm:$0xff] }
  0x5f   :  { %1829 = vmatpush.bf16.msra.mxu3 %v5927_v47  ;;  %v5996_v47 = vld [vmem:[%s7728_s3 + $0x4f8] sm:$0xff] }
  0x60   :  { %1788 = vmatpush.bf16.msra.mxu0 %v5902_v48  ;;  %v122_v48 = vpack.c.bf16 %v98_v39, %v74_v38  ;;  %v6018_v38 = vld [vmem:[%s7728_s3 + $0x5a8] sm:$0xff] }
  0x61   :  { %1802 = vmatpush.bf16.msra.mxu1 %v5910_v49  ;;  %v124_v49 = vpack.c.bf16 %v100_v41, %v76_v40  ;;  %v6026_v39 = vld [vmem:[%s7728_s3 + $0x5e8] sm:$0xff]  ;;  %v6001_v40 = vld [vmem:[%s7728_s3 + $0x520] sm:$0xff] }
  0x62   :  { %1816 = vmatpush.bf16.msra.mxu2 %v5918_v50  ;;  %v123_v50 = vpack.c.bf16 %v99_v43, %v75_v42  ;;  %v6009_v41 = vld [vmem:[%s7728_s3 + $0x560] sm:$0xff] }
  0x63   :  { %1830 = vmatpush.bf16.msra.mxu3 %v5926_v51  ;;  %v125_v51 = vpack.c.bf16 %v101_v45, %v77_v44  ;;  %v6017_v42 = vld [vmem:[%s7728_s3 + $0x5a0] sm:$0xff]  ;;  %v6000_v44 = vld [vmem:[%s7728_s3 + $0x518] sm:$0xff] }
  0x64   :  { %1789 = vmatpush.bf16.msra.mxu0 %v5901_v52  ;;  %v5971_v52 = vld [vmem:[%s7728_s3 + $0x430] sm:$0xff]  ;;  %v6025_v43 = vld [vmem:[%s7728_s3 + $0x5e0] sm:$0xff]  ;;  %v6008_v45 = vld [vmem:[%s7728_s3 + $0x558] sm:$0xff] }
  0x65   :  { %1803 = vmatpush.bf16.msra.mxu1 %v5909_v53  ;;  %v5979_v53 = vld [vmem:[%s7728_s3 + $0x470] sm:$0xff] }
  0x66   :  { %1817 = vmatpush.bf16.msra.mxu2 %v5917_v54  ;;  %v5987_v54 = vld [vmem:[%s7728_s3 + $0x4b0] sm:$0xff] }
  0x67   :  { %1831 = vmatpush.bf16.msra.mxu3 %v5925_v55  ;;  %1790 = vmatmul.bf16.vlgmr.msra.gmra.mxu0 %v118_v4  ;;  %v5995_v55 = vld [vmem:[%s7728_s3 + $0x4f0] sm:$0xff] }
  0x68   :  { %1838 = vmatpush.bf16.msrb.mxu0 %v5940_v56  ;;  %1804 = vmatmul.bf16.vlgmr.msra.gmra.mxu1 %v119_v6  ;;  %v5970_v56 = vld [vmem:[%s7728_s3 + $0x428] sm:$0xff]  ;;  %v5967_v4 = vld [vmem:[%s7728_s3 + $0x410] sm:$0xff] }
  0x69   :  { %1852 = vmatpush.bf16.msrb.mxu1 %v5948_v57  ;;  %1818 = vmatmul.bf16.vlgmr.msra.gmra.mxu2 %v120_v5  ;;  %v5978_v57 = vld [vmem:[%s7728_s3 + $0x468] sm:$0xff]  ;;  %v5975_v5 = vld [vmem:[%s7728_s3 + $0x450] sm:$0xff] }
  0x6a   :  { %1866 = vmatpush.bf16.msrb.mxu2 %v5956_v2  ;;  %1832 = vmatmul.bf16.vlgmr.msra.gmra.mxu3 %v121_v7  ;;  %v5984_v2 = vld [vmem:[%s7728_s3 + $0x498] sm:$0xff]  ;;  %v5983_v6 = vld [vmem:[%s7728_s3 + $0x490] sm:$0xff] }
  0x6b   :  { %1880 = vmatpush.bf16.msrb.mxu3 %v5964_v3  ;;  %v5992_v3 = vld [vmem:[%s7728_s3 + $0x4d8] sm:$0xff]  ;;  %v5991_v7 = vld [vmem:[%s7728_s3 + $0x4d0] sm:$0xff] }
  0x6c   :  { %1839 = vmatpush.bf16.msrb.mxu0 %v5939_v8  ;;  %v5966_v8 = vld [vmem:[%s7728_s3 + $0x408] sm:$0xff] }
  0x6d   :  { %1853 = vmatpush.bf16.msrb.mxu1 %v5947_v9  ;;  %v5974_v9 = vld [vmem:[%s7728_s3 + $0x448] sm:$0xff] }
  0x6e   :  { %1867 = vmatpush.bf16.msrb.mxu2 %v5955_v10  ;;  %v5982_v10 = vld [vmem:[%s7728_s3 + $0x488] sm:$0xff] }
  0x6f   :  { %1881 = vmatpush.bf16.msrb.mxu3 %v5963_v11  ;;  %v5990_v11 = vld [vmem:[%s7728_s3 + $0x4c8] sm:$0xff] }
  0x70   :  { %1840 = vmatpush.bf16.msrb.mxu0 %v5938_v12  ;;  %v5965_v12 = vld [vmem:[%s7728_s3 + $0x400] sm:$0xff] }
  0x71   :  { %1854 = vmatpush.bf16.msrb.mxu1 %v5946_v13  ;;  %v5973_v13 = vld [vmem:[%s7728_s3 + $0x440] sm:$0xff] }
  0x72   :  { %1868 = vmatpush.bf16.msrb.mxu2 %v5954_v14  ;;  %v5981_v14 = vld [vmem:[%s7728_s3 + $0x480] sm:$0xff] }
  0x73   :  { %1882 = vmatpush.bf16.msrb.mxu3 %v5962_v15  ;;  %v5989_v15 = vld [vmem:[%s7728_s3 + $0x4c0] sm:$0xff] }
  0x74   :  { %1841 = vmatpush.bf16.msrb.mxu0 %v5937_v16  ;;  %v6004_v16 = vld [vmem:[%s7728_s3 + $0x538] sm:$0xff] }
  0x75   :  { %1855 = vmatpush.bf16.msrb.mxu1 %v5945_v17  ;;  %v6012_v17 = vld [vmem:[%s7728_s3 + $0x578] sm:$0xff] }
  0x76   :  { %1869 = vmatpush.bf16.msrb.mxu2 %v5953_v18  ;;  %v78_v18 = vld [vmem:[%s7725_s0 + $0x80] sm:$0xff] }
  0x77   :  { %1883 = vmatpush.bf16.msrb.mxu3 %v5961_v19  ;;  %v102_v19 = vld [vmem:[%s7725_s0 + $0x140] sm:$0xff] }
  0x78   :  { %1842 = vmatpush.bf16.msrb.mxu0 %v5936_v20  ;;  %v80_v20 = vld [vmem:[%s7725_s0 + $0x90] sm:$0xff] }
  0x79   :  { %1856 = vmatpush.bf16.msrb.mxu1 %v5944_v21  ;;  %v104_v21 = vld [vmem:[%s7725_s0 + $0x150] sm:$0xff] }
  0x7a   :  { %1870 = vmatpush.bf16.msrb.mxu2 %v5952_v22  ;;  %v79_v22 = vld [vmem:[%s7725_s0 + $0x88] sm:$0xff] }
  0x7b   :  { %1884 = vmatpush.bf16.msrb.mxu3 %v5960_v23  ;;  %v103_v23 = vld [vmem:[%s7725_s0 + $0x148] sm:$0xff] }
  0x7c   :  { %1843 = vmatpush.bf16.msrb.mxu0 %v5935_v24  ;;  %v81_v24 = vld [vmem:[%s7725_s0 + $0x98] sm:$0xff] }
  0x7d   :  { %1857 = vmatpush.bf16.msrb.mxu1 %v5943_v25  ;;  %v105_v25 = vld [vmem:[%s7725_s0 + $0x158] sm:$0xff] }
  0x7e   :  { %1871 = vmatpush.bf16.msrb.mxu2 %v5951_v26  ;;  %v6020_v26 = vld [vmem:[%s7728_s3 + $0x5b8] sm:$0xff] }
  0x7f   :  { %1885 = vmatpush.bf16.msrb.mxu3 %v5959_v27  ;;  %v6028_v27 = vld [vmem:[%s7728_s3 + $0x5f8] sm:$0xff] }
  0x80   :  { %1844 = vmatpush.bf16.msrb.mxu0 %v5934_v28  ;;  %v126_v28 = vpack.c.bf16 %v102_v19, %v78_v18 }
  0x81   :  { %1858 = vmatpush.bf16.msrb.mxu1 %v5942_v29  ;;  %v128_v29 = vpack.c.bf16 %v104_v21, %v80_v20 }
  0x82   :  { %1872 = vmatpush.bf16.msrb.mxu2 %v5950_v30  ;;  %v127_v30 = vpack.c.bf16 %v103_v23, %v79_v22 }
  0x83   :  { %1886 = vmatpush.bf16.msrb.mxu3 %v5958_v31  ;;  %v129_v31 = vpack.c.bf16 %v105_v25, %v81_v24 }
  0x84   :  { %1845 = vmatpush.bf16.msrb.mxu0 %v5933_v32  ;;  %v6003_v32 = vld [vmem:[%s7728_s3 + $0x530] sm:$0xff] }
  0x85   :  { %1859 = vmatpush.bf16.msrb.mxu1 %v5941_v33  ;;  %v6011_v33 = vld [vmem:[%s7728_s3 + $0x570] sm:$0xff] }
  0x86   :  { %1873 = vmatpush.bf16.msrb.mxu2 %v5949_v34  ;;  %v6019_v34 = vld [vmem:[%s7728_s3 + $0x5b0] sm:$0xff] }
  0x87   :  { %1887 = vmatpush.bf16.msrb.mxu3 %v5957_v35  ;;  %1846 = vmatmul.bf16.vlgmr.msrb.gmra.mxu0 %v122_v48  ;;  %v6027_v35 = vld [vmem:[%s7728_s3 + $0x5f0] sm:$0xff] }
  0x88   :  { %1894 = vmatpush.bf16.msra.mxu0 %v5972_v36  ;;  %1860 = vmatmul.bf16.vlgmr.msrb.gmra.mxu1 %v123_v50  ;;  %v6002_v36 = vld [vmem:[%s7728_s3 + $0x528] sm:$0xff]  ;;  %v5999_v48 = vld [vmem:[%s7728_s3 + $0x510] sm:$0xff] }
  0x89   :  { %1908 = vmatpush.bf16.msra.mxu1 %v5980_v37  ;;  %1874 = vmatmul.bf16.vlgmr.msrb.gmra.mxu2 %v124_v49  ;;  %v6010_v37 = vld [vmem:[%s7728_s3 + $0x568] sm:$0xff]  ;;  %v6007_v49 = vld [vmem:[%s7728_s3 + $0x550] sm:$0xff] }
  0x8a   :  { %1922 = vmatpush.bf16.msra.mxu2 %v5988_v46  ;;  %1888 = vmatmul.bf16.vlgmr.msrb.gmra.mxu3 %v125_v51  ;;  %v6016_v46 = vld [vmem:[%s7728_s3 + $0x598] sm:$0xff]  ;;  %v6015_v50 = vld [vmem:[%s7728_s3 + $0x590] sm:$0xff] }
  0x8b   :  { %1936 = vmatpush.bf16.msra.mxu3 %v5996_v47  ;;  %v6024_v47 = vld [vmem:[%s7728_s3 + $0x5d8] sm:$0xff]  ;;  %v6023_v51 = vld [vmem:[%s7728_s3 + $0x5d0] sm:$0xff] }
  0x8c   :  { %1895 = vmatpush.bf16.msra.mxu0 %v5971_v52  ;;  %v5998_v52 = vld [vmem:[%s7728_s3 + $0x508] sm:$0xff] }
  0x8d   :  { %1909 = vmatpush.bf16.msra.mxu1 %v5979_v53  ;;  %v6006_v53 = vld [vmem:[%s7728_s3 + $0x548] sm:$0xff] }
  0x8e   :  { %1923 = vmatpush.bf16.msra.mxu2 %v5987_v54  ;;  %v6014_v54 = vld [vmem:[%s7728_s3 + $0x588] sm:$0xff] }
  0x8f   :  { %1937 = vmatpush.bf16.msra.mxu3 %v5995_v55  ;;  %v6022_v55 = vld [vmem:[%s7728_s3 + $0x5c8] sm:$0xff] }
  0x90   :  { %1896 = vmatpush.bf16.msra.mxu0 %v5970_v56  ;;  %v5997_v56 = vld [vmem:[%s7728_s3 + $0x500] sm:$0xff] }
  0x91   :  { %1910 = vmatpush.bf16.msra.mxu1 %v5978_v57  ;;  %v6005_v57 = vld [vmem:[%s7728_s3 + $0x540] sm:$0xff] }
  0x92   :  { %1924 = vmatpush.bf16.msra.mxu2 %v5986_v58  ;;  %v6013_v58 = vld [vmem:[%s7728_s3 + $0x580] sm:$0xff] }
  0x93   :  { %1938 = vmatpush.bf16.msra.mxu3 %v5994_v59  ;;  %v6021_v59 = vld [vmem:[%s7728_s3 + $0x5c0] sm:$0xff]  ;;  %s4119_s3 = sshll.u32 %s6408_s10, 4  ;;  %s4120_s3 = int_to_ptr.vmem [resolvable:$true] %s4119_s3 }
  0x94   :  { %1897 = vmatpush.bf16.msra.mxu0 %v5969_v60  ;;  %v82_v60 = vld [vmem:[%s7725_s0 + $0xa0] sm:$0xff] }
  0x95   :  { %1911 = vmatpush.bf16.msra.mxu1 %v5977_v61  ;;  %v106_v61 = vld [vmem:[%s7725_s0 + $0x160] sm:$0xff] }
  0x96   :  { %1925 = vmatpush.bf16.msra.mxu2 %v5985_v62  ;;  %v83_v62 = vld [vmem:[%s7725_s0 + $0xa8] sm:$0xff] }
  0x97   :  { %1939 = vmatpush.bf16.msra.mxu3 %v5993_v63  ;;  %v107_v63 = vld [vmem:[%s7725_s0 + $0x168] sm:$0xff] }
  0x98   :  { %1898 = vmatpush.bf16.msra.mxu0 %v5968_v0  ;;  %v84_v0 = vld [vmem:[%s7725_s0 + $0xb0] sm:$0xff] }
  0x99   :  { %1912 = vmatpush.bf16.msra.mxu1 %v5976_v1  ;;  %v108_v1 = vld [vmem:[%s7725_s0 + $0x170] sm:$0xff] }
  0x9a   :  { %1926 = vmatpush.bf16.msra.mxu2 %v5984_v2  ;;  %v85_v2 = vld [vmem:[%s7725_s0 + $0xb8] sm:$0xff] }
  0x9b   :  { %1940 = vmatpush.bf16.msra.mxu3 %v5992_v3  ;;  %v109_v3 = vld [vmem:[%s7725_s0 + $0x178] sm:$0xff] }
  0x9c   :  { %1899 = vmatpush.bf16.msra.mxu0 %v5967_v4  ;;  %v130_v4 = vpack.c.bf16 %v106_v61, %v82_v60  ;;  %v5033_v60 = vld [vmem:[%s7729_s4 + $0xc0] sm:$0xf]  ;;  %v6055_v61 = vld [vmem:[%s7729_s4 + $0xcc] sm:$0xf0] }
  0x9d   :  { %1913 = vmatpush.bf16.msra.mxu1 %v5975_v5  ;;  %v131_v5 = vpack.c.bf16 %v107_v63, %v83_v62  ;;  %v5034_v63 = vor.u32 %v6055_v61, %v5033_v60 }
  0x9e   :  { %1927 = vmatpush.bf16.msra.mxu2 %v5983_v6  ;;  %v132_v6 = vpack.c.bf16 %v108_v1, %v84_v0  ;;  %v6053_v0 = vld [vmem:[%s7729_s4 + $0xc4] sm:$0xf]  ;;  %v5035_v1 = vld [vmem:[%s7729_s4 + $0xd0] sm:$0xf0] }
  0x9f   :  { %1941 = vmatpush.bf16.msra.mxu3 %v5991_v7  ;;  %v133_v7 = vpack.c.bf16 %v109_v3, %v85_v2  ;;  %v5041_v2 = vld [vmem:[%s7729_s4 + $0xc8] sm:$0xf] }
  0xa0   :  { %1900 = vmatpush.bf16.msra.mxu0 %v5966_v8 }
  0xa1   :  { %1914 = vmatpush.bf16.msra.mxu1 %v5974_v9 }
  0xa2   :  { %1928 = vmatpush.bf16.msra.mxu2 %v5982_v10 }
  0xa3   :  { %1942 = vmatpush.bf16.msra.mxu3 %v5990_v11 }
  0xa4   :  { %1901 = vmatpush.bf16.msra.mxu0 %v5965_v12  ;;  %v1679_v8 = vpop.f32.mrf.mxu0 }
  0xa5   :  { %1915 = vmatpush.bf16.msra.mxu1 %v5973_v13  ;;  %v1693_v9 = vpop.f32.mrf.mxu1 }
  0xa6   :  { %1929 = vmatpush.bf16.msra.mxu2 %v5981_v14  ;;  %v1694_v24 = vadd.f32 %v1693_v9, %v1679_v8  ;;  %v5043_v8 = vld [vmem:[%s7729_s4 + $0xd8] sm:$0xf0] }
  0xa7   :  { %1943 = vmatpush.bf16.msra.mxu3 %v5989_v15  ;;  %1902 = vmatmul.bf16.vlgmr.msra.gmra.mxu0 %v126_v28 }
  0xa8   :  { %1950 = vmatpush.bf16.msrb.mxu0 %v6004_v16  ;;  %1916 = vmatmul.bf16.vlgmr.msra.gmra.mxu1 %v127_v30 }
  0xa9   :  { %1964 = vmatpush.bf16.msrb.mxu1 %v6012_v17  ;;  %1930 = vmatmul.bf16.vlgmr.msra.gmra.mxu2 %v128_v29 }
  0xaa   :  { %1978 = vmatpush.bf16.msrb.mxu2 %v6020_v26  ;;  %1944 = vmatmul.bf16.vlgmr.msra.gmra.mxu3 %v129_v31 }
  0xab   :  { %1992 = vmatpush.bf16.msrb.mxu3 %v6028_v27 }
  0xac   :  { %1951 = vmatpush.bf16.msrb.mxu0 %v6003_v32  ;;  %v1707_v10 = vpop.f32.mrf.mxu2  ;;  %v1681_v12 = vpop.f32.mrf.mxu0  ;;  %v4917_v32 = vld [vmem:[%s7730_s5] sm:$0xf] }
  0xad   :  { %1965 = vmatpush.bf16.msrb.mxu1 %v6011_v33  ;;  %v1721_v11 = vpop.f32.mrf.mxu3  ;;  %v1695_v13 = vpop.f32.mrf.mxu1  ;;  %v1708_v27 = vadd.f32 %v1707_v10, %v1694_v24  ;;  %v6064_v33 = vld [vmem:[%s7730_s5 + $0xc] sm:$0xf0]  ;;  %v5025_v24 = vld [vmem:[%s7729_s4 + $0xa8] sm:$0xf] }
  0xae   :  { %1979 = vmatpush.bf16.msrb.mxu2 %v6019_v34  ;;  %v1696_v28 = vadd.f32 %v1695_v13, %v1681_v12  ;;  %v6062_v34 = vld [vmem:[%s7730_s5 + $0x4] sm:$0xf] }
  0xaf   :  { %1993 = vmatpush.bf16.msrb.mxu3 %v6027_v35  ;;  %v1722_v31 = vadd.f32 %v1721_v11, %v1708_v27  ;;  %v6061_v13 = vld [vmem:[%s7726_s1] sm:$0xff] }
  0xb0   :  { %1952 = vmatpush.bf16.msrb.mxu0 %v6002_v36 }
  0xb1   :  { %1966 = vmatpush.bf16.msrb.mxu1 %v6010_v37  ;;  %v4918_v37 = vor.u32 %v6064_v33, %v4917_v32  ;;  %v6050_v32 = vld [vmem:[%s7729_s4 + $0xac] sm:$0xf]  ;;  %v5027_v33 = vld [vmem:[%s7729_s4 + $0xb8] sm:$0xf0] }
  0xb2   :  { %1980 = vmatpush.bf16.msrb.mxu2 %v6018_v38  ;;  %v4919_v38 = vld [vmem:[%s7730_s5 + $0x10] sm:$0xf0] }
  0xb3   :  { %1994 = vmatpush.bf16.msrb.mxu3 %v6026_v39  ;;  %v4925_v39 = vld [vmem:[%s7730_s5 + $0x8] sm:$0xf] }
  0xb4   :  { %1953 = vmatpush.bf16.msrb.mxu0 %v6001_v40  ;;  %v1709_v14 = vpop.f32.mrf.mxu2  ;;  %v6065_v40 = vld [vmem:[%s7730_s5 + $0x14] sm:$0xf0] }
  0xb5   :  { %1967 = vmatpush.bf16.msrb.mxu1 %v6009_v41  ;;  %v1723_v15 = vpop.f32.mrf.mxu3  ;;  %v1710_v35 = vadd.f32 %v1709_v14, %v1696_v28  ;;  %v4922_v41 = vor.u32 %v6062_v34, %v4919_v38  ;;  %v5017_v14 = vld [vmem:[%s7729_s4 + $0xa0] sm:$0xf] }
  0xb6   :  { %1981 = vmatpush.bf16.msrb.mxu2 %v6017_v42  ;;  %v4926_v42 = vor.u32 %v6065_v40, %v4925_v39  ;;  %v5030_v39 = vor.u32 %v6050_v32, %v5027_v33 }
  0xb7   :  { %1995 = vmatpush.bf16.msrb.mxu3 %v6025_v43  ;;  %v6063_v43 = vld [vmem:[%s7730_s5 + $0xc] sm:$0xf] }
  0xb8   :  { %1954 = vmatpush.bf16.msrb.mxu0 %v6000_v44  ;;  %v4927_v44 = vld [vmem:[%s7730_s5 + $0x18] sm:$0xf0] }
  0xb9   :  { %1968 = vmatpush.bf16.msrb.mxu1 %v6008_v45  ;;  %v5049_v45 = vld [vmem:[%s7729_s4 + $0xe0] sm:$0xf] }
  0xba   :  { %1982 = vmatpush.bf16.msrb.mxu2 %v6016_v46 }
  0xbb   :  { %1996 = vmatpush.bf16.msrb.mxu3 %v6024_v47  ;;  %v4930_v47 = vor.u32 %v6063_v43, %v4927_v44  ;;  %v5009_v43 = vld [vmem:[%s7729_s4 + $0x88] sm:$0xf]  ;;  %v6048_v44 = vld [vmem:[%s7729_s4 + $0x94] sm:$0xf0] }
  0xbc   :  { %1955 = vmatpush.bf16.msrb.mxu0 %v5999_v48  ;;  %v6059_v48 = vld [vmem:[%s7729_s4 + $0xec] sm:$0xf0] }
  0xbd   :  { %1969 = vmatpush.bf16.msrb.mxu1 %v6007_v49  ;;  %v6057_v49 = vld [vmem:[%s7729_s4 + $0xe4] sm:$0xf] }
  0xbe   :  { %1983 = vmatpush.bf16.msrb.mxu2 %v6015_v50  ;;  %v5051_v50 = vld [vmem:[%s7729_s4 + $0xf0] sm:$0xf0] }
  0xbf   :  { %1997 = vmatpush.bf16.msrb.mxu3 %v6023_v51 }
  0xc0   :  { %1956 = vmatpush.bf16.msrb.mxu0 %v5998_v52  ;;  %v5050_v52 = vor.u32 %v6059_v48, %v5049_v45  ;;  %v6046_v48 = vld [vmem:[%s7729_s4 + $0x8c] sm:$0xf] }
  0xc1   :  { %1970 = vmatpush.bf16.msrb.mxu1 %v6006_v53  ;;  %v5054_v53 = vor.u32 %v6057_v49, %v5051_v50  ;;  %v5011_v49 = vld [vmem:[%s7729_s4 + $0x98] sm:$0xf0] }
  0xc2   :  { %1984 = vmatpush.bf16.msrb.mxu2 %v6014_v54  ;;  %v5057_v54 = vld [vmem:[%s7729_s4 + $0xe8] sm:$0xf] }
  0xc3   :  { %1998 = vmatpush.bf16.msrb.mxu3 %v6022_v55  ;;  %v6060_v55 = vld [vmem:[%s7729_s4 + $0xf4] sm:$0xf0] }
  0xc4   :  { %1957 = vmatpush.bf16.msrb.mxu0 %v5997_v56  ;;  %v1735_v16 = vpop.f32.mrf.mxu0  ;;  %v6058_v56 = vld [vmem:[%s7729_s4 + $0xec] sm:$0xf] }
  0xc5   :  { %1971 = vmatpush.bf16.msrb.mxu1 %v6005_v57  ;;  %v1749_v17 = vpop.f32.mrf.mxu1  ;;  %v1736_v46 = vadd.f32 %v1735_v16, %v1722_v31  ;;  %v1724_v57 = vadd.f32 %v1723_v15, %v1710_v35  ;;  %v6051_v15 = vld [vmem:[%s7729_s4 + $0xac] sm:$0xf0]  ;;  %v6052_v31 = vld [vmem:[%s7729_s4 + $0xb4] sm:$0xf0] }
  0xc6   :  { %1985 = vmatpush.bf16.msrb.mxu2 %v6013_v58  ;;  %v5058_v58 = vor.u32 %v6060_v55, %v5057_v54  ;;  %v5018_v27 = vor.u32 %v6051_v15, %v5017_v14  ;;  %v4985_v55 = vld [vmem:[%s7729_s4 + $0x60] sm:$0xf] }
  0xc7   :  { %1999 = vmatpush.bf16.msrb.mxu3 %v6021_v59  ;;  %1958 = vmatmul.bf16.vlgmr.msrb.gmra.mxu0 %v130_v4  ;;  %v5059_v59 = vld [vmem:[%s7729_s4 + $0xf8] sm:$0xf0]  ;;  %v1750_v3 = vadd.f32 %v1749_v17, %v1736_v46  ;;  %v6049_v17 = vld [vmem:[%s7729_s4 + $0xa4] sm:$0xf] }
  0xc8   :  { %1972 = vmatmul.bf16.vlgmr.msrb.gmra.mxu1 %v131_v5  ;;  %2081 = vmatpush.bf16.msra.mxu0 %v4918_v37  ;;  %v5062_v62 = vor.u32 %v6058_v56, %v5059_v59  ;;  %v5038_v5 = vor.u32 %v6053_v0, %v5035_v1  ;;  %v5026_v37 = vor.u32 %v6052_v31, %v5025_v24  ;;  %v6043_v56 = vld [vmem:[%s7729_s4 + $0x6c] sm:$0xf0]  ;;  %v6044_v59 = vld [vmem:[%s7729_s4 + $0x74] sm:$0xf0]  ;;  %v6042_v0 = vld [vmem:[%s7729_s4 + $0x6c] sm:$0xf] }
  0xc9   :  { %1986 = vmatmul.bf16.vlgmr.msrb.gmra.mxu2 %v132_v6  ;;  %2095 = vmatpush.bf16.msra.mxu1 %v4922_v41  ;;  %v6056_v6 = vld [vmem:[%s7729_s4 + $0xd4] sm:$0xf0]  ;;  %v6045_v41 = vld [vmem:[%s7729_s4 + $0x84] sm:$0xf]  ;;  %v4995_v1 = vld [vmem:[%s7729_s4 + $0x78] sm:$0xf0] }
  0xca   :  { %2000 = vmatmul.bf16.vlgmr.msrb.gmra.mxu3 %v133_v7  ;;  %2109 = vmatpush.bf16.msra.mxu2 %v4926_v42  ;;  %v6054_v7 = vld [vmem:[%s7729_s4 + $0xcc] sm:$0xf]  ;;  %v5042_v11 = vor.u32 %v6056_v6, %v5041_v2  ;;  %v4998_v2 = vor.u32 %v6042_v0, %v4995_v1 }
  0xcb   :  { %2123 = vmatpush.bf16.msra.mxu3 %v4930_v47  ;;  %v5046_v12 = vor.u32 %v6054_v7, %v5043_v8  ;;  %v5010_v47 = vor.u32 %v6048_v44, %v5009_v43  ;;  %v4977_v8 = vld [vmem:[%s7729_s4 + $0x48] sm:$0xf]  ;;  %v6031_v44 = vld [vmem:[%s7729_s4 + $0xc] sm:$0xf0] }
  0xcc   :  { %v7195_v18 = vpop.f32.mrf.mxu2  ;;  %v1737_v20 = vpop.f32.mrf.mxu0  ;;  %2290 = vmatpush.bf16.msrb.mxu0 %v5050_v52 }
  0xcd   :  { %v7197_v19 = vpop.f32.mrf.mxu3  ;;  %v7199_v21 = vpop.f32.mrf.mxu1  ;;  %2304 = vmatpush.bf16.msrb.mxu1 %v5054_v53  ;;  %v1738_v4 = vadd.f32 %v1737_v20, %v1724_v57  ;;  %v5019_v20 = vld [vmem:[%s7729_s4 + $0xb0] sm:$0xf0]  ;;  %v1764_v34 = vadd.f32 %v7195_v18, %v1750_v3  ;;  %v5001_v18 = vld [vmem:[%s7729_s4 + $0x80] sm:$0xf]  ;;  %v5014_v53 = vor.u32 %v6046_v48, %v5011_v49  ;;  %v6041_v57 = vld [vmem:[%s7729_s4 + $0x64] sm:$0xf] }
  0xce   :  { %2318 = vmatpush.bf16.msrb.mxu2 %v5058_v58  ;;  %v5022_v28 = vor.u32 %v6049_v17, %v5019_v20  ;;  %v4986_v58 = vor.u32 %v6043_v56, %v4985_v55  ;;  %v6038_v17 = vld [vmem:[%s7729_s4 + $0x4c] sm:$0xf]  ;;  %v4979_v20 = vld [vmem:[%s7729_s4 + $0x58] sm:$0xf0]  ;;  %v6032_v48 = vld [vmem:[%s7729_s4 + $0x14] sm:$0xf0] }
  0xcf   :  { %2332 = vmatpush.bf16.msrb.mxu3 %v5062_v62  ;;  %v1752_v35 = vadd.f32 %v7199_v21, %v1738_v4  ;;  %v6047_v21 = vld [vmem:[%s7729_s4 + $0x8c] sm:$0xf0]  ;;  %v1778_v45 = vadd.f32 %v7197_v19, %v1764_v34  ;;  %v4982_v24 = vor.u32 %v6038_v17, %v4979_v20  ;;  %v4961_v34 = vld [vmem:[%s7729_s4 + $0x28] sm:$0xf]  ;;  %v4947_v55 = vld [vmem:[%s7729_s4 + $0x18] sm:$0xf0] }
  0xd0   :  { %2291 = vmatpush.bf16.msrb.mxu0 %v5034_v63  ;;  %v5002_v42 = vor.u32 %v6047_v21, %v5001_v18  ;;  %v6039_v4 = vld [vmem:[%s7729_s4 + $0x4c] sm:$0xf0]  ;;  %v6034_v21 = vld [vmem:[%s7729_s4 + $0x2c] sm:$0xf] }
  0xd1   :  { %2305 = vmatpush.bf16.msrb.mxu1 %v5038_v5  ;;  %v6037_v5 = vld [vmem:[%s7729_s4 + $0x44] sm:$0xf] }
  0xd2   :  { %2319 = vmatpush.bf16.msrb.mxu2 %v5042_v11  ;;  %v6040_v11 = vld [vmem:[%s7729_s4 + $0x54] sm:$0xf0] }
  0xd3   :  { %2333 = vmatpush.bf16.msrb.mxu3 %v5046_v12  ;;  %v4978_v15 = vor.u32 %v6040_v11, %v4977_v8 }
  0xd4   :  { %v7201_v22 = vpop.f32.mrf.mxu2  ;;  %2292 = vmatpush.bf16.msrb.mxu0 %v5018_v27 }
  0xd5   :  { %v7203_v23 = vpop.f32.mrf.mxu3  ;;  %v1766_v40 = vadd.f32 %v7201_v22, %v1752_v35  ;;  %2306 = vmatpush.bf16.msrb.mxu1 %v5022_v28  ;;  %v5003_v22 = vld [vmem:[%s7729_s4 + $0x90] sm:$0xf0]  ;;  %v6033_v28 = vld [vmem:[%s7729_s4 + $0x24] sm:$0xf]  ;;  %v6036_v35 = vld [vmem:[%s7729_s4 + $0x34] sm:$0xf0] }
  0xd6   :  { %2320 = vmatpush.bf16.msrb.mxu2 %v5026_v37  ;;  %v5006_v46 = vor.u32 %v6045_v41, %v5003_v22  ;;  %v4962_v18 = vor.u32 %v6036_v35, %v4961_v34  ;;  %v4963_v41 = vld [vmem:[%s7729_s4 + $0x38] sm:$0xf0]  ;;  %v6234_v34 = vld [vmem:[#allocation3 + $0x544] sm:$0xf] }
  0xd7   :  { %4931 = vmatmul.msk.bf16.vlgmr.msra.gmra.mxu0 %vm2070_vm0, %v6061_v13  ;;  %2334 = vmatpush.bf16.msrb.mxu3 %v5030_v39  ;;  %v1780_v54 = vadd.f32 %v7203_v23, %v1766_v40  ;;  %v4987_v23 = vld [vmem:[%s7729_s4 + $0x70] sm:$0xf0] }
  0xd8   :  { %4932 = vmatmul.msk.bf16.vlgmr.msra.gmra.mxu1 %vm2070_vm0, %v6061_v13  ;;  %2293 = vmatpush.bf16.msrb.mxu0 %v5002_v42  ;;  %v4990_v62 = vor.u32 %v6041_v57, %v4987_v23  ;;  %v4966_v42 = vor.u32 %v6034_v21, %v4963_v41  ;;  %v6235_v41 = vld [vmem:[#allocation3 + $0x54c] sm:$0xf] }
  0xd9   :  { %4933 = vmatmul.msk.bf16.vlgmr.msra.gmra.mxu2 %vm2070_vm0, %v6061_v13  ;;  %2307 = vmatpush.bf16.msrb.mxu1 %v5006_v46 }
  0xda   :  { %4934 = vmatmul.msk.bf16.vlgmr.msra.gmra.mxu3 %vm2070_vm0, %v6061_v13  ;;  %2321 = vmatpush.bf16.msrb.mxu2 %v5010_v47 }
  0xdb   :  { %2335 = vmatpush.bf16.msrb.mxu3 %v5014_v53 }
  0xdc   :  { %2294 = vmatpush.bf16.msrb.mxu0 %v4986_v58 }
  0xdd   :  { %2308 = vmatpush.bf16.msrb.mxu1 %v4990_v62 }
  0xdf   :  { %2336 = vmatpush.bf16.msrb.mxu3 %v4998_v2 }
  0xe3   :  { %2337 = vmatpush.bf16.msrb.mxu3 %v4982_v24 }
  0xe4   :  { %v7205_v25 = vpop.f32.mrf.mxu0 }
  0xe5   :  { %v7207_v26 = vpop.f32.mrf.mxu1  ;;  %v1792_v19 = vadd.f32 %v7205_v25, %v1778_v45  ;;  %v4993_v25 = vld [vmem:[%s7729_s4 + $0x68] sm:$0xf]  ;;  %v6029_v45 = vld [vmem:[%s7729_s4 + $0x4] sm:$0xf] }
  0xe6   :  { %v4994_v63 = vor.u32 %v6044_v59, %v4993_v25 }
  0xe7   :  { %v1806_v3 = vadd.f32 %v7207_v26, %v1792_v19  ;;  %v4971_v26 = vld [vmem:[%s7729_s4 + $0x50] sm:$0xf0]  ;;  %v6030_v19 = vld [vmem:[%s7729_s4 + $0xc] sm:$0xf]  ;;  %2338 = vmatpush.bf16.msrb.mxu3 %v4966_v42 }
  0xe8   :  { %2322 = vmatpush.bf16.msrb.mxu2 %v4994_v63  ;;  %v4974_v14 = vor.u32 %v6037_v5, %v4971_v26  ;;  %v4950_v56 = vor.u32 %v6030_v19, %v4947_v55  ;;  %v5753_v42 = vld [vmem:[#allocation3 + $0x5a8] sm:$0xf0]  ;;  %v5551_v19 = vld [vmem:[#allocation3 + $0x3c0] sm:$0xf] }
  0xe9   :  { %v6198_v55 = vld [vmem:[#allocation3 + $0x41c] sm:$0xf0] }
  0xea   :  { %2309 = vmatpush.bf16.msrb.mxu1 %v4974_v14 }
  0xeb   :  { %2339 = vmatpush.bf16.msrb.mxu3 %v4950_v56  ;;  %v6186_v56 = vld [vmem:[#allocation3 + $0x3c4] sm:$0xf] }
  0xec   :  { %v7209_v29 = vpop.f32.mrf.mxu2  ;;  %v7222_v36 = vpop.f32.mrf.mxu0  ;;  %2323 = vmatpush.bf16.msrb.mxu2 %v4978_v15 }
  0xed   :  { %v7211_v30 = vpop.f32.mrf.mxu3  ;;  %v7251_v51 = vpop.f32.mrf.mxu1  ;;  %v1794_v60 = vadd.f32 %v7222_v36, %v1780_v54  ;;  %v4969_v36 = vld [vmem:[%s7729_s4 + $0x40] sm:$0xf]  ;;  %v1820_v12 = vadd.f32 %v7209_v29, %v1806_v3 }
  0xee   :  { %v4970_v7 = vor.u32 %v6039_v4, %v4969_v36  ;;  %v4953_v29 = vld [vmem:[%s7729_s4 + $0x20] sm:$0xf] }
  0xef   :  { %v1808_v13 = vadd.f32 %v7251_v51, %v1794_v60  ;;  %v6035_v51 = vld [vmem:[%s7729_s4 + $0x2c] sm:$0xf0]  ;;  %v1834_v37 = vadd.f32 %v7211_v30, %v1820_v12  ;;  %v4937_v30 = vld [vmem:[%s7729_s4] sm:$0xf] }
  0xf0   :  { %2295 = vmatpush.bf16.msrb.mxu0 %v4970_v7  ;;  %v4954_v33 = vor.u32 %v6035_v51, %v4953_v29  ;;  %v4938_v47 = vor.u32 %v6031_v44, %v4937_v30  ;;  %2324 = vmatpush.bf16.msrb.mxu2 %v4962_v18  ;;  %v6222_v30 = vld [vmem:[#allocation3 + $0x4dc] sm:$0xf0]  ;;  %v6210_v44 = vld [vmem:[#allocation3 + $0x484] sm:$0xf] }
  0xf4   :  { %v7289_v9 = vpop.f32.mrf.mxu2  ;;  %2296 = vmatpush.bf16.msrb.mxu0 %v4954_v33  ;;  %v5743_v33 = vld [vmem:[#allocation3 + $0x540] sm:$0xf] }
  0xf5   :  { %v7291_v10 = vpop.f32.mrf.mxu3  ;;  %v1822_v27 = vadd.f32 %v7289_v9, %v1808_v13  ;;  %v4955_v9 = vld [vmem:[%s7729_s4 + $0x30] sm:$0xf0] }
  0xf6   :  { %v4958_v40 = vor.u32 %v6033_v28, %v4955_v9  ;;  %v6246_v9 = vld [vmem:[#allocation3 + $0x59c] sm:$0xf0] }
  0xf7   :  { %v1836_v22 = vadd.f32 %v7291_v10, %v1822_v27  ;;  %v4939_v10 = vld [vmem:[%s7729_s4 + $0x10] sm:$0xf0]  ;;  %v5744_v35 = vor.u32 %v6246_v9, %v5743_v33 }
  0xf8   :  { %2310 = vmatpush.bf16.msrb.mxu1 %v4958_v40  ;;  %v4942_v53 = vor.u32 %v6029_v45, %v4939_v10  ;;  %2297 = vmatpush.bf16.msrb.mxu0 %v4938_v47  ;;  %v6247_v40 = vld [vmem:[#allocation3 + $0x5a4] sm:$0xf0] }
  0xf9   :  { %v5655_v47 = vld [vmem:[#allocation3 + $0x488] sm:$0xf] }
  0xfc   :  { %2311 = vmatpush.bf16.msrb.mxu1 %v4942_v53  ;;  %3701 = vmatpush.bf16.msra.mxu0 %v5744_v35  ;;  %v5657_v53 = vld [vmem:[#allocation3 + $0x4e8] sm:$0xf0]  ;;  %v6126_v35 = vld [vmem:[#allocation3 + $0x1dc] sm:$0xf0] }
 0x104   :  { %v7302_v16 = vpop.f32.mrf.mxu0 }
 0x105   :  { %v7325_v38 = vpop.f32.mrf.mxu1  ;;  %v1848_v43 = vadd.f32 %v7302_v16, %v1834_v37  ;;  %v4945_v16 = vld [vmem:[%s7729_s4 + $0x8] sm:$0xf]  ;;  %v5745_v37 = vld [vmem:[#allocation3 + $0x5a0] sm:$0xf0]  ;;  %s6411_s4 = smov 192  }
 0x106   :  { %v4946_v54 = vor.u32 %v6032_v48, %v4945_v16  ;;  %v5748_v18 = vor.u32 %v6234_v34, %v5745_v37  ;;  %v6223_v16 = vld [vmem:[#allocation3 + $0x4e4] sm:$0xf0]  ;;  %v6211_v48 = vld [vmem:[#allocation3 + $0x48c] sm:$0xf]  ;;  %v5263_v34 = vld [vmem:[#allocation3 + $0x180] sm:$0xf] }
 0x107   :  { %v1862_v57 = vadd.f32 %v7325_v38, %v1848_v43  ;;  %v5647_v43 = vld [vmem:[#allocation3 + $0x480] sm:$0xf]  ;;  %v6114_v37 = vld [vmem:[#allocation3 + $0x184] sm:$0xf] }
 0x108   :  { %2325 = vmatpush.bf16.msrb.mxu2 %v4946_v54  ;;  %3715 = vmatpush.bf16.msra.mxu1 %v5748_v18  ;;  %v5648_v45 = vor.u32 %v6222_v30, %v5647_v43  ;;  %v5660_v54 = vor.u32 %v6211_v48, %v5657_v53  ;;  %v5271_v18 = vld [vmem:[#allocation3 + $0x188] sm:$0xf]  ;;  %v5273_v43 = vld [vmem:[#allocation3 + $0x1e8] sm:$0xf0]  ;;  %v7487_v30 = vld [vmem:[%s7731_s6] sm:$0xf] }
 0x109   :  { %v5175_v48 = vld [vmem:[#allocation3 + $0xc8] sm:$0xf] }
 0x10a   :  { %3702 = vmatpush.bf16.msra.mxu0 %v5648_v45  ;;  %v5167_v45 = vld [vmem:[#allocation3 + $0xc0] sm:$0xf] }
 0x10c   :  { %v7356_v50 = vpop.f32.mrf.mxu2  ;;  %v1849_v61 = vpop.f32.mrf.mxu0 }
 0x10d   :  { %v7358_v52 = vpop.f32.mrf.mxu3  ;;  %v7397_v6 = vpop.f32.mrf.mxu1  ;;  %v1850_v49 = vadd.f32 %v1849_v61, %v1836_v22  ;;  %v1876_v25 = vadd.f32 %v7356_v50, %v1862_v57  ;;  %v5756_v22 = vor.u32 %v6235_v41, %v5753_v42  ;;  %v5552_v57 = vor.u32 %v6198_v55, %v5551_v19 }
 0x10e   :  { %v2349_v19 = vperm.slane %v7487_v30, 1 }
 0x10f   :  { %v1864_v59 = vadd.f32 %v7397_v6, %v1850_v49  ;;  %v1890_v62 = vadd.f32 %v7358_v52, %v1876_v25  ;;  %3743 = vmatpush.bf16.msra.mxu3 %v5756_v22  ;;  %v5656_v49 = vor.u32 %v6223_v16, %v5655_v47  ;;  %v6199_v25 = vld [vmem:[#allocation3 + $0x424] sm:$0xf0]  ;;  %3703 = vmatpush.bf16.msra.mxu0 %v5552_v57  ;;  %v6115_v22 = vld [vmem:[#allocation3 + $0x18c] sm:$0xf]  ;;  %v6090_v47 = vld [vmem:[#allocation3 + $0xc4] sm:$0xf] }
 0x110   :  { %v5169_v16 = vld [vmem:[#allocation3 + $0x120] sm:$0xf0]  ;;  %v6091_v57 = vld [vmem:[#allocation3 + $0xcc] sm:$0xf] }
 0x111   :  { %v5172_v55 = vor.u32 %v6090_v47, %v5169_v16  ;;  %v6213_v16 = vld [vmem:[#allocation3 + $0x49c] sm:$0xf] }
 0x113   :  { %3744 = vmatpush.bf16.msra.mxu3 %v5660_v54  ;;  %v2348_v54 = vperm.slane %v7487_v30, 0 }
 0x114   :  { %v1877_v31 = vpop.f32.mrf.mxu2 }
 0x115   :  { %v1891_v32 = vpop.f32.mrf.mxu3  ;;  %v1878_v60 = vadd.f32 %v1877_v31, %v1864_v59 }
 0x117   :  { %v1892_v0 = vadd.f32 %v1891_v32, %v1878_v60 }
 0x124   :  { %v1903_v39 = vpop.f32.mrf.mxu0 }
 0x125   :  { %v1917_v46 = vpop.f32.mrf.mxu1  ;;  %v1904_v1 = vadd.f32 %v1903_v39, %v1890_v62  ;;  %v5751_v39 = vld [vmem:[#allocation3 + $0x548] sm:$0xf]  ;;  %v5561_v62 = vld [vmem:[#allocation3 + $0x428] sm:$0xf0] }
 0x126   :  { %v5752_v21 = vor.u32 %v6247_v40, %v5751_v39  ;;  %v5264_v39 = vor.u32 %v6126_v35, %v5263_v34  ;;  %v5265_v40 = vld [vmem:[#allocation3 + $0x1e0] sm:$0xf0]  ;;  %v5769_v35 = vld [vmem:[#allocation3 + $0x5b8] sm:$0xf0] }
 0x127   :  { %v1918_v36 = vadd.f32 %v1917_v46, %v1904_v1  ;;  %v5649_v46 = vld [vmem:[#allocation3 + $0x4e0] sm:$0xf0]  ;;  %v6174_v1 = vld [vmem:[#allocation3 + $0x35c] sm:$0xf0]  ;;  %v5268_v41 = vor.u32 %v6114_v37, %v5265_v40  ;;  %v5663_v37 = vld [vmem:[#allocation3 + $0x490] sm:$0xf] }
 0x128   :  { %3729 = vmatpush.bf16.msra.mxu2 %v5752_v21  ;;  %v5652_v10 = vor.u32 %v6210_v44, %v5649_v46  ;;  %v6127_v21 = vld [vmem:[#allocation3 + $0x1e4] sm:$0xf0]  ;;  %v5276_v44 = vor.u32 %v6115_v22, %v5273_v43  ;;  %v6102_v46 = vld [vmem:[#allocation3 + $0x11c] sm:$0xf0]  ;;  %v5665_v22 = vld [vmem:[#allocation3 + $0x4f0] sm:$0xf0] }
 0x129   :  { %v5272_v42 = vor.u32 %v6127_v21, %v5271_v18  ;;  %v5671_v43 = vld [vmem:[#allocation3 + $0x498] sm:$0xf] }
 0x12a   :  { %3716 = vmatpush.bf16.msra.mxu1 %v5652_v10  ;;  %v5168_v10 = vor.u32 %v6102_v46, %v5167_v45 }
 0x12c   :  { %v1931_v58 = vpop.f32.mrf.mxu2  ;;  %v1905_v61 = vpop.f32.mrf.mxu0  ;;  %3730 = vmatpush.bf16.msra.mxu2 %v5656_v49  ;;  %v6103_v49 = vld [vmem:[#allocation3 + $0x124] sm:$0xf0] }
 0x12d   :  { %v1945_v23 = vpop.f32.mrf.mxu3  ;;  %v1919_v63 = vpop.f32.mrf.mxu1  ;;  %v1906_v2 = vadd.f32 %v1905_v61, %v1892_v0  ;;  %v1932_v5 = vadd.f32 %v1931_v58, %v1918_v36  ;;  %v5553_v58 = vld [vmem:[#allocation3 + $0x420] sm:$0xf0]  ;;  %v6187_v61 = vld [vmem:[#allocation3 + $0x3cc] sm:$0xf]  ;;  %v5455_v0 = vld [vmem:[#allocation3 + $0x300] sm:$0xf] }
 0x12e   :  { %v5556_v59 = vor.u32 %v6186_v56, %v5553_v58  ;;  %v5463_v36 = vld [vmem:[#allocation3 + $0x308] sm:$0xf]  ;;  %v5176_v56 = vor.u32 %v6103_v49, %v5175_v48  ;;  %v5177_v58 = vld [vmem:[#allocation3 + $0x128] sm:$0xf0]  ;;  %v5673_v48 = vld [vmem:[#allocation3 + $0x4f8] sm:$0xf0] }
 0x12f   :  { %v1920_v7 = vadd.f32 %v1919_v63, %v1906_v2  ;;  %v1946_v8 = vadd.f32 %v1945_v23, %v1932_v5  ;;  %v5559_v23 = vld [vmem:[#allocation3 + $0x3c8] sm:$0xf]  ;;  %v5564_v63 = vor.u32 %v6187_v61, %v5561_v62  ;;  %v6162_v2 = vld [vmem:[#allocation3 + $0x304] sm:$0xf] }
 0x130   :  { %v5560_v60 = vor.u32 %v6199_v25, %v5559_v23  ;;  %3717 = vmatpush.bf16.msra.mxu1 %v5556_v59  ;;  %v5180_v59 = vor.u32 %v6091_v57, %v5177_v58  ;;  %v6200_v57 = vld [vmem:[#allocation3 + $0x42c] sm:$0xf0]  ;;  %v6188_v58 = vld [vmem:[#allocation3 + $0x3d4] sm:$0xf] }
 0x131   :  { %3745 = vmatpush.bf16.msra.mxu3 %v5564_v63  ;;  %v5071_v63 = vld [vmem:[#allocation3] sm:$0xf] }
 0x132   :  { %3731 = vmatpush.bf16.msra.mxu2 %v5560_v60 }
 0x134   :  { %v1933_v3 = vpop.f32.mrf.mxu2 }
 0x135   :  { %v1947_v38 = vpop.f32.mrf.mxu3  ;;  %v1934_v50 = vadd.f32 %v1933_v3, %v1920_v7  ;;  %v5456_v3 = vor.u32 %v6174_v1, %v5455_v0  ;;  %v6078_v0 = vld [vmem:[#allocation3 + $0x5c] sm:$0xf0]  ;;  %v6066_v1 = vld [vmem:[#allocation3 + $0x4] sm:$0xf] }
 0x137   :  { %v1948_v12 = vadd.f32 %v1947_v38, %v1934_v50  ;;  %v5457_v38 = vld [vmem:[#allocation3 + $0x360] sm:$0xf0]  ;;  %v5465_v50 = vld [vmem:[#allocation3 + $0x368] sm:$0xf0]  ;;  %3704 = vmatpush.bf16.msra.mxu0 %v5456_v3  ;;  %v5072_v3 = vor.u32 %v6078_v0, %v5071_v63 }
 0x138   :  { %v5460_v5 = vor.u32 %v6162_v2, %v5457_v38  ;;  %v2350_v2 = vperm.slane %v7487_v30, 2  ;;  %v5073_v38 = vld [vmem:[#allocation3 + $0x60] sm:$0xf0] }
 0x13a   :  { %3718 = vmatpush.bf16.msra.mxu1 %v5460_v5 }
 0x144   :  { %v1959_v4 = vpop.f32.mrf.mxu0 }
 0x145   :  { %v1973_v26 = vpop.f32.mrf.mxu1  ;;  %v1960_v13 = vadd.f32 %v1959_v4, %v1946_v8  ;;  %v6175_v4 = vld [vmem:[#allocation3 + $0x364] sm:$0xf0] }
 0x146   :  { %v5464_v7 = vor.u32 %v6175_v4, %v5463_v36  ;;  %v5079_v36 = vld [vmem:[#allocation3 + $0x8] sm:$0xf] }
 0x147   :  { %v1974_v52 = vadd.f32 %v1973_v26, %v1960_v13  ;;  %v6163_v26 = vld [vmem:[#allocation3 + $0x30c] sm:$0xf]  ;;  %v5359_v13 = vld [vmem:[#allocation3 + $0x240] sm:$0xf] }
 0x148   :  { %3732 = vmatpush.bf16.msra.mxu2 %v5464_v7  ;;  %v5076_v7 = vor.u32 %v6066_v1, %v5073_v38  ;;  %v6189_v1 = vld [vmem:[#allocation3 + $0x3dc] sm:$0xf] }
 0x14c   :  { %v1987_v6 = vpop.f32.mrf.mxu2  ;;  %v1961_v14 = vpop.f32.mrf.mxu0 }
 0x14d   :  { %v2001_v11 = vpop.f32.mrf.mxu3  ;;  %v1962_v15 = vadd.f32 %v1961_v14, %v1948_v12  ;;  %v1975_v17 = vpop.f32.mrf.mxu1  ;;  %v1988_v20 = vadd.f32 %v1987_v6, %v1974_v52  ;;  %v6150_v14 = vld [vmem:[#allocation3 + $0x29c] sm:$0xf0] }
 0x14e   :  { %v5360_v52 = vor.u32 %v6150_v14, %v5359_v13  ;;  %v5759_v13 = vld [vmem:[#allocation3 + $0x550] sm:$0xf] }
 0x14f   :  { %v1976_v24 = vadd.f32 %v1975_v17, %v1962_v15  ;;  %v2002_v28 = vadd.f32 %v2001_v11, %v1988_v20  ;;  %v5468_v11 = vor.u32 %v6163_v26, %v5465_v50  ;;  %v6138_v15 = vld [vmem:[#allocation3 + $0x244] sm:$0xf]  ;;  %v5367_v20 = vld [vmem:[#allocation3 + $0x248] sm:$0xf]  ;;  %v6067_v50 = vld [vmem:[#allocation3 + $0xc] sm:$0xf] }
 0x150   :  { %v5361_v17 = vld [vmem:[#allocation3 + $0x2a0] sm:$0xf0]  ;;  %3705 = vmatpush.bf16.msra.mxu0 %v5360_v52  ;;  %v6079_v26 = vld [vmem:[#allocation3 + $0x64] sm:$0xf0]  ;;  %v6248_v14 = vld [vmem:[#allocation3 + $0x5ac] sm:$0xf0] }
 0x151   :  { %3746 = vmatpush.bf16.msra.mxu3 %v5468_v11 }
 0x154   :  { %v1989_v27 = vpop.f32.mrf.mxu2  ;;  %v7472_v8 = vpop.f32.mrf.mxu0  ;;  %3706 = vmatpush.bf16.msra.mxu0 %v5264_v39  ;;  %v6224_v39 = vld [vmem:[#allocation3 + $0x4ec] sm:$0xf0] }
 0x155   :  { %v1990_v29 = vadd.f32 %v1989_v27, %v1976_v24  ;;  %v2003_v51 = vpop.f32.mrf.mxu3  ;;  %v7474_v6 = vpop.f32.mrf.mxu1  ;;  %v6151_v24 = vld [vmem:[#allocation3 + $0x2a4] sm:$0xf0]  ;;  %v5664_v46 = vor.u32 %v6224_v39, %v5663_v37 }
 0x157   :  { %v2004_v31 = vadd.f32 %v2003_v51, %v1990_v29  ;;  %v5364_v29 = vor.u32 %v6138_v15, %v5361_v17  ;;  %v5368_v51 = vor.u32 %v6151_v24, %v5367_v20  ;;  %v6236_v15 = vld [vmem:[#allocation3 + $0x554] sm:$0xf]  ;;  %v5760_v20 = vor.u32 %v6248_v14, %v5759_v13 }
 0x158   :  { %3707 = vmatpush.bf16.msra.mxu0 %v5168_v10  ;;  %v5761_v24 = vld [vmem:[#allocation3 + $0x5b0] sm:$0xf0]  ;;  %v6225_v10 = vld [vmem:[#allocation3 + $0x4f4] sm:$0xf0] }
 0x159   :  { %v2006_v32 = vpack.c.bf16 %v2004_v31, %v2002_v28  ;;  %v6139_v28 = vld [vmem:[#allocation3 + $0x24c] sm:$0xf]  ;;  %3719 = vmatpush.bf16.msra.mxu1 %v5364_v29  ;;  %3733 = vmatpush.bf16.msra.mxu2 %v5368_v51  ;;  %v5764_v29 = vor.u32 %v6236_v15, %v5761_v24  ;;  %v5767_v51 = vld [vmem:[#allocation3 + $0x558] sm:$0xf]  ;;  %v5672_v49 = vor.u32 %v6225_v10, %v5671_v43  ;;  %v6164_v15 = vld [vmem:[#allocation3 + $0x314] sm:$0xf] }
 0x15a   :  { %v5369_v31 = vld [vmem:[#allocation3 + $0x2a8] sm:$0xf0] }
 0x15b   :  { %2298 = vmatmul.bf16.vlgmr.msrb.gmra.mxu0 %v2006_v32  ;;  %2312 = vmatmul.bf16.vlgmr.msrb.gmra.mxu1 %v2006_v32  ;;  %v5372_v9 = vor.u32 %v6139_v28, %v5369_v31  ;;  %v6249_v28 = vld [vmem:[#allocation3 + $0x5b4] sm:$0xf0]  ;;  %v6237_v31 = vld [vmem:[#allocation3 + $0x55c] sm:$0xf] }
 0x15c   :  { %2326 = vmatmul.bf16.vlgmr.msrb.gmra.mxu2 %v2006_v32  ;;  %2340 = vmatmul.bf16.vlgmr.msrb.gmra.mxu3 %v2006_v32  ;;  %v7476_v12 = vpop.f32.mrf.mxu2  ;;  %v7480_v32 = vpop.f32.mrf.mxu0  ;;  %v5768_v34 = vor.u32 %v6249_v28, %v5767_v51  ;;  %v5481_v51 = vld [vmem:[#allocation3 + $0x378] sm:$0xf0] }
 0x15d   :  { %v7478_v27 = vpop.f32.mrf.mxu3  ;;  %v7482_v33 = vpop.f32.mrf.mxu1  ;;  %3747 = vmatpush.bf16.msra.mxu3 %v5372_v9  ;;  %3720 = vmatpush.bf16.msra.mxu1 %v5268_v41  ;;  %v5772_v41 = vor.u32 %v6237_v31, %v5769_v35 }
 0x15e   :  { %3734 = vmatpush.bf16.msra.mxu2 %v5272_v42  ;;  %3708 = vmatpush.bf16.msra.mxu0 %v5072_v3  ;;  %v6212_v42 = vld [vmem:[#allocation3 + $0x494] sm:$0xf]  ;;  %v5577_v3 = vld [vmem:[#allocation3 + $0x438] sm:$0xf0] }
 0x15f   :  { %v5668_v47 = vor.u32 %v6212_v42, %v5665_v22  ;;  %v5383_v42 = vld [vmem:[#allocation3 + $0x258] sm:$0xf] }
 0x161   :  { %3748 = vmatpush.bf16.msra.mxu3 %v5276_v44  ;;  %3721 = vmatpush.bf16.msra.mxu1 %v5172_v55  ;;  %v5676_v55 = vor.u32 %v6213_v16, %v5673_v48 }
 0x162   :  { %3735 = vmatpush.bf16.msra.mxu2 %v5176_v56  ;;  %3757 = vmatpush.bf16.msrb.mxu0 %v5760_v20  ;;  %v5567_v56 = vld [vmem:[#allocation3 + $0x3d0] sm:$0xf] }
 0x164   :  { %v7489_v53 = vpop.f32.mrf.mxu2 }
 0x165   :  { %v7493_v60 = vpop.f32.mrf.mxu3  ;;  %3749 = vmatpush.bf16.msra.mxu3 %v5180_v59  ;;  %3722 = vmatpush.bf16.msra.mxu1 %v5076_v7  ;;  %v5569_v59 = vld [vmem:[#allocation3 + $0x430] sm:$0xf0] }
 0x166   :  { %3758 = vmatpush.bf16.msrb.mxu0 %v5664_v46  ;;  %v5572_v0 = vor.u32 %v6188_v58, %v5569_v59 }
 0x169   :  { %3771 = vmatpush.bf16.msrb.mxu1 %v5764_v29  ;;  %v6165_v29 = vld [vmem:[#allocation3 + $0x31c] sm:$0xf] }
 0x16d   :  { %3772 = vmatpush.bf16.msrb.mxu1 %v5668_v47 }
 0x171   :  { %3773 = vmatpush.bf16.msrb.mxu1 %v5572_v0 }
 0x1d8   :  { %v2299_v23 = vpop.f32.mrf.mxu0  ;;  %v2313_v25 = vpop.f32.mrf.mxu1 }
 0x1d9   :  { %v2300_v61 = vadd.f32 %v2299_v23, %v7472_v8  ;;  %v2314_v62 = vadd.f32 %v2313_v25, %v7474_v6  ;;  %v5081_v8 = vld [vmem:[#allocation3 + $0x68] sm:$0xf0]  ;;  %v5080_v6 = vor.u32 %v6079_v26, %v5079_v36  ;;  %v5568_v25 = vor.u32 %v6200_v57, %v5567_v56 }
 0x1da   :  { %v5084_v11 = vor.u32 %v6067_v50, %v5081_v8  ;;  %v2351_v36 = vperm.slane %v7487_v30, 3  ;;  %v5580_v50 = vor.u32 %v6189_v1, %v5577_v3  ;;  %v5471_v8 = vld [vmem:[#allocation3 + $0x310] sm:$0xf] }
 0x1db   :  { %v2356_v4 = vadd.f32 %v2348_v54, %v2300_v61  ;;  %v2357_v5 = vadd.f32 %v2349_v19, %v2314_v62  ;;  %3736 = vmatpush.bf16.msra.mxu2 %v5080_v6  ;;  %v5575_v61 = vld [vmem:[#allocation3 + $0x3d8] sm:$0xf]  ;;  %v6176_v6 = vld [vmem:[#allocation3 + $0x36c] sm:$0xf0]  ;;  %3759 = vmatpush.bf16.msrb.mxu0 %v5568_v25 }
 0x1dc   :  { %3750 = vmatpush.bf16.msra.mxu3 %v5084_v11  ;;  %v6201_v62 = vld [vmem:[#allocation3 + $0x434] sm:$0xf0]  ;;  %v5472_v14 = vor.u32 %v6176_v6, %v5471_v8 }
 0x1dd   :  { %v5063_v52 = vmul.f32 -1.442695, %v2356_v4  ;;  %v5065_v17 = vmul.f32 -1.442695, %v2357_v5 }
 0x1df   :  { %6268 = vpow2.f32 %v5063_v52  ;;  %v2327_v9 = vpop.f32.mrf.mxu2  ;;  %3785 = vmatpush.bf16.msrb.mxu2 %v5768_v34  ;;  %v2341_v23 = vpop.f32.mrf.mxu3  ;;  %v5473_v52 = vld [vmem:[#allocation3 + $0x370] sm:$0xf0]  ;;  %3760 = vmatpush.bf16.msrb.mxu0 %v5472_v14  ;;  %v6152_v34 = vld [vmem:[#allocation3 + $0x2ac] sm:$0xf0] }
 0x1e0   :  { %6270 = vpow2.f32 %v5065_v17  ;;  %v2328_v40 = vadd.f32 %v2327_v9, %v7476_v12  ;;  %v2301_v18 = vpop.f32.mrf.mxu0  ;;  %v2315_v21 = vpop.f32.mrf.mxu1  ;;  %3799 = vmatpush.bf16.msrb.mxu3 %v5772_v41  ;;  %v5479_v17 = vld [vmem:[#allocation3 + $0x318] sm:$0xf]  ;;  %v5476_v31 = vor.u32 %v6164_v15, %v5473_v52  ;;  %v5375_v9 = vld [vmem:[#allocation3 + $0x250] sm:$0xf]  ;;  %v5377_v41 = vld [vmem:[#allocation3 + $0x2b0] sm:$0xf0] }
 0x1e1   :  { %v2302_v44 = vadd.f32 %v2301_v18, %v7480_v32  ;;  %v2316_v45 = vadd.f32 %v2315_v21, %v7482_v33  ;;  %v5376_v18 = vor.u32 %v6152_v34, %v5375_v9  ;;  %v6140_v21 = vld [vmem:[#allocation3 + $0x254] sm:$0xf] }
 0x1e2   :  { %v2358_v12 = vadd.f32 %v2350_v2, %v2328_v40  ;;  %v5484_v40 = vor.u32 %v6165_v29, %v5481_v51  ;;  %3774 = vmatpush.bf16.msrb.mxu1 %v5476_v31  ;;  %v5380_v43 = vor.u32 %v6140_v21, %v5377_v41  ;;  %v6116_v31 = vld [vmem:[#allocation3 + $0x194] sm:$0xf] }
 0x1e3   :  { %v2360_v32 = vadd.f32 %v2348_v54, %v2302_v44  ;;  %v2361_v33 = vadd.f32 %v2349_v19, %v2316_v45  ;;  %3786 = vmatpush.bf16.msrb.mxu2 %v5672_v49  ;;  %v5576_v54 = vor.u32 %v6201_v62, %v5575_v61  ;;  %v2342_v19 = vadd.f32 %v2341_v23, %v7478_v27  ;;  %v6177_v27 = vld [vmem:[#allocation3 + $0x374] sm:$0xf0]  ;;  %v6141_v61 = vld [vmem:[#allocation3 + $0x25c] sm:$0xf]  ;;  %v5281_v9 = vld [vmem:[#allocation3 + $0x1f0] sm:$0xf0] }
 0x1e4   :  { %v5067_v63 = vmul.f32 -1.442695, %v2358_v12  ;;  %3800 = vmatpush.bf16.msrb.mxu3 %v5676_v55  ;;  %v5480_v39 = vor.u32 %v6177_v27, %v5479_v17  ;;  %v6153_v44 = vld [vmem:[#allocation3 + $0x2b4] sm:$0xf0]  ;;  %3761 = vmatpush.bf16.msrb.mxu0 %v5376_v18  ;;  %v5385_v62 = vld [vmem:[#allocation3 + $0x2b8] sm:$0xf0] }
 0x1e5   :  { %v6269_v38 = vpop.eup %6268  ;;  %v5064_v4 = vmul.f32 -1.442695, %v2360_v32  ;;  %v5066_v5 = vmul.f32 -1.442695, %v2361_v33  ;;  %v2359_v20 = vadd.f32 %v2351_v36, %v2342_v19  ;;  %v5388_v8 = vor.u32 %v6141_v61, %v5385_v62  ;;  %v6129_v18 = vld [vmem:[#allocation3 + $0x1f4] sm:$0xf0] }
 0x1e6   :  { %v6271_v7 = vpop.eup %6270  ;;  %v7512_v26 = vadd.f32 1.0, %v6269_v38  ;;  %6272 = vpow2.f32 %v5067_v63  ;;  %3775 = vmatpush.bf16.msrb.mxu1 %v5380_v43  ;;  %v6117_v43 = vld [vmem:[#allocation3 + $0x19c] sm:$0xf]  ;;  %v6214_v62 = vld [vmem:[#allocation3 + $0x4a4] sm:$0xf] }
 0x1e7   :  { %v7515_v11 = vadd.f32 1.0, %v6271_v7  ;;  %6274 = vpow2.f32 %v5064_v4  ;;  %v2329_v13 = vpop.f32.mrf.mxu2  ;;  %3787 = vmatpush.bf16.msrb.mxu2 %v5576_v54  ;;  %v2343_v10 = vpop.f32.mrf.mxu3  ;;  %v5279_v4 = vld [vmem:[#allocation3 + $0x190] sm:$0xf] }
 0x1e8   :  { %6276 = vrcp.f32 %v7512_v26  ;;  %v2330_v24 = vadd.f32 %v2329_v13, %v7489_v53  ;;  %3801 = vmatpush.bf16.msrb.mxu3 %v5580_v50  ;;  %v2381_v28 = vand.u32 2147483647, %v7512_v26  ;;  %vm2377_vm1 = vweird.f32 %v7512_v26 }
 0x1e9   :  { %6278 = vrcp.f32 %v7515_v11  ;;  %v2383_v12 = vand.u32 2147483648, %v7512_v26  ;;  %v2421_v56 = vand.u32 2147483648, %v7515_v11  ;;  %v2419_v58 = vand.u32 2147483647, %v7515_v11 }
 0x1ea   :  { %6280 = vpow2.f32 %v5066_v5  ;;  %v2362_v37 = vadd.f32 %v2350_v2, %v2330_v24  ;;  %v5384_v2 = vor.u32 %v6153_v44, %v5383_v42  ;;  %vm7541_vm2 = vcmp.eq.f32.partialorder %v2381_v28, 8.507059e+37  ;;  %v6128_v5 = vld [vmem:[#allocation3 + $0x1ec] sm:$0xf0]  ;;  %v5289_v44 = vld [vmem:[#allocation3 + $0x1f8] sm:$0xf0] }
 0x1eb   :  { %6282 = vtanh.f32 %v2359_v20  ;;  %3788 = vmatpush.bf16.msrb.mxu2 %v5480_v39  ;;  %v2344_v33 = vadd.f32 %v2343_v10, %v7493_v60  ;;  %vm2415_vm3 = vweird.f32 %v7515_v11  ;;  %v2384_v0 = vor.u32 1.1754944e-38, %v2383_v12  ;;  %v5183_v10 = vld [vmem:[#allocation3 + $0xd0] sm:$0xf] }
 0x1ec   :  { %v6273_v35 = vpop.eup %6272  ;;  %v5068_v47 = vmul.f32 -1.442695, %v2362_v37  ;;  %3802 = vmatpush.bf16.msrb.mxu3 %v5484_v40  ;;  %v2422_v3 = vor.u32 1.1754944e-38, %v2421_v56  ;;  %vm7557_vm6 = vcmp.eq.f32.partialorder %v2419_v58, 8.507059e+37  ;;  %v5280_v20 = vor.u32 %v6128_v5, %v5279_v4  ;;  %v5287_v40 = vld [vmem:[#allocation3 + $0x198] sm:$0xf] }
 0x1ed   :  { %v6275_v53 = vpop.eup %6274  ;;  %v7525_v22 = vadd.f32 1.0, %v6273_v35  ;;  %v2363_v50 = vadd.f32 %v2351_v36, %v2344_v33  ;;  %v58_v36 = vld [vmem:[%s7727_s2] sm:$0xff]  ;;  %v5284_v58 = vor.u32 %v6116_v31, %v5281_v9  ;;  %v6105_v33 = vld [vmem:[#allocation3 + $0x134] sm:$0xf0]  ;;  %v5292_v5 = vor.u32 %v6117_v43, %v5289_v44  ;;  %v5097_v31 = vld [vmem:[#allocation3 + $0x78] sm:$0xf0] }
 0x1ee   :  { %v7527_v45 = vpop.eup %6276  ;;  %v7529_v46 = vadd.f32 1.0, %v6275_v53  ;;  %3762 = vmatpush.bf16.msrb.mxu0 %v5280_v20 }
 0x1ef   :  { %v7531_v16 = vpop.eup %6278  ;;  %v2373_v48 = vmul.f32 %v7527_v45, %v7512_v26  ;;  %6284 = vrcp.f32 %v7525_v22  ;;  %v2459_v59 = vand.u32 2147483648, %v7525_v22  ;;  %3789 = vmatpush.bf16.msrb.mxu2 %v5384_v2  ;;  %vm2378_vm4 = vweird.f32 %v7527_v45  ;;  %v6104_v2 = vld [vmem:[#allocation3 + $0x12c] sm:$0xf0]  ;;  %3776 = vmatpush.bf16.msrb.mxu1 %v5284_v58 }
 0x1f0   :  { %v6281_v49 = vpop.eup %6280  ;;  %v2411_v55 = vmul.f32 %v7531_v16, %v7515_v11  ;;  %6286 = vrcp.f32 %v7529_v46  ;;  %vm2416_vm5 = vweird.f32 %v7531_v16  ;;  %v2457_v7 = vand.u32 2147483647, %v7525_v22  ;;  %vm2379_vm8 = vmor %vm2377_vm1, %vm2378_vm4  ;;  %3803 = vmatpush.bf16.msrb.mxu3 %v5388_v8 }
 0x1f1   :  { %v2374_v23 = vsub.f32 1.0, %v2373_v48  ;;  %v7547_v32 = vadd.f32 1.0, %v6281_v49  ;;  %6288 = vpow2.f32 %v5068_v47  ;;  %v6283_v1 = vpop.eup %6282  ;;  %vm2453_vm7 = vweird.f32 %v7525_v22  ;;  %vm7584_vm9 = vmor %vm2415_vm3, %vm2416_vm5  ;;  %v5185_v49 = vld [vmem:[#allocation3 + $0x130] sm:$0xf0] }
 0x1f2   :  { %v2412_v25 = vsub.f32 1.0, %v2411_v55  ;;  %v7570_v13 = vor.u32 1.1754944e-38, %v2459_v59  ;;  %vm2392_vm10 = vweird.f32 %v7529_v46  ;;  %v2396_v17 = vand.u32 2147483647, %v7529_v46  ;;  %v5191_v55 = vld [vmem:[#allocation3 + $0xd8] sm:$0xf] }
 0x1f3   :  { %v2375_v63 = vmul.f32 %v7527_v45, %v2374_v23  ;;  %6290 = vrcp.f32 %v7547_v32  ;;  %v2436_v15 = vand.u32 2147483648, %v7547_v32  ;;  %v2434_v27 = vand.u32 2147483647, %v7547_v32  ;;  %v5193_v59 = vld [vmem:[#allocation3 + $0x138] sm:$0xf0] }
 0x1f4   :  { %v2413_v60 = vmul.f32 %v7531_v16, %v2412_v25  ;;  %6292 = vtanh.f32 %v2363_v50  ;;  %vm2430_vm11 = vweird.f32 %v7547_v32  ;;  %v2398_v47 = vand.u32 2147483648, %v7529_v46  ;;  %v6093_v25 = vld [vmem:[#allocation3 + $0xdc] sm:$0xf]  ;;  %v5089_v50 = vld [vmem:[#allocation3 + $0x70] sm:$0xf0]  ;;  %3804 = vmatpush.bf16.msrb.mxu3 %v5292_v5 }
 0x1f5   :  { %v7561_v54 = vpop.eup %6284  ;;  %v2376_v19 = vadd.f32 %v7527_v45, %v2375_v63  ;;  %v5288_v23 = vor.u32 %v6129_v18, %v5287_v40  ;;  %vm7620_vm15 = vcmp.eq.f32.partialorder %v2396_v17, 8.507059e+37  ;;  %v5087_v63 = vld [vmem:[#allocation3 + $0x10] sm:$0xf]  ;;  %vm7633_vm1 = vcmp.eq.f32.partialorder %v2434_v27, 8.507059e+37  ;;  %v5583_v5 = vld [vmem:[#allocation3 + $0x3e0] sm:$0xf] }
 0x1f6   :  { %v2449_v6 = vmul.f32 %v7561_v54, %v7525_v22  ;;  %v2414_v14 = vadd.f32 %v7531_v16, %v2413_v60  ;;  %v7578_v52 = vpop.eup %6286  ;;  %vm2454_vm12 = vweird.f32 %v7561_v54  ;;  %v2399_v38 = vor.u32 1.1754944e-38, %v2398_v47  ;;  %v6250_v47 = vld [vmem:[#allocation3 + $0x5bc] sm:$0xf0]  ;;  %v6215_v60 = vld [vmem:[#allocation3 + $0x4ac] sm:$0xf] }
 0x1f7   :  { %v2380_v26 = vsel %vm2379_vm8, %v7527_v45, %v2376_v19  ;;  %v6289_v24 = vpop.eup %6288  ;;  %v2388_v28 = vmul.f32 %v7578_v52, %v7529_v46  ;;  %v2437_v45 = vor.u32 1.1754944e-38, %v2436_v15  ;;  %vm2393_vm13 = vweird.f32 %v7578_v52  ;;  %vm7628_vm0 = vmor %vm2453_vm7, %vm2454_vm12  ;;  %3790 = vmatpush.bf16.msrb.mxu2 %v5288_v23  ;;  %v6068_v19 = vld [vmem:[#allocation3 + $0x14] sm:$0xf]  ;;  %v59_v46 = vld [vmem:[%s7727_s2 + $0x8] sm:$0xff] }
 0x1f8   :  { %v2450_v11 = vsub.f32 1.0, %v2449_v6  ;;  %v2385_v29 = vsel %vm7541_vm2, %v2384_v0, %v2380_v26  ;;  %v2418_v51 = vsel %vm7584_vm9, %v7531_v16, %v2414_v14  ;;  %v7606_v39 = vadd.f32 1.0, %v6289_v24  ;;  %v6092_v16 = vld [vmem:[#allocation3 + $0xd4] sm:$0xf]  ;;  %v6080_v0 = vld [vmem:[#allocation3 + $0x6c] sm:$0xf0]  ;;  %vm7641_vm2 = vmor %vm2392_vm10, %vm2393_vm13 }
 0x1f9   :  { %v7602_v34 = vpop.eup %6290  ;;  %v2423_v35 = vsel %vm7557_vm6, %v2422_v3, %v2418_v51  ;;  %v2484_v37 = vmul.f32 %v6283_v1, %v2385_v29  ;;  %v2389_v42 = vsub.f32 1.0, %v2388_v28  ;;  %v5184_v14 = vor.u32 %v6104_v2, %v5183_v10  ;;  %v6081_v26 = vld [vmem:[#allocation3 + $0x74] sm:$0xf0]  ;;  %v6069_v28 = vld [vmem:[#allocation3 + $0x1c] sm:$0xf] }
 0x1fa   :  { %v2451_v21 = vmul.f32 %v7561_v54, %v2450_v11  ;;  %v2482_v41 = vmul.f32 %v2423_v35, %v58_v36  ;;  %v2426_v53 = vmul.f32 %v7602_v34, %v7547_v32  ;;  %6294 = vrcp.f32 %v7606_v39  ;;  %v6293_v1 = vpop.eup %6292  ;;  %v5095_v36 = vld [vmem:[#allocation3 + $0x18] sm:$0xf] }
 0x1fb   :  { %v2390_v57 = vmul.f32 %v7578_v52, %v2389_v42  ;;  %vm2431_vm14 = vweird.f32 %v7602_v34  ;;  %v5188_v15 = vor.u32 %v6092_v16, %v5185_v49  ;;  %v5192_v30 = vor.u32 %v6105_v33, %v5191_v55  ;;  %3763 = vmatpush.bf16.msrb.mxu0 %v5184_v14  ;;  %v6238_v16 = vld [vmem:[#allocation3 + $0x564] sm:$0xf]  ;;  %v6251_v55 = vld [vmem:[#allocation3 + $0x5c4] sm:$0xf0]  ;;  %v5679_v33 = vld [vmem:[#allocation3 + $0x4a0] sm:$0xf] }
 0x1fc   :  { %v2486_v48 = vadd.f32 %v2484_v37, %v2482_v41  ;;  %v2427_v12 = vsub.f32 1.0, %v2426_v53  ;;  %v2452_v56 = vadd.f32 %v7561_v54, %v2451_v21  ;;  %vm2432_vm3 = vmor %vm2430_vm11, %vm2431_vm14  ;;  %v5196_v24 = vor.u32 %v6093_v25, %v5193_v59  ;;  %v6226_v25 = vld [vmem:[#allocation3 + $0x4fc] sm:$0xf0]  ;;  %v5585_v14 = vld [vmem:[#allocation3 + $0x440] sm:$0xf0] }
 0x1fd   :  { %v2391_v3 = vadd.f32 %v7578_v52, %v2390_v57  ;;  %v5088_v11 = vor.u32 %v6080_v0, %v5087_v63  ;;  %v5092_v32 = vor.u32 %v6068_v19, %v5089_v50  ;;  %vm2458_vm4 = vcmp.eq.f32.partialorder %v2457_v7, 8.507059e+37  ;;  %3777 = vmatpush.bf16.msrb.mxu1 %v5188_v15  ;;  %3791 = vmatpush.bf16.msrb.mxu2 %v5192_v30  ;;  %v5785_v57 = vld [vmem:[#allocation3 + $0x5c8] sm:$0xf0]  ;;  %v5681_v63 = vld [vmem:[#allocation3 + $0x500] sm:$0xf0] }
 0x1fe   :  { %6296 = vtanh.f32 %v2486_v48  ;;  %4087 = vst [vmem:[#allocation9] sm:$0xff] %v2486_v48  ;;  %v2428_v61 = vmul.f32 %v7602_v34, %v2427_v12  ;;  %v2456_v27 = vsel %vm7628_vm0, %v7561_v54, %v2452_v56  ;;  %v5096_v35 = vor.u32 %v6081_v26, %v5095_v36  ;;  %3805 = vmatpush.bf16.msrb.mxu3 %v5196_v24  ;;  %v5777_v48 = vld [vmem:[#allocation3 + $0x5c0] sm:$0xf0]  ;;  %v5783_v12 = vld [vmem:[#allocation3 + $0x568] sm:$0xf] }
 0x1ff   :  { %v2395_v20 = vsel %vm7641_vm2, %v7578_v52, %v2391_v3  ;;  %v2461_v40 = vsel %vm2458_vm4, %v7570_v13, %v2456_v27  ;;  %v5100_v41 = vor.u32 %v6069_v28, %v5097_v31  ;;  %3764 = vmatpush.bf16.msrb.mxu0 %v5088_v11  ;;  %v2474_v7 = vand.u32 2147483648, %v7606_v39  ;;  %v6239_v56 = vld [vmem:[#allocation3 + $0x56c] sm:$0xf]  ;;  %v5687_v0 = vld [vmem:[#allocation3 + $0x4a8] sm:$0xf] }
 0x200   :  { %v2429_v6 = vadd.f32 %v7602_v34, %v2428_v61  ;;  %v6295_v17 = vpop.eup %6294  ;;  %v2400_v54 = vsel %vm7620_vm15, %v2399_v38, %v2395_v20  ;;  %vm2468_vm6 = vweird.f32 %v7606_v39  ;;  %v2472_v13 = vand.u32 2147483647, %v7606_v39  ;;  %v5689_v3 = vld [vmem:[#allocation3 + $0x508] sm:$0xf0]  ;;  %v6202_v19 = vld [vmem:[#allocation3 + $0x43c] sm:$0xf0] }
 0x201   :  { %v2464_v29 = vmul.f32 %v6295_v17, %v7606_v39  ;;  %v2485_v9 = vmul.f32 %v6293_v1, %v2400_v54  ;;  %vm2469_vm5 = vweird.f32 %v6295_v17  ;;  %3778 = vmatpush.bf16.msrb.mxu1 %v5092_v32  ;;  %3792 = vmatpush.bf16.msrb.mxu2 %v5096_v35  ;;  %v2475_v44 = vor.u32 1.1754944e-38, %v2474_v7  ;;  %v6227_v1 = vld [vmem:[#allocation3 + $0x504] sm:$0xf0]  ;;  %v6191_v36 = vld [vmem:[#allocation3 + $0x3ec] sm:$0xf] }
 0x202   :  { %v2433_v51 = vsel %vm2432_vm3, %v7602_v34, %v2429_v6  ;;  %3806 = vmatpush.bf16.msrb.mxu3 %v5100_v41  ;;  %vm2470_vm7 = vmor %vm2468_vm6, %vm2469_vm5  ;;  %vm2473_vm8 = vcmp.eq.f32.partialorder %v2472_v13, 8.507059e+37  ;;  %v5780_v23 = vor.u32 %v6238_v16, %v5777_v48  ;;  %v5784_v59 = vor.u32 %v6251_v55, %v5783_v12  ;;  %v6190_v6 = vld [vmem:[#allocation3 + $0x3e4] sm:$0xf]  ;;  %v5591_v15 = vld [vmem:[#allocation3 + $0x3e8] sm:$0xf] }
 0x203   :  { %v2438_v52 = vsel %vm7633_vm1, %v2437_v45, %v2433_v51  ;;  %v2465_v18 = vsub.f32 1.0, %v2464_v29  ;;  %v5775_v45 = vld [vmem:[#allocation3 + $0x560] sm:$0xf]  ;;  %v5788_v61 = vor.u32 %v6239_v56, %v5785_v57  ;;  %v5680_v38 = vor.u32 %v6226_v25, %v5679_v33  ;;  %v6203_v30 = vld [vmem:[#allocation3 + $0x444] sm:$0xf0] }
 0x204   :  { %v6297_v37 = vpop.eup %6296  ;;  %v2483_v21 = vmul.f32 %v2438_v52, %v59_v46  ;;  %v5776_v39 = vor.u32 %v6250_v47, %v5775_v45  ;;  %v5684_v4 = vor.u32 %v6214_v62, %v5681_v63  ;;  %v5688_v50 = vor.u32 %v6227_v1, %v5687_v0  ;;  %v5593_v26 = vld [vmem:[#allocation3 + $0x448] sm:$0xf0]  ;;  %v5487_v46 = vld [vmem:[#allocation3 + $0x320] sm:$0xf]  ;;  %v6166_v29 = vld [vmem:[#allocation3 + $0x324] sm:$0xf] }
 0x205   :  { %v2490_v34 = vmul.f32 %v6297_v37, %v2461_v40  ;;  %v2466_v42 = vmul.f32 %v6295_v17, %v2465_v18  ;;  %v5692_v8 = vor.u32 %v6215_v60, %v5689_v3  ;;  %v5588_v27 = vor.u32 %v6190_v6, %v5585_v14  ;;  %v6178_v20 = vld [vmem:[#allocation3 + $0x37c] sm:$0xf0]  ;;  %v5489_v54 = vld [vmem:[#allocation3 + $0x380] sm:$0xf0]  ;;  %v5495_v51 = vld [vmem:[#allocation3 + $0x328] sm:$0xf] }
 0x206   :  { %v2487_v53 = vadd.f32 %v2485_v9, %v2483_v21  ;;  %v5592_v24 = vor.u32 %v6203_v30, %v5591_v15  ;;  %v5596_v11 = vor.u32 %v6191_v36, %v5593_v26  ;;  %v6179_v32 = vld [vmem:[#allocation3 + $0x384] sm:$0xf0]  ;;  %v6167_v28 = vld [vmem:[#allocation3 + $0x32c] sm:$0xf]  ;;  %v5488_v52 = vor.u32 %v6178_v20, %v5487_v46  ;;  %v5391_v35 = vld [vmem:[#allocation3 + $0x260] sm:$0xf] }
 0x207   :  { %4085 = vst [vmem:[#allocation7] sm:$0xff] %v2490_v34  ;;  %v2467_v22 = vadd.f32 %v6295_v17, %v2466_v42  ;;  %v5497_v31 = vld [vmem:[#allocation3 + $0x388] sm:$0xf0]  ;;  %v5492_v9 = vor.u32 %v6166_v29, %v5489_v54  ;;  %v6154_v37 = vld [vmem:[#allocation3 + $0x2bc] sm:$0xf0]  ;;  %v5496_v40 = vor.u32 %v6179_v32, %v5495_v51 }
 0x208   :  { %6298 = vtanh.f32 %v2487_v53  ;;  %4088 = vst [vmem:[#allocation9 + $0x8] sm:$0xff] %v2487_v53  ;;  %v5500_v18 = vor.u32 %v6167_v28, %v5497_v31  ;;  %v6142_v21 = vld [vmem:[#allocation3 + $0x264] sm:$0xf]  ;;  %v5399_v41 = vld [vmem:[#allocation3 + $0x268] sm:$0xf]  ;;  %v5392_v7 = vor.u32 %v6154_v37, %v5391_v35 }
 0x209   :  { %v2471_v43 = vsel %vm2470_vm7, %v6295_v17, %v2467_v22  ;;  %v5584_v17 = vor.u32 %v6202_v19, %v5583_v5  ;;  %v6155_v42 = vld [vmem:[#allocation3 + $0x2c4] sm:$0xf0]  ;;  %v6143_v53 = vld [vmem:[#allocation3 + $0x26c] sm:$0xf]  ;;  %v5199_v57 = vld [vmem:[#allocation3 + $0xe0] sm:$0xf] }
 0x20a   :  { %v2476_v2 = vsel %vm2473_vm8, %v2475_v44, %v2471_v43  ;;  %v5401_v22 = vld [vmem:[#allocation3 + $0x2c8] sm:$0xf0]  ;;  %v5295_v43 = vld [vmem:[#allocation3 + $0x1a0] sm:$0xf]  ;;  %v5400_v45 = vor.u32 %v6155_v42, %v5399_v41  ;;  %v5303_v16 = vld [vmem:[#allocation3 + $0x1a8] sm:$0xf] }
 0x20b   :  { %v6130_v44 = vld [vmem:[#allocation3 + $0x1fc] sm:$0xf0]  ;;  %v5404_v47 = vor.u32 %v6143_v53, %v5401_v22  ;;  %v6131_v48 = vld [vmem:[#allocation3 + $0x204] sm:$0xf0]  ;;  %v6119_v12 = vld [vmem:[#allocation3 + $0x1ac] sm:$0xf] }
 0x20c   :  { %v5296_v55 = vor.u32 %v6130_v44, %v5295_v43  ;;  %v6094_v25 = vld [vmem:[#allocation3 + $0xe4] sm:$0xf]  ;;  %v6107_v62 = vld [vmem:[#allocation3 + $0x144] sm:$0xf0]  ;;  %v6095_v63 = vld [vmem:[#allocation3 + $0xec] sm:$0xf] }
 0x20d   :  { %v5209_v0 = vld [vmem:[#allocation3 + $0x148] sm:$0xf0]  ;;  %v5103_v1 = vld [vmem:[#allocation3 + $0x20] sm:$0xf]  ;;  %v5105_v5 = vld [vmem:[#allocation3 + $0x80] sm:$0xf0] }
 0x20e   :  { %v6299_v10 = vpop.eup %6298  ;;  %v6083_v6 = vld [vmem:[#allocation3 + $0x84] sm:$0xf0]  ;;  %v6071_v14 = vld [vmem:[#allocation3 + $0x2c] sm:$0xf]  ;;  %v5791_v30 = vld [vmem:[#allocation3 + $0x570] sm:$0xf] }
 0x20f   :  { %v2491_v49 = vmul.f32 %v6299_v10, %v2476_v2  ;;  %v6118_v10 = vld [vmem:[#allocation3 + $0x1a4] sm:$0xf]  ;;  %v5113_v15 = vld [vmem:[#allocation3 + $0x88] sm:$0xf0]  ;;  %v6252_v36 = vld [vmem:[#allocation3 + $0x5cc] sm:$0xf0] }
 0x210   :  { %v5297_v2 = vld [vmem:[#allocation3 + $0x200] sm:$0xf0]  ;;  %v6240_v26 = vld [vmem:[#allocation3 + $0x574] sm:$0xf]  ;;  %v5801_v29 = vld [vmem:[#allocation3 + $0x5d8] sm:$0xf0]  ;;  %v5116_v51 = vor.u32 %v6071_v14, %v5113_v15  ;;  %v5792_v32 = vor.u32 %v6252_v36, %v5791_v30 }
 0x211   :  { %v7671_v58 = vpack.c.bf16 %v2491_v49, %v2490_v34  ;;  %4086 = vst [vmem:[#allocation7 + $0x8] sm:$0xff] %v2491_v49  ;;  %v5393_v34 = vld [vmem:[#allocation3 + $0x2c0] sm:$0xf0]  ;;  %v5305_v49 = vld [vmem:[#allocation3 + $0x208] sm:$0xf0]  ;;  %v5300_v56 = vor.u32 %v6118_v10, %v5297_v2 }
 0x212   :  { %v5396_v13 = vor.u32 %v6142_v21, %v5393_v34  ;;  %v5308_v33 = vor.u32 %v6119_v12, %v5305_v49  ;;  %v5695_v31 = vld [vmem:[#allocation3 + $0x4b0] sm:$0xf]  ;;  %v6216_v37 = vld [vmem:[#allocation3 + $0x4b4] sm:$0xf]  ;;  %v6229_v21 = vld [vmem:[#allocation3 + $0x514] sm:$0xf0] }
 0x213   :  { %3709 = vmatmul.bf16.vlgmr.msra.gmra.mxu0 %v7671_v58  ;;  %3723 = vmatmul.bf16.vlgmr.msra.gmra.mxu1 %v7671_v58  ;;  %v6217_v34 = vld [vmem:[#allocation3 + $0x4bc] sm:$0xf]  ;;  %v5599_v22 = vld [vmem:[#allocation3 + $0x3f0] sm:$0xf]  ;;  %v6192_v44 = vld [vmem:[#allocation3 + $0x3f4] sm:$0xf] }
 0x214   :  { %3737 = vmatmul.bf16.vlgmr.msra.gmra.mxu2 %v7671_v58  ;;  %3751 = vmatmul.bf16.vlgmr.msra.gmra.mxu3 %v7671_v58  ;;  %v5705_v41 = vld [vmem:[#allocation3 + $0x518] sm:$0xf0]  ;;  %v6205_v10 = vld [vmem:[#allocation3 + $0x454] sm:$0xf0]  ;;  %v5503_v49 = vld [vmem:[#allocation3 + $0x330] sm:$0xf] }
 0x215   :  { %3813 = vmatpush.bf16.msra.mxu0 %v5776_v39  ;;  %3827 = vmatpush.bf16.msra.mxu1 %v5780_v23  ;;  %v6106_v39 = vld [vmem:[#allocation3 + $0x13c] sm:$0xf0]  ;;  %v5304_v23 = vor.u32 %v6131_v48, %v5303_v16  ;;  %v5708_v43 = vor.u32 %v6217_v34, %v5705_v41  ;;  %v6193_v2 = vld [vmem:[#allocation3 + $0x3fc] sm:$0xf]  ;;  %v5311_v15 = vld [vmem:[#allocation3 + $0x1b0] sm:$0xf] }
 0x216   :  { %3841 = vmatpush.bf16.msra.mxu2 %v5784_v59  ;;  %3855 = vmatpush.bf16.msra.mxu3 %v5788_v61  ;;  %v5201_v59 = vld [vmem:[#allocation3 + $0x140] sm:$0xf0]  ;;  %v5207_v61 = vld [vmem:[#allocation3 + $0xe8] sm:$0xf]  ;;  %v5200_v60 = vor.u32 %v6106_v39, %v5199_v57  ;;  %v5609_v16 = vld [vmem:[#allocation3 + $0x458] sm:$0xf0] }
 0x217   :  { %v5204_v3 = vor.u32 %v6094_v25, %v5201_v59  ;;  %v5208_v19 = vor.u32 %v6107_v62, %v5207_v61  ;;  %v5612_v57 = vor.u32 %v6193_v2, %v5609_v16  ;;  %v6168_v39 = vld [vmem:[#allocation3 + $0x334] sm:$0xf]  ;;  %v6181_v25 = vld [vmem:[#allocation3 + $0x394] sm:$0xf0]  ;;  %v6169_v59 = vld [vmem:[#allocation3 + $0x33c] sm:$0xf] }
 0x218   :  { %v5513_v61 = vld [vmem:[#allocation3 + $0x398] sm:$0xf0]  ;;  %v6132_v30 = vld [vmem:[#allocation3 + $0x20c] sm:$0xf0]  ;;  %v6254_v2 = vld [vmem:[#allocation3 + $0x5dc] sm:$0xf0] }
 0x219   :  { %3814 = vmatpush.bf16.msra.mxu0 %v5680_v38  ;;  %3828 = vmatpush.bf16.msra.mxu1 %v5684_v4  ;;  %v6082_v38 = vld [vmem:[#allocation3 + $0x7c] sm:$0xf0]  ;;  %v6070_v4 = vld [vmem:[#allocation3 + $0x24] sm:$0xf]  ;;  %4114 = dma.vmem_to_hbm [thread:$0]  %s4107_s12, 256, %s4109_s14, [#allocation8], %s6406_s15, %s6406_s15, %s6407_s16  }
 0x21a   :  { %3842 = vmatpush.bf16.msra.mxu2 %v5688_v50  ;;  %3856 = vmatpush.bf16.msra.mxu3 %v5692_v8  ;;  %v5212_v50 = vor.u32 %v6095_v63, %v5209_v0  ;;  %v5111_v8 = vld [vmem:[#allocation3 + $0x28] sm:$0xf]  ;;  %v5104_v46 = vor.u32 %v6082_v38, %v5103_v1  ;;  %v5108_v20 = vor.u32 %v6070_v4, %v5105_v5  ;;  %v5407_v0 = vld [vmem:[#allocation3 + $0x270] sm:$0xf]  ;;  %v6144_v38 = vld [vmem:[#allocation3 + $0x274] sm:$0xf] }
 0x21b   :  { %v5112_v54 = vor.u32 %v6083_v6, %v5111_v8  ;;  %v6156_v1 = vld [vmem:[#allocation3 + $0x2cc] sm:$0xf0]  ;;  %v5409_v4 = vld [vmem:[#allocation3 + $0x2d0] sm:$0xf0]  ;;  %v5415_v5 = vld [vmem:[#allocation3 + $0x278] sm:$0xf] }
 0x21c   :  { %v5417_v8 = vld [vmem:[#allocation3 + $0x2d8] sm:$0xf0]  ;;  %v5408_v6 = vor.u32 %v6156_v1, %v5407_v0  ;;  %v5412_v14 = vor.u32 %v6144_v38, %v5409_v4  ;;  %v6242_v16 = vld [vmem:[#allocation3 + $0x584] sm:$0xf]  ;;  %v6231_v38 = vld [vmem:[#allocation3 + $0x524] sm:$0xf0] }
 0x21d   :  { %3815 = vmatpush.bf16.msra.mxu0 %v5584_v17  ;;  %3829 = vmatpush.bf16.msra.mxu1 %v5588_v27  ;;  %v5793_v17 = vld [vmem:[#allocation3 + $0x5d0] sm:$0xf0]  ;;  %v5799_v27 = vld [vmem:[#allocation3 + $0x578] sm:$0xf]  ;;  %v6218_v1 = vld [vmem:[#allocation3 + $0x4c4] sm:$0xf] }
 0x21e   :  { %3843 = vmatpush.bf16.msra.mxu2 %v5592_v24  ;;  %3857 = vmatpush.bf16.msra.mxu3 %v5596_v11  ;;  %v6253_v24 = vld [vmem:[#allocation3 + $0x5d4] sm:$0xf0]  ;;  %v6241_v11 = vld [vmem:[#allocation3 + $0x57c] sm:$0xf]  ;;  %v5796_v28 = vor.u32 %v6240_v26, %v5793_v17  ;;  %v6120_v17 = vld [vmem:[#allocation3 + $0x1b4] sm:$0xf] }
 0x21f   :  { %v5804_v35 = vor.u32 %v6241_v11, %v5801_v29  ;;  %v5321_v11 = vld [vmem:[#allocation3 + $0x218] sm:$0xf0]  ;;  %v5312_v29 = vor.u32 %v6132_v30, %v5311_v15  ;;  %v6219_v4 = vld [vmem:[#allocation3 + $0x4cc] sm:$0xf]  ;;  %v6194_v30 = vld [vmem:[#allocation3 + $0x404] sm:$0xf] }
 0x220   :  { %4127 = dma.vmem_to_hbm [thread:$0]  %s4120_s3, 256, %s4122_s19, [#allocation8], %s6406_s15, %s6406_s15, %s6407_s16  }
 0x221   :  { %3816 = vmatpush.bf16.msra.mxu0 %v5488_v52  ;;  %3830 = vmatpush.bf16.msra.mxu1 %v5492_v9  ;;  %v6228_v52 = vld [vmem:[#allocation3 + $0x50c] sm:$0xf0]  ;;  %v5800_v9 = vor.u32 %v6253_v24, %v5799_v27  ;;  %v5313_v27 = vld [vmem:[#allocation3 + $0x210] sm:$0xf0]  ;;  %v6121_v24 = vld [vmem:[#allocation3 + $0x1bc] sm:$0xf] }
 0x222   :  { %3844 = vmatpush.bf16.msra.mxu2 %v5496_v40  ;;  %3858 = vmatpush.bf16.msra.mxu3 %v5500_v18  ;;  %v5697_v40 = vld [vmem:[#allocation3 + $0x510] sm:$0xf0]  ;;  %v5703_v18 = vld [vmem:[#allocation3 + $0x4b8] sm:$0xf]  ;;  %v5696_v42 = vor.u32 %v6228_v52, %v5695_v31  ;;  %v5324_v31 = vor.u32 %v6121_v24, %v5321_v11  ;;  %v5519_v11 = vld [vmem:[#allocation3 + $0x340] sm:$0xf] }
 0x223   :  { %3765 = vmatmul.bf16.vlgmr.msrb.gmra.mxu0 %v7671_v58  ;;  %3779 = vmatmul.bf16.vlgmr.msrb.gmra.mxu1 %v7671_v58  ;;  %v5700_v53 = vor.u32 %v6216_v37, %v5697_v40  ;;  %v6096_v52 = vld [vmem:[#allocation3 + $0xf4] sm:$0xf]  ;;  %v6109_v37 = vld [vmem:[#allocation3 + $0x154] sm:$0xf0]  ;;  %v6097_v40 = vld [vmem:[#allocation3 + $0xfc] sm:$0xf] }
 0x224   :  { %3793 = vmatmul.bf16.vlgmr.msrb.gmra.mxu2 %v7671_v58  ;;  %3807 = vmatmul.bf16.vlgmr.msrb.gmra.mxu3 %v7671_v58 }
 0x225   :  { %3817 = vmatpush.bf16.msra.mxu0 %v5392_v7  ;;  %3831 = vmatpush.bf16.msra.mxu1 %v5396_v13  ;;  %v6204_v7 = vld [vmem:[#allocation3 + $0x44c] sm:$0xf0]  ;;  %v5704_v13 = vor.u32 %v6229_v21, %v5703_v18  ;;  %v5225_v18 = vld [vmem:[#allocation3 + $0x158] sm:$0xf0] }
 0x226   :  { %3845 = vmatpush.bf16.msra.mxu2 %v5400_v45  ;;  %3859 = vmatpush.bf16.msra.mxu3 %v5404_v47  ;;  %v5601_v45 = vld [vmem:[#allocation3 + $0x450] sm:$0xf0]  ;;  %v5607_v47 = vld [vmem:[#allocation3 + $0x3f8] sm:$0xf]  ;;  %v5600_v48 = vor.u32 %v6204_v7, %v5599_v22  ;;  %v5119_v21 = vld [vmem:[#allocation3 + $0x30] sm:$0xf] }
 0x227   :  { %v5604_v12 = vor.u32 %v6192_v44, %v5601_v45  ;;  %v5121_v22 = vld [vmem:[#allocation3 + $0x90] sm:$0xf0]  ;;  %v6085_v44 = vld [vmem:[#allocation3 + $0x94] sm:$0xf0]  ;;  %v6073_v45 = vld [vmem:[#allocation3 + $0x3c] sm:$0xf] }
 0x229   :  { %3818 = vmatpush.bf16.msra.mxu0 %v5296_v55  ;;  %3832 = vmatpush.bf16.msra.mxu1 %v5300_v56  ;;  %v6180_v55 = vld [vmem:[#allocation3 + $0x38c] sm:$0xf0]  ;;  %v5608_v56 = vor.u32 %v6205_v10, %v5607_v47  ;;  %v5129_v47 = vld [vmem:[#allocation3 + $0x98] sm:$0xf0]  ;;  %v5807_v10 = vld [vmem:[#allocation3 + $0x580] sm:$0xf] }
 0x22a   :  { %3846 = vmatpush.bf16.msra.mxu2 %v5304_v23  ;;  %3860 = vmatpush.bf16.msra.mxu3 %v5308_v33  ;;  %v5505_v23 = vld [vmem:[#allocation3 + $0x390] sm:$0xf0]  ;;  %v5511_v33 = vld [vmem:[#allocation3 + $0x338] sm:$0xf]  ;;  %v5504_v62 = vor.u32 %v6180_v55, %v5503_v49 }
 0x22b   :  { %v5508_v63 = vor.u32 %v6168_v39, %v5505_v23  ;;  %v5817_v39 = vld [vmem:[#allocation3 + $0x5e8] sm:$0xf0] }
 0x22d   :  { %3819 = vmatpush.bf16.msra.mxu0 %v5200_v60  ;;  %3833 = vmatpush.bf16.msra.mxu1 %v5204_v3  ;;  %v5512_v60 = vor.u32 %v6181_v25, %v5511_v33  ;;  %v5516_v3 = vor.u32 %v6169_v59, %v5513_v61  ;;  %v5132_v33 = vor.u32 %v6073_v45, %v5129_v47  ;;  %v5711_v61 = vld [vmem:[#allocation3 + $0x4c0] sm:$0xf] }
 0x22e   :  { %3847 = vmatpush.bf16.msra.mxu2 %v5208_v19  ;;  %3861 = vmatpush.bf16.msra.mxu3 %v5212_v50  ;;  %v6157_v19 = vld [vmem:[#allocation3 + $0x2d4] sm:$0xf0]  ;;  %v6145_v50 = vld [vmem:[#allocation3 + $0x27c] sm:$0xf]  ;;  %v5808_v25 = vor.u32 %v6254_v2, %v5807_v10  ;;  %v5327_v47 = vld [vmem:[#allocation3 + $0x1c0] sm:$0xf] }
 0x22f   :  { %v5416_v36 = vor.u32 %v6157_v19, %v5415_v5  ;;  %v5420_v26 = vor.u32 %v6145_v50, %v5417_v8  ;;  %v5721_v5 = vld [vmem:[#allocation3 + $0x528] sm:$0xf0]  ;;  %v5615_v8 = vld [vmem:[#allocation3 + $0x400] sm:$0xf] }
 0x230   :  { %v5724_v15 = vor.u32 %v6219_v4, %v5721_v5  ;;  %v6134_v10 = vld [vmem:[#allocation3 + $0x21c] sm:$0xf0] }
 0x231   :  { %3820 = vmatpush.bf16.msra.mxu0 %v5104_v46  ;;  %3834 = vmatpush.bf16.msra.mxu1 %v5108_v20  ;;  %v5319_v46 = vld [vmem:[#allocation3 + $0x1b8] sm:$0xf] }
 0x232   :  { %3848 = vmatpush.bf16.msra.mxu2 %v5112_v54  ;;  %3862 = vmatpush.bf16.msra.mxu3 %v5116_v51  ;;  %v6133_v20 = vld [vmem:[#allocation3 + $0x214] sm:$0xf0]  ;;  %v5316_v54 = vor.u32 %v6120_v17, %v5313_v27  ;;  %v5215_v51 = vld [vmem:[#allocation3 + $0xf0] sm:$0xf]  ;;  %v6207_v17 = vld [vmem:[#allocation3 + $0x464] sm:$0xf0] }
 0x233   :  { %v6195_v27 = vld [vmem:[#allocation3 + $0x40c] sm:$0xf] }
 0x234   :  { %3821 = vmatmul.bf16.vlgmr.msra.gmra.mxu0 %v7671_v58  ;;  %3835 = vmatmul.bf16.vlgmr.msra.gmra.mxu1 %v7671_v58 }
 0x235   :  { %3869 = vmatpush.bf16.msrb.mxu0 %v5792_v32  ;;  %3883 = vmatpush.bf16.msrb.mxu1 %v5796_v28  ;;  %v6108_v32 = vld [vmem:[#allocation3 + $0x14c] sm:$0xf0]  ;;  %v5320_v28 = vor.u32 %v6133_v20, %v5319_v46  ;;  %v5625_v46 = vld [vmem:[#allocation3 + $0x468] sm:$0xf0] }
 0x236   :  { %3897 = vmatpush.bf16.msrb.mxu2 %v5800_v9  ;;  %3911 = vmatpush.bf16.msrb.mxu3 %v5804_v35  ;;  %v5217_v9 = vld [vmem:[#allocation3 + $0x150] sm:$0xf0]  ;;  %v5223_v35 = vld [vmem:[#allocation3 + $0xf8] sm:$0xf]  ;;  %v5216_v34 = vor.u32 %v6108_v32, %v5215_v51  ;;  %v5628_v51 = vor.u32 %v6195_v27, %v5625_v46  ;;  %v6170_v32 = vld [vmem:[#allocation3 + $0x344] sm:$0xf] }
 0x237   :  { %3849 = vmatmul.bf16.vlgmr.msra.gmra.mxu2 %v7671_v58  ;;  %3863 = vmatmul.bf16.vlgmr.msra.gmra.mxu3 %v7671_v58  ;;  %v5220_v41 = vor.u32 %v6096_v52, %v5217_v9  ;;  %v5224_v7 = vor.u32 %v6109_v37, %v5223_v35  ;;  %v6183_v52 = vld [vmem:[#allocation3 + $0x3a4] sm:$0xf0]  ;;  %v6171_v9 = vld [vmem:[#allocation3 + $0x34c] sm:$0xf]  ;;  %v6256_v27 = vld [vmem:[#allocation3 + $0x5ec] sm:$0xf0] }
 0x238   :  { %v5529_v35 = vld [vmem:[#allocation3 + $0x3a8] sm:$0xf0]  ;;  %v6244_v46 = vld [vmem:[#allocation3 + $0x594] sm:$0xf] }
 0x239   :  { %3870 = vmatpush.bf16.msrb.mxu0 %v5696_v42  ;;  %3884 = vmatpush.bf16.msrb.mxu1 %v5700_v53  ;;  %v6084_v42 = vld [vmem:[#allocation3 + $0x8c] sm:$0xf0]  ;;  %v6072_v53 = vld [vmem:[#allocation3 + $0x34] sm:$0xf] }
 0x23a   :  { %3898 = vmatpush.bf16.msrb.mxu2 %v5704_v13  ;;  %3912 = vmatpush.bf16.msrb.mxu3 %v5708_v43  ;;  %v5228_v13 = vor.u32 %v6097_v40, %v5225_v18  ;;  %v5127_v43 = vld [vmem:[#allocation3 + $0x38] sm:$0xf]  ;;  %v5120_v49 = vor.u32 %v6084_v42, %v5119_v21  ;;  %v5124_v55 = vor.u32 %v6072_v53, %v5121_v22  ;;  %v5423_v18 = vld [vmem:[#allocation3 + $0x280] sm:$0xf]  ;;  %v6146_v42 = vld [vmem:[#allocation3 + $0x284] sm:$0xf] }
 0x23b   :  { %v5128_v23 = vor.u32 %v6085_v44, %v5127_v43  ;;  %v6158_v21 = vld [vmem:[#allocation3 + $0x2dc] sm:$0xf0]  ;;  %v5425_v53 = vld [vmem:[#allocation3 + $0x2e0] sm:$0xf0]  ;;  %v5431_v22 = vld [vmem:[#allocation3 + $0x288] sm:$0xf] }
 0x23c   :  { %v5433_v43 = vld [vmem:[#allocation3 + $0x2e8] sm:$0xf0]  ;;  %v5424_v44 = vor.u32 %v6158_v21, %v5423_v18  ;;  %v5428_v45 = vor.u32 %v6146_v42, %v5425_v53  ;;  %v6220_v21 = vld [vmem:[#allocation3 + $0x4d4] sm:$0xf]  ;;  %v6233_v42 = vld [vmem:[#allocation3 + $0x534] sm:$0xf0] }
 0x23d   :  { %3871 = vmatpush.bf16.msrb.mxu0 %v5600_v48  ;;  %3885 = vmatpush.bf16.msrb.mxu1 %v5604_v12  ;;  %v5809_v48 = vld [vmem:[#allocation3 + $0x5e0] sm:$0xf0]  ;;  %v5815_v12 = vld [vmem:[#allocation3 + $0x588] sm:$0xf]  ;;  %v6221_v53 = vld [vmem:[#allocation3 + $0x4dc] sm:$0xf] }
 0x23e   :  { %3899 = vmatpush.bf16.msrb.mxu2 %v5608_v56  ;;  %3913 = vmatpush.bf16.msrb.mxu3 %v5612_v57  ;;  %v6255_v56 = vld [vmem:[#allocation3 + $0x5e4] sm:$0xf0]  ;;  %v6243_v57 = vld [vmem:[#allocation3 + $0x58c] sm:$0xf]  ;;  %v5812_v59 = vor.u32 %v6242_v16, %v5809_v48  ;;  %v6122_v48 = vld [vmem:[#allocation3 + $0x1c4] sm:$0xf] }
 0x23f   :  { %v5820_v0 = vor.u32 %v6243_v57, %v5817_v39  ;;  %v5337_v57 = vld [vmem:[#allocation3 + $0x228] sm:$0xf0]  ;;  %v5328_v39 = vor.u32 %v6134_v10, %v5327_v47  ;;  %v6196_v10 = vld [vmem:[#allocation3 + $0x414] sm:$0xf] }
 0x241   :  { %3872 = vmatpush.bf16.msrb.mxu0 %v5504_v62  ;;  %3886 = vmatpush.bf16.msrb.mxu1 %v5508_v63  ;;  %v6230_v62 = vld [vmem:[#allocation3 + $0x51c] sm:$0xf0]  ;;  %v5816_v63 = vor.u32 %v6255_v56, %v5815_v12  ;;  %v5329_v12 = vld [vmem:[#allocation3 + $0x220] sm:$0xf0]  ;;  %v6123_v56 = vld [vmem:[#allocation3 + $0x1cc] sm:$0xf] }
 0x242   :  { %3900 = vmatpush.bf16.msrb.mxu2 %v5512_v60  ;;  %3914 = vmatpush.bf16.msrb.mxu3 %v5516_v3  ;;  %v5713_v60 = vld [vmem:[#allocation3 + $0x520] sm:$0xf0]  ;;  %v5719_v3 = vld [vmem:[#allocation3 + $0x4c8] sm:$0xf]  ;;  %v5712_v19 = vor.u32 %v6230_v62, %v5711_v61  ;;  %v5340_v61 = vor.u32 %v6123_v56, %v5337_v57  ;;  %v5535_v57 = vld [vmem:[#allocation3 + $0x350] sm:$0xf] }
 0x243   :  { %v5716_v50 = vor.u32 %v6218_v1, %v5713_v60  ;;  %v6098_v62 = vld [vmem:[#allocation3 + $0x104] sm:$0xf]  ;;  %v6111_v1 = vld [vmem:[#allocation3 + $0x164] sm:$0xf0]  ;;  %v6099_v60 = vld [vmem:[#allocation3 + $0x10c] sm:$0xf] }
 0x245   :  { %3873 = vmatpush.bf16.msrb.mxu0 %v5408_v6  ;;  %3887 = vmatpush.bf16.msrb.mxu1 %v5412_v14  ;;  %v6206_v6 = vld [vmem:[#allocation3 + $0x45c] sm:$0xf0]  ;;  %v5720_v14 = vor.u32 %v6231_v38, %v5719_v3  ;;  %v5241_v3 = vld [vmem:[#allocation3 + $0x168] sm:$0xf0] }
 0x246   :  { %3901 = vmatpush.bf16.msrb.mxu2 %v5416_v36  ;;  %3915 = vmatpush.bf16.msrb.mxu3 %v5420_v26  ;;  %v5617_v36 = vld [vmem:[#allocation3 + $0x460] sm:$0xf0]  ;;  %v5623_v26 = vld [vmem:[#allocation3 + $0x408] sm:$0xf]  ;;  %v5616_v20 = vor.u32 %v6206_v6, %v5615_v8  ;;  %v5135_v38 = vld [vmem:[#allocation3 + $0x40] sm:$0xf] }
 0x247   :  { %v5620_v24 = vor.u32 %v6194_v30, %v5617_v36  ;;  %v5137_v8 = vld [vmem:[#allocation3 + $0xa0] sm:$0xf0]  ;;  %v6087_v30 = vld [vmem:[#allocation3 + $0xa4] sm:$0xf0]  ;;  %v6075_v36 = vld [vmem:[#allocation3 + $0x4c] sm:$0xf] }
 0x249   :  { %3874 = vmatpush.bf16.msrb.mxu0 %v5312_v29  ;;  %3888 = vmatpush.bf16.msrb.mxu1 %v5316_v54  ;;  %v6182_v29 = vld [vmem:[#allocation3 + $0x39c] sm:$0xf0]  ;;  %v5624_v54 = vor.u32 %v6207_v17, %v5623_v26  ;;  %v5145_v26 = vld [vmem:[#allocation3 + $0xa8] sm:$0xf0]  ;;  %v5823_v17 = vld [vmem:[#allocation3 + $0x590] sm:$0xf] }
 0x24a   :  { %3902 = vmatpush.bf16.msrb.mxu2 %v5320_v28  ;;  %3916 = vmatpush.bf16.msrb.mxu3 %v5324_v31  ;;  %v5521_v28 = vld [vmem:[#allocation3 + $0x3a0] sm:$0xf0]  ;;  %v5527_v31 = vld [vmem:[#allocation3 + $0x348] sm:$0xf]  ;;  %v5520_v37 = vor.u32 %v6182_v29, %v5519_v11 }
 0x24b   :  { %v5524_v40 = vor.u32 %v6170_v32, %v5521_v28  ;;  %v5833_v32 = vld [vmem:[#allocation3 + $0x5f8] sm:$0xf0] }
 0x24d   :  { %3875 = vmatpush.bf16.msrb.mxu0 %v5216_v34  ;;  %3889 = vmatpush.bf16.msrb.mxu1 %v5220_v41  ;;  %v5528_v34 = vor.u32 %v6183_v52, %v5527_v31  ;;  %v5532_v41 = vor.u32 %v6171_v9, %v5529_v35  ;;  %v5148_v31 = vor.u32 %v6075_v36, %v5145_v26  ;;  %v5727_v35 = vld [vmem:[#allocation3 + $0x4d0] sm:$0xf] }
 0x24e   :  { %3903 = vmatpush.bf16.msrb.mxu2 %v5224_v7  ;;  %3917 = vmatpush.bf16.msrb.mxu3 %v5228_v13  ;;  %v6159_v7 = vld [vmem:[#allocation3 + $0x2e4] sm:$0xf0]  ;;  %v6147_v13 = vld [vmem:[#allocation3 + $0x28c] sm:$0xf]  ;;  %v5824_v52 = vor.u32 %v6256_v27, %v5823_v17  ;;  %v5343_v26 = vld [vmem:[#allocation3 + $0x1d0] sm:$0xf] }
 0x24f   :  { %v5432_v2 = vor.u32 %v6159_v7, %v5431_v22  ;;  %v5436_v16 = vor.u32 %v6147_v13, %v5433_v43  ;;  %v5737_v22 = vld [vmem:[#allocation3 + $0x538] sm:$0xf0]  ;;  %v5631_v43 = vld [vmem:[#allocation3 + $0x410] sm:$0xf] }
 0x250   :  { %v5740_v47 = vor.u32 %v6221_v53, %v5737_v22  ;;  %v6136_v17 = vld [vmem:[#allocation3 + $0x22c] sm:$0xf0] }
 0x251   :  { %3876 = vmatpush.bf16.msrb.mxu0 %v5120_v49  ;;  %3890 = vmatpush.bf16.msrb.mxu1 %v5124_v55  ;;  %v5335_v49 = vld [vmem:[#allocation3 + $0x1c8] sm:$0xf]  ;;  %v5151_v22 = vld [vmem:[#allocation3 + $0x50] sm:$0xf] }
 0x252   :  { %3904 = vmatpush.bf16.msrb.mxu2 %v5128_v23  ;;  %3918 = vmatpush.bf16.msrb.mxu3 %v5132_v33  ;;  %v6135_v55 = vld [vmem:[#allocation3 + $0x224] sm:$0xf0]  ;;  %v5332_v23 = vor.u32 %v6122_v48, %v5329_v12  ;;  %v5231_v33 = vld [vmem:[#allocation3 + $0x100] sm:$0xf]  ;;  %v6209_v48 = vld [vmem:[#allocation3 + $0x474] sm:$0xf0] }
 0x253   :  { %v6197_v12 = vld [vmem:[#allocation3 + $0x41c] sm:$0xf] }
 0x254   :  { %3877 = vmatmul.bf16.vlgmr.msrb.gmra.mxu0 %v7671_v58  ;;  %3891 = vmatmul.bf16.vlgmr.msrb.gmra.mxu1 %v7671_v58 }
 0x255   :  { %3925 = vmatpush.bf16.msra.mxu0 %v5808_v25  ;;  %3939 = vmatpush.bf16.msra.mxu1 %v5812_v59  ;;  %v6110_v25 = vld [vmem:[#allocation3 + $0x15c] sm:$0xf0]  ;;  %v5336_v59 = vor.u32 %v6135_v55, %v5335_v49  ;;  %v5641_v49 = vld [vmem:[#allocation3 + $0x478] sm:$0xf0] }
 0x256   :  { %3953 = vmatpush.bf16.msra.mxu2 %v5816_v63  ;;  %3967 = vmatpush.bf16.msra.mxu3 %v5820_v0  ;;  %v5233_v63 = vld [vmem:[#allocation3 + $0x160] sm:$0xf0]  ;;  %v5239_v0 = vld [vmem:[#allocation3 + $0x108] sm:$0xf]  ;;  %v5232_v4 = vor.u32 %v6110_v25, %v5231_v33  ;;  %v5644_v33 = vor.u32 %v6197_v12, %v5641_v49  ;;  %v6172_v25 = vld [vmem:[#allocation3 + $0x354] sm:$0xf] }
 0x257   :  { %3905 = vmatmul.bf16.vlgmr.msrb.gmra.mxu2 %v7671_v58  ;;  %3919 = vmatmul.bf16.vlgmr.msrb.gmra.mxu3 %v7671_v58  ;;  %v5236_v5 = vor.u32 %v6098_v62, %v5233_v63  ;;  %v5240_v6 = vor.u32 %v6111_v1, %v5239_v0  ;;  %v6185_v62 = vld [vmem:[#allocation3 + $0x3b4] sm:$0xf0]  ;;  %v6173_v63 = vld [vmem:[#allocation3 + $0x35c] sm:$0xf] }
 0x258   :  { %v5545_v0 = vld [vmem:[#allocation3 + $0x3b8] sm:$0xf0] }
 0x259   :  { %3926 = vmatpush.bf16.msra.mxu0 %v5712_v19  ;;  %3940 = vmatpush.bf16.msra.mxu1 %v5716_v50  ;;  %v6086_v19 = vld [vmem:[#allocation3 + $0x9c] sm:$0xf0]  ;;  %v6074_v50 = vld [vmem:[#allocation3 + $0x44] sm:$0xf] }
 0x25a   :  { %3954 = vmatpush.bf16.msra.mxu2 %v5720_v14  ;;  %3968 = vmatpush.bf16.msra.mxu3 %v5724_v15  ;;  %v5244_v14 = vor.u32 %v6099_v60, %v5241_v3  ;;  %v5143_v15 = vld [vmem:[#allocation3 + $0x48] sm:$0xf]  ;;  %v5136_v11 = vor.u32 %v6086_v19, %v5135_v38  ;;  %v5140_v29 = vor.u32 %v6074_v50, %v5137_v8  ;;  %v5439_v3 = vld [vmem:[#allocation3 + $0x290] sm:$0xf]  ;;  %v6148_v19 = vld [vmem:[#allocation3 + $0x294] sm:$0xf] }
 0x25b   :  { %v5144_v28 = vor.u32 %v6087_v30, %v5143_v15  ;;  %v6160_v38 = vld [vmem:[#allocation3 + $0x2ec] sm:$0xf0]  ;;  %v5441_v50 = vld [vmem:[#allocation3 + $0x2f0] sm:$0xf0]  ;;  %v5447_v8 = vld [vmem:[#allocation3 + $0x298] sm:$0xf] }
 0x25c   :  { %v5449_v15 = vld [vmem:[#allocation3 + $0x2f8] sm:$0xf0]  ;;  %v5440_v30 = vor.u32 %v6160_v38, %v5439_v3  ;;  %v5444_v36 = vor.u32 %v6148_v19, %v5441_v50 }
 0x25d   :  { %3927 = vmatpush.bf16.msra.mxu0 %v5616_v20  ;;  %3941 = vmatpush.bf16.msra.mxu1 %v5620_v24  ;;  %v5825_v20 = vld [vmem:[#allocation3 + $0x5f0] sm:$0xf0]  ;;  %v5831_v24 = vld [vmem:[#allocation3 + $0x598] sm:$0xf] }
 0x25e   :  { %3955 = vmatpush.bf16.msra.mxu2 %v5624_v54  ;;  %3969 = vmatpush.bf16.msra.mxu3 %v5628_v51  ;;  %v6257_v54 = vld [vmem:[#allocation3 + $0x5f4] sm:$0xf0]  ;;  %v6245_v51 = vld [vmem:[#allocation3 + $0x59c] sm:$0xf]  ;;  %v5828_v9 = vor.u32 %v6244_v46, %v5825_v20  ;;  %v6124_v20 = vld [vmem:[#allocation3 + $0x1d4] sm:$0xf] }
 0x25f   :  { %v5836_v18 = vor.u32 %v6245_v51, %v5833_v32  ;;  %v5353_v51 = vld [vmem:[#allocation3 + $0x238] sm:$0xf0]  ;;  %v5344_v32 = vor.u32 %v6136_v17, %v5343_v26 }
 0x261   :  { %3928 = vmatpush.bf16.msra.mxu0 %v5520_v37  ;;  %3942 = vmatpush.bf16.msra.mxu1 %v5524_v40  ;;  %v6232_v37 = vld [vmem:[#allocation3 + $0x52c] sm:$0xf0]  ;;  %v5832_v40 = vor.u32 %v6257_v54, %v5831_v24  ;;  %v5345_v24 = vld [vmem:[#allocation3 + $0x230] sm:$0xf0]  ;;  %v6125_v54 = vld [vmem:[#allocation3 + $0x1dc] sm:$0xf] }
 0x262   :  { %3956 = vmatpush.bf16.msra.mxu2 %v5528_v34  ;;  %3970 = vmatpush.bf16.msra.mxu3 %v5532_v41  ;;  %v5729_v34 = vld [vmem:[#allocation3 + $0x530] sm:$0xf0]  ;;  %v5735_v41 = vld [vmem:[#allocation3 + $0x4d8] sm:$0xf]  ;;  %v5728_v7 = vor.u32 %v6232_v37, %v5727_v35  ;;  %v5356_v35 = vor.u32 %v6125_v54, %v5353_v51 }
 0x263   :  { %v5732_v13 = vor.u32 %v6220_v21, %v5729_v34  ;;  %v6100_v37 = vld [vmem:[#allocation3 + $0x114] sm:$0xf]  ;;  %v6113_v21 = vld [vmem:[#allocation3 + $0x174] sm:$0xf0]  ;;  %v6101_v34 = vld [vmem:[#allocation3 + $0x11c] sm:$0xf] }
 0x265   :  { %3929 = vmatpush.bf16.msra.mxu0 %v5424_v44  ;;  %3943 = vmatpush.bf16.msra.mxu1 %v5428_v45  ;;  %v6208_v44 = vld [vmem:[#allocation3 + $0x46c] sm:$0xf0]  ;;  %v5736_v45 = vor.u32 %v6233_v42, %v5735_v41  ;;  %v5257_v41 = vld [vmem:[#allocation3 + $0x178] sm:$0xf0] }
 0x266   :  { %3957 = vmatpush.bf16.msra.mxu2 %v5432_v2  ;;  %3971 = vmatpush.bf16.msra.mxu3 %v5436_v16  ;;  %v5633_v2 = vld [vmem:[#allocation3 + $0x470] sm:$0xf0]  ;;  %v5639_v16 = vld [vmem:[#allocation3 + $0x418] sm:$0xf]  ;;  %v5632_v55 = vor.u32 %v6208_v44, %v5631_v43  ;;  %v5260_v43 = vor.u32 %v6101_v34, %v5257_v41 }
 0x267   :  { %v5636_v56 = vor.u32 %v6196_v10, %v5633_v2  ;;  %v6076_v44 = vld [vmem:[#allocation3 + $0x54] sm:$0xf]  ;;  %v6089_v10 = vld [vmem:[#allocation3 + $0xb4] sm:$0xf0]  ;;  %v6077_v2 = vld [vmem:[#allocation3 + $0x5c] sm:$0xf] }
 0x269   :  { %3930 = vmatpush.bf16.msra.mxu0 %v5328_v39  ;;  %3944 = vmatpush.bf16.msra.mxu1 %v5332_v23  ;;  %v6184_v39 = vld [vmem:[#allocation3 + $0x3ac] sm:$0xf0]  ;;  %v5640_v23 = vor.u32 %v6209_v48, %v5639_v16  ;;  %v5161_v16 = vld [vmem:[#allocation3 + $0xb8] sm:$0xf0] }
 0x26a   :  { %3958 = vmatpush.bf16.msra.mxu2 %v5336_v59  ;;  %3972 = vmatpush.bf16.msra.mxu3 %v5340_v61  ;;  %v5537_v59 = vld [vmem:[#allocation3 + $0x3b0] sm:$0xf0]  ;;  %v5543_v61 = vld [vmem:[#allocation3 + $0x358] sm:$0xf]  ;;  %v5536_v1 = vor.u32 %v6184_v39, %v5535_v57 }
 0x26b   :  { %v5540_v60 = vor.u32 %v6172_v25, %v5537_v59 }
 0x26d   :  { %3931 = vmatpush.bf16.msra.mxu0 %v5232_v4  ;;  %3945 = vmatpush.bf16.msra.mxu1 %v5236_v5  ;;  %v5544_v4 = vor.u32 %v6185_v62, %v5543_v61  ;;  %v5548_v5 = vor.u32 %v6173_v63, %v5545_v0 }
 0x26e   :  { %3959 = vmatpush.bf16.msra.mxu2 %v5240_v6  ;;  %3973 = vmatpush.bf16.msra.mxu3 %v5244_v14  ;;  %v6161_v6 = vld [vmem:[#allocation3 + $0x2f4] sm:$0xf0]  ;;  %v6149_v14 = vld [vmem:[#allocation3 + $0x29c] sm:$0xf] }
 0x26f   :  { %v5448_v27 = vor.u32 %v6161_v6, %v5447_v8  ;;  %v5452_v46 = vor.u32 %v6149_v14, %v5449_v15 }
 0x271   :  { %3932 = vmatpush.bf16.msra.mxu0 %v5136_v11  ;;  %3946 = vmatpush.bf16.msra.mxu1 %v5140_v29  ;;  %v5351_v11 = vld [vmem:[#allocation3 + $0x1d8] sm:$0xf] }
 0x272   :  { %3960 = vmatpush.bf16.msra.mxu2 %v5144_v28  ;;  %3974 = vmatpush.bf16.msra.mxu3 %v5148_v31  ;;  %v6137_v29 = vld [vmem:[#allocation3 + $0x234] sm:$0xf0]  ;;  %v5348_v28 = vor.u32 %v6124_v20, %v5345_v24  ;;  %v5247_v31 = vld [vmem:[#allocation3 + $0x110] sm:$0xf] }
 0x274   :  { %3933 = vmatmul.bf16.vlgmr.msra.gmra.mxu0 %v7671_v58  ;;  %3947 = vmatmul.bf16.vlgmr.msra.gmra.mxu1 %v7671_v58 }
 0x275   :  { %3981 = vmatpush.bf16.msrb.mxu0 %v5824_v52  ;;  %3995 = vmatpush.bf16.msrb.mxu1 %v5828_v9  ;;  %v6112_v52 = vld [vmem:[#allocation3 + $0x16c] sm:$0xf0]  ;;  %v5352_v9 = vor.u32 %v6137_v29, %v5351_v11 }
 0x276   :  { %4009 = vmatpush.bf16.msrb.mxu2 %v5832_v40  ;;  %4023 = vmatpush.bf16.msrb.mxu3 %v5836_v18  ;;  %v5249_v40 = vld [vmem:[#allocation3 + $0x170] sm:$0xf0]  ;;  %v5255_v18 = vld [vmem:[#allocation3 + $0x118] sm:$0xf]  ;;  %v5248_v42 = vor.u32 %v6112_v52, %v5247_v31 }
 0x277   :  { %3961 = vmatmul.bf16.vlgmr.msra.gmra.mxu2 %v7671_v58  ;;  %3975 = vmatmul.bf16.vlgmr.msra.gmra.mxu3 %v7671_v58  ;;  %v5252_v53 = vor.u32 %v6100_v37, %v5249_v40 }
 0x279   :  { %3982 = vmatpush.bf16.msrb.mxu0 %v5728_v7  ;;  %3996 = vmatpush.bf16.msrb.mxu1 %v5732_v13  ;;  %v6088_v7 = vld [vmem:[#allocation3 + $0xac] sm:$0xf0]  ;;  %v5256_v13 = vor.u32 %v6113_v21, %v5255_v18 }
 0x27a   :  { %4010 = vmatpush.bf16.msrb.mxu2 %v5736_v45  ;;  %4024 = vmatpush.bf16.msrb.mxu3 %v5740_v47  ;;  %v5153_v45 = vld [vmem:[#allocation3 + $0xb0] sm:$0xf0]  ;;  %v5159_v47 = vld [vmem:[#allocation3 + $0x58] sm:$0xf]  ;;  %v5152_v48 = vor.u32 %v6088_v7, %v5151_v22 }
 0x27b   :  { %v5156_v12 = vor.u32 %v6076_v44, %v5153_v45  ;;  %v5160_v49 = vor.u32 %v6089_v10, %v5159_v47 }
 0x27d   :  { %3983 = vmatpush.bf16.msrb.mxu0 %v5632_v55  ;;  %3997 = vmatpush.bf16.msrb.mxu1 %v5636_v56  ;;  %v5164_v55 = vor.u32 %v6077_v2, %v5161_v16  ;;  %v7696_v56 = vld [vmem:[%s7733_s8] sm:$0xff] }
 0x27e   :  { %4011 = vmatpush.bf16.msrb.mxu2 %v5640_v23  ;;  %4025 = vmatpush.bf16.msrb.mxu3 %v5644_v33  ;;  %v2693_v57 = vperm.slane %v7696_v56, 0  ;;  %v2694_v39 = vperm.slane %v7696_v56, 1  ;;  %v2695_v61 = vperm.slane %v7696_v56, 2  ;;  %v2696_v62 = vperm.slane %v7696_v56, 3 }
 0x27f   :  { %v2698_v19 = vperm.slane %v7696_v56, 5  ;;  %v2699_v17 = vperm.slane %v7696_v56, 6 }
 0x281   :  { %3984 = vmatpush.bf16.msrb.mxu0 %v5536_v1  ;;  %3998 = vmatpush.bf16.msrb.mxu1 %v5540_v60 }
 0x282   :  { %4012 = vmatpush.bf16.msrb.mxu2 %v5544_v4  ;;  %4026 = vmatpush.bf16.msrb.mxu3 %v5548_v5 }
 0x285   :  { %3985 = vmatpush.bf16.msrb.mxu0 %v5440_v30  ;;  %3999 = vmatpush.bf16.msrb.mxu1 %v5444_v36 }
 0x286   :  { %4013 = vmatpush.bf16.msrb.mxu2 %v5448_v27  ;;  %4027 = vmatpush.bf16.msrb.mxu3 %v5452_v46  ;;  %v2700_v27 = vperm.slane %v7696_v56, 7 }
 0x289   :  { %3986 = vmatpush.bf16.msrb.mxu0 %v5344_v32  ;;  %4000 = vmatpush.bf16.msrb.mxu1 %v5348_v28  ;;  %v2688_v28 = vld [vmem:[%s7733_s8 + $0x8] sm:$0xff] }
 0x28a   :  { %4014 = vmatpush.bf16.msrb.mxu2 %v5352_v9  ;;  %4028 = vmatpush.bf16.msrb.mxu3 %v5356_v35  ;;  %v2701_v9 = vperm.slane %v2688_v28, 0  ;;  %v2702_v35 = vperm.slane %v2688_v28, 1 }
 0x28d   :  { %3987 = vmatpush.bf16.msrb.mxu0 %v5248_v42  ;;  %4001 = vmatpush.bf16.msrb.mxu1 %v5252_v53  ;;  %v2703_v42 = vperm.slane %v2688_v28, 2  ;;  %v2704_v53 = vperm.slane %v2688_v28, 3 }
 0x28e   :  { %4015 = vmatpush.bf16.msrb.mxu2 %v5256_v13  ;;  %4029 = vmatpush.bf16.msrb.mxu3 %v5260_v43 }
 0x290   :  { %v3710_v23 = vpop.f32.mrf.mxu0  ;;  %v3724_v33 = vpop.f32.mrf.mxu1 }
 0x291   :  { %3988 = vmatpush.bf16.msrb.mxu0 %v5152_v48  ;;  %4002 = vmatpush.bf16.msrb.mxu1 %v5156_v12  ;;  %v3711_v25 = vadd.f32 %v3710_v23, %v2693_v57  ;;  %v3725_v59 = vadd.f32 %v3724_v33, %v2694_v39  ;;  %v2707_v33 = vperm.slane %v2688_v28, 6 }
 0x292   :  { %4016 = vmatpush.bf16.msrb.mxu2 %v5160_v49  ;;  %4030 = vmatpush.bf16.msrb.mxu3 %v5164_v55  ;;  %v2705_v49 = vperm.slane %v2688_v28, 4  ;;  %v2706_v55 = vperm.slane %v2688_v28, 5 }
 0x293   :  { %4037 = vst [vmem:[#allocation6] sm:$0xff] %v3711_v25  ;;  %v2708_v25 = vperm.slane %v2688_v28, 7 }
 0x294   :  { %3989 = vmatmul.bf16.vlgmr.msrb.gmra.mxu0 %v7671_v58  ;;  %4003 = vmatmul.bf16.vlgmr.msrb.gmra.mxu1 %v7671_v58  ;;  %4038 = vst [vmem:[#allocation6 + $0x8] sm:$0xff] %v3725_v59 }
 0x295   :  { %4017 = vmatmul.bf16.vlgmr.msrb.gmra.mxu2 %v7671_v58  ;;  %4031 = vmatmul.bf16.vlgmr.msrb.gmra.mxu3 %v7671_v58  ;;  %v2697_v58 = vperm.slane %v7696_v56, 4 }
 0x297   :  { %v3738_v63 = vpop.f32.mrf.mxu2  ;;  %v3752_v0 = vpop.f32.mrf.mxu3 }
 0x298   :  { %v3739_v1 = vadd.f32 %v3738_v63, %v2695_v61  ;;  %v3753_v60 = vadd.f32 %v3752_v0, %v2696_v62  ;;  %v3712_v3 = vpop.f32.mrf.mxu0  ;;  %v3726_v38 = vpop.f32.mrf.mxu1 }
 0x299   :  { %v3713_v4 = vadd.f32 %v3712_v3, %v2693_v57  ;;  %v3727_v5 = vadd.f32 %v3726_v38, %v2694_v39 }
 0x29a   :  { %4039 = vst [vmem:[#allocation6 + $0x10] sm:$0xff] %v3739_v1 }
 0x29b   :  { %4040 = vst [vmem:[#allocation6 + $0x18] sm:$0xff] %v3753_v60 }
 0x29c   :  { %4061 = vst [vmem:[#allocation6 + $0xc0] sm:$0xff] %v3713_v4 }
 0x29d   :  { %4062 = vst [vmem:[#allocation6 + $0xc8] sm:$0xff] %v3727_v5 }
 0x29f   :  { %v3740_v50 = vpop.f32.mrf.mxu2  ;;  %v3754_v8 = vpop.f32.mrf.mxu3 }
 0x2a0   :  { %v3741_v6 = vadd.f32 %v3740_v50, %v2695_v61  ;;  %v3755_v14 = vadd.f32 %v3754_v8, %v2696_v62  ;;  %v3766_v15 = vpop.f32.mrf.mxu0  ;;  %v3780_v30 = vpop.f32.mrf.mxu1 }
 0x2a1   :  { %v3767_v36 = vadd.f32 %v3766_v15, %v2697_v58  ;;  %v3781_v26 = vadd.f32 %v3780_v30, %v2698_v19 }
 0x2a2   :  { %4063 = vst [vmem:[#allocation6 + $0xd0] sm:$0xff] %v3741_v6 }
 0x2a3   :  { %4064 = vst [vmem:[#allocation6 + $0xd8] sm:$0xff] %v3755_v14 }
 0x2a4   :  { %4041 = vst [vmem:[#allocation6 + $0x20] sm:$0xff] %v3767_v36 }
 0x2a5   :  { %4042 = vst [vmem:[#allocation6 + $0x28] sm:$0xff] %v3781_v26 }
 0x2a7   :  { %v3794_v46 = vpop.f32.mrf.mxu2  ;;  %v3808_v20 = vpop.f32.mrf.mxu3 }
 0x2a8   :  { %v3795_v24 = vadd.f32 %v3794_v46, %v2699_v17  ;;  %v3809_v11 = vadd.f32 %v3808_v20, %v2700_v27  ;;  %v3768_v29 = vpop.f32.mrf.mxu0  ;;  %v3782_v54 = vpop.f32.mrf.mxu1 }
 0x2a9   :  { %v3769_v51 = vadd.f32 %v3768_v29, %v2697_v58  ;;  %v3783_v32 = vadd.f32 %v3782_v54, %v2698_v19  ;;  %v2689_v19 = vld [vmem:[%s7733_s8 + $0x10] sm:$0xff]  ;;  %s6409_s8 = smov [#allocation6]  }
 0x2aa   :  { %4043 = vst [vmem:[#allocation6 + $0x30] sm:$0xff] %v3795_v24  ;;  %v2709_v50 = vperm.slane %v2689_v19, 0  ;;  %v2710_v8 = vperm.slane %v2689_v19, 1  ;;  %v2711_v36 = vperm.slane %v2689_v19, 2  ;;  %v2712_v26 = vperm.slane %v2689_v19, 3  ;;  %s4093_s0 = sshll.u32 %s6409_s8, 4  ;;  %s4094_s0 = int_to_ptr.vmem [resolvable:$true] %s4093_s0 }
 0x2ab   :  { %4044 = vst [vmem:[#allocation6 + $0x38] sm:$0xff] %v3809_v11 }
 0x2ac   :  { %4065 = vst [vmem:[#allocation6 + $0xe0] sm:$0xff] %v3769_v51 }
 0x2ad   :  { %4066 = vst [vmem:[#allocation6 + $0xe8] sm:$0xff] %v3783_v32 }
 0x2af   :  { %v3796_v31 = vpop.f32.mrf.mxu2  ;;  %v3810_v52 = vpop.f32.mrf.mxu3 }
 0x2b0   :  { %v3797_v37 = vadd.f32 %v3796_v31, %v2699_v17  ;;  %v3811_v40 = vadd.f32 %v3810_v52, %v2700_v27  ;;  %v2713_v52 = vperm.slane %v2689_v19, 4 }
 0x2b1   :  { %v3822_v18 = vpop.f32.mrf.mxu0  ;;  %v3836_v21 = vpop.f32.mrf.mxu1 }
 0x2b2   :  { %4067 = vst [vmem:[#allocation6 + $0xf0] sm:$0xff] %v3797_v37  ;;  %v3823_v34 = vadd.f32 %v3822_v18, %v2701_v9  ;;  %v3837_v41 = vadd.f32 %v3836_v21, %v2702_v35  ;;  %v2715_v21 = vperm.slane %v2689_v19, 6 }
 0x2b3   :  { %4068 = vst [vmem:[#allocation6 + $0xf8] sm:$0xff] %v3811_v40 }
 0x2b4   :  { %4045 = vst [vmem:[#allocation6 + $0x40] sm:$0xff] %v3823_v34  ;;  %v2716_v34 = vperm.slane %v2689_v19, 7 }
 0x2b5   :  { %4046 = vst [vmem:[#allocation6 + $0x48] sm:$0xff] %v3837_v41 }
 0x2b9   :  { %v3824_v44 = vpop.f32.mrf.mxu0  ;;  %v3838_v45 = vpop.f32.mrf.mxu1 }
 0x2ba   :  { %v3850_v22 = vpop.f32.mrf.mxu2  ;;  %v3864_v7 = vpop.f32.mrf.mxu3  ;;  %v3825_v47 = vadd.f32 %v3824_v44, %v2701_v9  ;;  %v3839_v10 = vadd.f32 %v3838_v45, %v2702_v35  ;;  %v2714_v9 = vperm.slane %v2689_v19, 5 }
 0x2bb   :  { %v3851_v13 = vadd.f32 %v3850_v22, %v2703_v42  ;;  %v3865_v43 = vadd.f32 %v3864_v7, %v2704_v53 }
 0x2bc   :  { %4069 = vst [vmem:[#allocation6 + $0x100] sm:$0xff] %v3825_v47 }
 0x2bd   :  { %4047 = vst [vmem:[#allocation6 + $0x50] sm:$0xff] %v3851_v13 }
 0x2be   :  { %4048 = vst [vmem:[#allocation6 + $0x58] sm:$0xff] %v3865_v43 }
 0x2bf   :  { %4070 = vst [vmem:[#allocation6 + $0x108] sm:$0xff] %v3839_v10 }
 0x2c2   :  { %v3852_v2 = vpop.f32.mrf.mxu2  ;;  %v3866_v16 = vpop.f32.mrf.mxu3 }
 0x2c3   :  { %v3853_v48 = vadd.f32 %v3852_v2, %v2703_v42  ;;  %v3867_v12 = vadd.f32 %v3866_v16, %v2704_v53 }
 0x2c5   :  { %4071 = vst [vmem:[#allocation6 + $0x110] sm:$0xff] %v3853_v48 }
 0x2c6   :  { %4072 = vst [vmem:[#allocation6 + $0x118] sm:$0xff] %v3867_v12 }
 0x2d1   :  { %v3878_v56 = vpop.f32.mrf.mxu0  ;;  %v3892_v57 = vpop.f32.mrf.mxu1 }
 0x2d2   :  { %v3879_v39 = vadd.f32 %v3878_v56, %v2705_v49  ;;  %v3893_v23 = vadd.f32 %v3892_v57, %v2706_v55 }
 0x2d4   :  { %4049 = vst [vmem:[#allocation6 + $0x60] sm:$0xff] %v3879_v39 }
 0x2d5   :  { %4050 = vst [vmem:[#allocation6 + $0x68] sm:$0xff] %v3893_v23 }
 0x2d9   :  { %v3880_v0 = vpop.f32.mrf.mxu0  ;;  %v3894_v1 = vpop.f32.mrf.mxu1 }
 0x2da   :  { %v3906_v59 = vpop.f32.mrf.mxu2  ;;  %v3920_v61 = vpop.f32.mrf.mxu3  ;;  %v3881_v60 = vadd.f32 %v3880_v0, %v2705_v49  ;;  %v3895_v3 = vadd.f32 %v3894_v1, %v2706_v55 }
 0x2db   :  { %v3907_v62 = vadd.f32 %v3906_v59, %v2707_v33  ;;  %v3921_v63 = vadd.f32 %v3920_v61, %v2708_v25 }
 0x2dc   :  { %4073 = vst [vmem:[#allocation6 + $0x120] sm:$0xff] %v3881_v60 }
 0x2dd   :  { %4051 = vst [vmem:[#allocation6 + $0x70] sm:$0xff] %v3907_v62 }
 0x2de   :  { %4052 = vst [vmem:[#allocation6 + $0x78] sm:$0xff] %v3921_v63 }
 0x2df   :  { %4074 = vst [vmem:[#allocation6 + $0x128] sm:$0xff] %v3895_v3 }
 0x2e2   :  { %v3908_v38 = vpop.f32.mrf.mxu2  ;;  %v3922_v4 = vpop.f32.mrf.mxu3 }
 0x2e3   :  { %v3909_v5 = vadd.f32 %v3908_v38, %v2707_v33  ;;  %v3923_v58 = vadd.f32 %v3922_v4, %v2708_v25 }
 0x2e5   :  { %4075 = vst [vmem:[#allocation6 + $0x130] sm:$0xff] %v3909_v5 }
 0x2e6   :  { %4076 = vst [vmem:[#allocation6 + $0x138] sm:$0xff] %v3923_v58 }
 0x2f1   :  { %v3934_v6 = vpop.f32.mrf.mxu0  ;;  %v3948_v14 = vpop.f32.mrf.mxu1 }
 0x2f2   :  { %v3935_v15 = vadd.f32 %v3934_v6, %v2709_v50  ;;  %v3949_v30 = vadd.f32 %v3948_v14, %v2710_v8 }
 0x2f4   :  { %4053 = vst [vmem:[#allocation6 + $0x80] sm:$0xff] %v3935_v15 }
 0x2f5   :  { %4054 = vst [vmem:[#allocation6 + $0x88] sm:$0xff] %v3949_v30 }
 0x2f9   :  { %v3936_v24 = vpop.f32.mrf.mxu0  ;;  %v3950_v11 = vpop.f32.mrf.mxu1 }
 0x2fa   :  { %v3962_v17 = vpop.f32.mrf.mxu2  ;;  %v3976_v27 = vpop.f32.mrf.mxu3  ;;  %v3937_v29 = vadd.f32 %v3936_v24, %v2709_v50  ;;  %v3951_v54 = vadd.f32 %v3950_v11, %v2710_v8 }
 0x2fb   :  { %v3963_v46 = vadd.f32 %v3962_v17, %v2711_v36  ;;  %v3977_v20 = vadd.f32 %v3976_v27, %v2712_v26 }
 0x2fc   :  { %4077 = vst [vmem:[#allocation6 + $0x140] sm:$0xff] %v3937_v29 }
 0x2fd   :  { %4055 = vst [vmem:[#allocation6 + $0x90] sm:$0xff] %v3963_v46 }
 0x2fe   :  { %4056 = vst [vmem:[#allocation6 + $0x98] sm:$0xff] %v3977_v20 }
 0x2ff   :  { %4078 = vst [vmem:[#allocation6 + $0x148] sm:$0xff] %v3951_v54 }
 0x302   :  { %v3964_v51 = vpop.f32.mrf.mxu2  ;;  %v3978_v32 = vpop.f32.mrf.mxu3 }
 0x303   :  { %v3965_v28 = vadd.f32 %v3964_v51, %v2711_v36  ;;  %v3979_v31 = vadd.f32 %v3978_v32, %v2712_v26 }
 0x305   :  { %4079 = vst [vmem:[#allocation6 + $0x150] sm:$0xff] %v3965_v28 }
 0x306   :  { %4080 = vst [vmem:[#allocation6 + $0x158] sm:$0xff] %v3979_v31 }
 0x311   :  { %v3990_v35 = vpop.f32.mrf.mxu0  ;;  %v4004_v37 = vpop.f32.mrf.mxu1 }
 0x312   :  { %v3991_v40 = vadd.f32 %v3990_v35, %v2713_v52  ;;  %v4005_v18 = vadd.f32 %v4004_v37, %v2714_v9 }
 0x314   :  { %4057 = vst [vmem:[#allocation6 + $0xa0] sm:$0xff] %v3991_v40 }
 0x315   :  { %4058 = vst [vmem:[#allocation6 + $0xa8] sm:$0xff] %v4005_v18 }
 0x318   :  { %v4018_v41 = vpop.f32.mrf.mxu2  ;;  %v4032_v42 = vpop.f32.mrf.mxu3 }
 0x319   :  { %v4019_v53 = vadd.f32 %v4018_v41, %v2715_v21  ;;  %v4033_v22 = vadd.f32 %v4032_v42, %v2716_v34  ;;  %v3992_v7 = vpop.f32.mrf.mxu0  ;;  %v4006_v13 = vpop.f32.mrf.mxu1 }
 0x31a   :  { %v3993_v43 = vadd.f32 %v3992_v7, %v2713_v52  ;;  %v4007_v44 = vadd.f32 %v4006_v13, %v2714_v9 }
 0x31b   :  { %4059 = vst [vmem:[#allocation6 + $0xb0] sm:$0xff] %v4019_v53 }
 0x31c   :  { %4060 = vst [vmem:[#allocation6 + $0xb8] sm:$0xff] %v4033_v22 }
 0x31d   :  { %4081 = vst [vmem:[#allocation6 + $0x160] sm:$0xff] %v3993_v43 }
 0x31e   :  { %4082 = vst [vmem:[#allocation6 + $0x168] sm:$0xff] %v4007_v44 }
 0x320   :  { %v4020_v45 = vpop.f32.mrf.mxu2  ;;  %v4034_v47 = vpop.f32.mrf.mxu3 }
 0x321   :  { %v4021_v10 = vadd.f32 %v4020_v45, %v2715_v21  ;;  %v4035_v2 = vadd.f32 %v4034_v47, %v2716_v34 }
 0x323   :  { %4083 = vst [vmem:[#allocation6 + $0x170] sm:$0xff] %v4021_v10 }
 0x324   :  { %4084 = vst [vmem:[#allocation6 + $0x178] sm:$0xff] %v4035_v2 }
 0x325   :  { %4101 = dma.vmem_to_hbm [thread:$0]  %s4094_s0, 6144, %s4096_s24, [#allocation5], %s6410_s25, %s6410_s25, %s6411_s4  }
 0x326   :  { %6398 = dma.done.wait [#allocation5], 6144  }
 0x327   :  { %6399 = vsyncadd [#allocation5], 4294961152 }
 0x328   :  { %6400 = dma.done.wait [#allocation8], 512  }
 0x329   :  { %6401 = vsyncadd [#allocation8], 4294966784 }
 0x32a   :  { %4140 = vsyncpa [#allocation4], 1 }
 0x32b   :  { %4141 = vsyncpa [#allocation5], 1 }
 0x32c   :  { %4142 = vsyncpa [#allocation8], 1 }

</bundles_post_ra>
